<compile_context>
chip_gen: v5e
topology: v5e:2x2
jax: 0.10.0
libtpu: 0.0.40
codegen_flags: <defaults>
</compile_context>

<pallas_src>
import functools

import jax
import jax.numpy as jnp
from jax.experimental import pallas as pl
from jax.experimental.pallas import tpu as pltpu


_LANE = 128
_VMEM_LIMIT = 48 * 1024 * 1024   # safe on v7x (64 MiB physical); raise on v5e/v6e if needed


def _round_up(x, m):
    return (x + m - 1) // m * m


def _const_spec(shape):
    """Grid-invariant VMEM block: constant index_map, single-buffered."""
    zeros = (0,) * len(shape)
    return pl.BlockSpec(shape, lambda b: zeros, pipeline_mode=pl.Buffered(1))


def _pad_kmajor(p, K, n_real, n_pad):
    """(R, K*n_real) -> (R, K*n_pad) in the K-major flattened layout, zero padded."""
    R = p.shape[0]
    p = p.reshape(R, K, n_real)
    p = jnp.pad(p, ((0, 0), (0, 0), (0, n_pad - n_real)))
    return p.reshape(R, K * n_pad)


# ----------------------------------------------------------------------------
# Pallas kernels
# ----------------------------------------------------------------------------
def _molconv_kernel(dist_ref, gm2_ref, fc_ref, fn_ref, mask_ref,
                    wd_ref, wg_ref, gg_ref, bg_ref,
                    wu_ref, gu_ref, bu_ref,
                    out_ref, *, n_real, n_pad, k_nbr, bb, eps=1e-5):
    dist = dist_ref[...]              # (BB, 1, K*Np) f32, zero in padded columns
    gm2 = gm2_ref[...]                # (BB, K, K*Np)
    fc = fc_ref[...]                  # (BB, C, Np)    center features (stored once)
    fn = fn_ref[...]                  # (BB, C, K*Np)  gathered neighbour features
    mask = mask_ref[...]              # (BB, 1, Np)    0/1 point mask (0 in padding)

    # --- gates: dist_ff (scalar 1x1 conv, SMEM scalar) and gm2m_ff (k->1 conv as a
    #     sublane reduce); the two gate LayerNorms are fused into one stats pass. ---
    d = dist * wd_ref[0, 0]                                          # (BB,1,KNp)
    g = jnp.sum(gm2 * wg_ref[...], axis=1, keepdims=True)            # (BB,1,KNp) XLU reduce
    dg = jnp.concatenate([d, g], axis=1)                             # (BB,2,KNp)

    inv_gate = 1.0 / float(k_nbr * n_real)   # padded columns are exactly zero -> exact stats
    mu = jnp.sum(dg, axis=2, keepdims=True) * inv_gate               # (BB,2,1)
    var = jnp.maximum(jnp.sum(dg * dg, axis=2, keepdims=True) * inv_gate - mu * mu, 0.0)
    w12 = jax.nn.sigmoid((dg - mu) * jax.lax.rsqrt(var + eps) * gg_ref[...] + bg_ref[...])
    w = w12[:, 0:1, :] * w12[:, 1:2, :]                              # (BB,1,KNp)

    # --- gated mix of neighbour / center features (center tiled K times in VMEM) ---
    fc_t = jnp.concatenate([fc] * k_nbr, axis=-1)                    # (BB,C,KNp)
    f = fc_t + w * (fn - fc_t)                                       # broadcast over C

    wu = wu_ref[...]                  # (Cout, C) bf16 (cast once in the wrapper)
    gu = gu_ref[...]                  # (Cout, KNp) f32
    bu = bu_ref[...]
    c_out = wu.shape[0]
    inv_up = 1.0 / float(c_out * k_nbr * n_real)

    for b in range(bb):               # per-sample 2-D MXU matmul + LayerNorm
        # update_ff: 1x1 conv (C -> Cout), bf16 operands, f32 accumulation
        u = jnp.dot(wu, f[b].astype(jnp.bfloat16),
                    preferred_element_type=jnp.float32)              # (Cout, KNp)
        mu_u = jnp.sum(u) * inv_up
        var_u = jnp.maximum(jnp.sum(u * u) * inv_up - mu_u * mu_u, 0.0)
        u = (u - mu_u) * jax.lax.rsqrt(var_u + eps) * gu + bu
        u = jnp.where(u >= 0.0, u, 0.02 * u)                         # LeakyReLU(0.02)

        # mean over k neighbours: K lane-aligned slices (Np is a multiple of 128)
        acc = u[:, 0:n_pad]
        for kk in range(1, k_nbr):
            acc = acc + u[:, kk * n_pad:(kk + 1) * n_pad]
        out_ref[b] = acc * (1.0 / k_nbr) * mask[b]                   # (Cout, Np), masked


def _head_kernel(x_ref, mask_ref, wct_ref, g_ref, b_ref, out_ref,
                 *, n_real, bb, eps=1e-5):
    wct = wct_ref[...]                # (E, E) bf16 (transposed Conv1d weight)
    gT = g_ref[...]                   # (Np, E) f32 (transposed LN gamma, zero padded)
    bT = b_ref[...]
    E = wct.shape[1]
    inv_cnt = 1.0 / float(E * n_real)

    pooled = []
    for b in range(bb):
        xb = x_ref[b]                 # (Np, E) bf16
        mb = mask_ref[b]              # (Np, 1) f32, zero at invalid & padded rows

        # Conv1d(E, E, 1, bias=False) on the MXU
        y = jnp.dot(xb, wct, preferred_element_type=jnp.float32)     # (Np, E)

        # LayerNorm((E, N)): padded rows are exactly zero (zero input, no bias),
        # so plain sums with the real element count are exact.
        mu = jnp.sum(y) * inv_cnt
        var = jnp.maximum(jnp.sum(y * y) * inv_cnt - mu * mu, 0.0)
        y = (y - mu) * jax.lax.rsqrt(var + eps) * gT + bT
        y = jnp.where(y >= 0.0, y, 0.2 * y)                          # LeakyReLU(0.2)

        # masked max-pool + masked mean-pool over points (sublane reductions)
        y_max = jnp.max(jnp.where(mb > 0.5, y, -jnp.inf), axis=0, keepdims=True)  # (1,E)
        cnt = jnp.maximum(jnp.sum(mb), 0.1)
        y_avg = jnp.sum(y * mb, axis=0, keepdims=True) / cnt                      # (1,E)
        pooled.append(y_max + y_avg)

    out_ref[0] = jnp.concatenate(pooled, axis=0)    # (BB, E): one dense store


# ----------------------------------------------------------------------------
# Pallas wrappers
# ----------------------------------------------------------------------------
def molconv3_pallas(dist_f, gm2_f, fc_p, fn_f, mask_p, lp, N, Np, K, BB):
    B, C, _ = fc_p.shape
    KNp = K * Np
    Cout = lp["Wu"].shape[0]

    # wrapper-side weight prep: bf16 MXU weight, padded/fused LN affines, Wg column
    wu16 = lp["Wu"].astype(jnp.bfloat16)
    wg_col = lp["Wg"].reshape(K, 1)
    g_gate = jnp.concatenate([_pad_kmajor(lp["gd"], K, N, Np),
                              _pad_kmajor(lp["gg"], K, N, Np)], axis=0)   # (2, KNp)
    b_gate = jnp.concatenate([_pad_kmajor(lp["bd"], K, N, Np),
                              _pad_kmajor(lp["bg"], K, N, Np)], axis=0)
    gu = _pad_kmajor(lp["gu"], K, N, Np)
    bu = _pad_kmajor(lp["bu"], K, N, Np)

    kernel = functools.partial(_molconv_kernel, n_real=N, n_pad=Np, k_nbr=K, bb=BB)

    return pl.pallas_call(
        kernel,
        out_shape=jax.ShapeDtypeStruct((B, Cout, Np), jnp.float32),
        grid=(B // BB,),
        in_specs=[
            pl.BlockSpec((BB, 1, KNp), lambda b: (b, 0, 0)),   # dist
            pl.BlockSpec((BB, K, KNp), lambda b: (b, 0, 0)),   # gm2
            pl.BlockSpec((BB, C, Np), lambda b: (b, 0, 0)),    # center feats (not duplicated)
            pl.BlockSpec((BB, C, KNp), lambda b: (b, 0, 0)),   # neighbour feats
            pl.BlockSpec((BB, 1, Np), lambda b: (b, 0, 0)),    # mask
            pl.BlockSpec(memory_space=pltpu.MemorySpace.SMEM),  # Wd scalar
            _const_spec((K, 1)),                               # Wg column
            _const_spec((2, KNp)),                             # fused gate LN gamma
            _const_spec((2, KNp)),                             # fused gate LN beta
            _const_spec((Cout, C)),                            # Wu (bf16)
            _const_spec((Cout, KNp)),                          # gu
            _const_spec((Cout, KNp)),                          # bu
        ],
        out_specs=pl.BlockSpec((BB, Cout, Np), lambda b: (b, 0, 0)),
        compiler_params=pltpu.CompilerParams(
            dimension_semantics=("parallel",),
            vmem_limit_bytes=_VMEM_LIMIT),
    )(dist_f, gm2_f, fc_p, fn_f, mask_p,
      lp["Wd"], wg_col, g_gate, b_gate, wu16, gu, bu)


def encoder_head_pallas(xT, maskT, hp, N, Np, BB):
    B, _, E = xT.shape
    wcT16 = jnp.transpose(hp["Wc"]).astype(jnp.bfloat16)                 # (E, E)
    gT = jnp.pad(jnp.transpose(hp["gamma"]), ((0, Np - N), (0, 0)))      # (Np, E)
    bT = jnp.pad(jnp.transpose(hp["beta"]), ((0, Np - N), (0, 0)))

    kernel = functools.partial(_head_kernel, n_real=N, bb=BB)
    out = pl.pallas_call(
        kernel,
        out_shape=jax.ShapeDtypeStruct((B // BB, BB, E), jnp.float32),
        grid=(B // BB,),
        in_specs=[
            pl.BlockSpec((BB, Np, E), lambda b: (b, 0, 0)),
            pl.BlockSpec((BB, Np, 1), lambda b: (b, 0, 0)),
            _const_spec((E, E)),
            _const_spec((Np, E)),
            _const_spec((Np, E)),
        ],
        out_specs=pl.BlockSpec((1, BB, E), lambda b: (b, 0, 0)),
        compiler_params=pltpu.CompilerParams(
            dimension_semantics=("parallel",),
            vmem_limit_bytes=_VMEM_LIMIT),
    )(xT, maskT, wcT16, gT, bT)
    return out.reshape(B, E)


# ----------------------------------------------------------------------------
# JAX glue: knn / gather / gram features (data-dependent gather stays in XLA)
# ----------------------------------------------------------------------------
def generate_feat(x, idx_base, k, n_pad, remove_xyz):
    """Port of MolConv._generate_feat; K-major / N-innermost flattening, zero padded to n_pad."""
    B, C, N = x.shape
    xt = jnp.transpose(x, (0, 2, 1))                           # (B, N, C)
    inner = -2.0 * jnp.matmul(xt, x)                           # (B, N, N)
    xx = jnp.sum(x * x, axis=1, keepdims=True)                 # (B, 1, N)
    pairwise = -xx - inner - jnp.transpose(xx, (0, 2, 1))      # -||xi-xj||^2
    neg_d, idx = jax.lax.top_k(pairwise, k)                    # (B, N, k)
    dist = -neg_d

    idx = idx + idx_base.astype(idx.dtype)                     # flat-gather indices
    x_flat = xt.reshape(B * N, C)
    graph_feat = x_flat[idx.reshape(-1)].reshape(B, N, k, C)   # neighbour feats

    # double gram matrix, L2-normalized over the point axis (F.normalize dim=1)
    gm = jnp.matmul(graph_feat, jnp.transpose(graph_feat, (0, 1, 3, 2)))   # (B,N,k,k)
    sub = gm[:, :, :, 0:1]
    sub_gm = jnp.matmul(sub, jnp.transpose(sub, (0, 1, 3, 2)))             # (B,N,k,k)
    norm = jnp.sqrt(jnp.sum(sub_gm * sub_gm, axis=1, keepdims=True))
    sub_gm = sub_gm / jnp.maximum(norm, 1e-12)

    pad4 = ((0, 0), (0, 0), (0, 0), (0, n_pad - N))
    dist_f = jnp.pad(jnp.transpose(dist, (0, 2, 1)),
                     ((0, 0), (0, 0), (0, n_pad - N))).reshape(B, 1, k * n_pad)
    gm2_f = jnp.pad(jnp.transpose(sub_gm, (0, 3, 2, 1)), pad4).reshape(B, k, k * n_pad)
    if remove_xyz:
        fn = graph_feat[..., 3:]
        fc = x[:, 3:, :]
    else:
        fn = graph_feat
        fc = x
    fn_f = jnp.pad(jnp.transpose(fn, (0, 3, 2, 1)), pad4).reshape(B, fn.shape[-1], k * n_pad)
    fc_p = jnp.pad(fc, ((0, 0), (0, 0), (0, n_pad - N)))       # center feats once, (B, C, Np)
    return dist_f, gm2_f, fc_p, fn_f


def init_params(key, in_dim, layers, emb_dim, N, K):
    KN = K * N   # LayerNorm affines stored in the real (unpadded) K-major layout
    keys = jax.random.split(key, len(layers) + 1)
    params = {"layers": []}
    cin = in_dim
    for i, cout in enumerate(layers):
        C = cin - 3 if i == 0 else cin            # remove_xyz on first layer
        kk = jax.random.split(keys[i], 3)
        params["layers"].append({
            "Wd": 0.5 + 0.1 * jax.random.normal(kk[0], (1, 1), jnp.float32),
            "Wg": 0.1 * jax.random.normal(kk[1], (1, K), jnp.float32),
            "gd": jnp.ones((1, KN), jnp.float32), "bd": jnp.zeros((1, KN), jnp.float32),
            "gg": jnp.ones((1, KN), jnp.float32), "bg": jnp.zeros((1, KN), jnp.float32),
            "Wu": 0.1 * jax.random.normal(kk[2], (cout, C), jnp.float32),
            "gu": jnp.ones((cout, KN), jnp.float32), "bu": jnp.zeros((cout, KN), jnp.float32),
        })
        cin = cout
    params["head"] = {
        "Wc": 0.1 * jax.random.normal(keys[-1], (emb_dim, emb_dim), jnp.float32),
        "gamma": jnp.ones((emb_dim, N), jnp.float32),
        "beta": jnp.zeros((emb_dim, N), jnp.float32),
    }
    return params


@functools.partial(jax.jit, static_argnames=("N", "K", "BB"))
def encoder_forward(params, x, idx_base, mask, N, K, BB):
    B = x.shape[0]
    assert B % BB == 0
    Np = _round_up(N, _LANE)
    mask_p = jnp.pad(mask.astype(jnp.float32).reshape(B, 1, N),
                     ((0, 0), (0, 0), (0, Np - N)))

    xs = []
    inp = x
    for i, lp in enumerate(params["layers"]):
        dist_f, gm2_f, fc_p, fn_f = generate_feat(inp, idx_base, K, Np,
                                                  remove_xyz=(i == 0))
        out = molconv3_pallas(dist_f, gm2_f, fc_p, fn_f, mask_p, lp, N, Np, K, BB)
        xs.append(out)
        inp = out[:, :, :N]                       # unpadded features feed the next knn

    xcat = jnp.concatenate(xs, axis=1)            # (B, E, Np), zero at padded/masked cols
    xT = jnp.transpose(xcat, (0, 2, 1)).astype(jnp.bfloat16)   # bf16 MXU operand, cast once
    maskT = jnp.transpose(mask_p, (0, 2, 1))      # (B, Np, 1)
    return encoder_head_pallas(xT, maskT, params["head"], N, Np, BB)


if __name__ == "__main__":
    B, IN_DIM, N, K = 4, 8, 16, 4
    LAYERS = [8, 16]
    EMB = sum(LAYERS)                             # concat of layer outputs
    BB = 2                                        # samples per grid step (grid length 2, even)

    key = jax.random.PRNGKey(0)
    kx, kp = jax.random.split(key)
    x = jax.random.normal(kx, (B, IN_DIM, N), dtype=jnp.float32)
    idx_base = (jnp.arange(B, dtype=jnp.int32) * N).reshape(B, 1, 1)
    valid = jnp.array([12, 9, 16, 5], dtype=jnp.int32)
    mask = jnp.arange(N, dtype=jnp.int32)[None, :] < valid[:, None]   # (B, N) bool

    params = init_params(kp, IN_DIM, LAYERS, EMB, N, K)
    out = encoder_forward(params, x, idx_base, mask, N=N, K=K, BB=BB)
    out = jax.block_until_ready(out)

    assert out.shape == (B, EMB), out.shape
    assert bool(jnp.all(jnp.isfinite(out)))
    print("KERNEL_OK")
</pallas_src>

<mosaic_0001>
module attributes {stable_mosaic.version = 11 : i64} {
  func.func @_molconv_kernel(%arg0: i32, %arg1: memref<2x1x512xf32, #tpu.memory_space<vmem>>, %arg2: memref<2x4x512xf32, #tpu.memory_space<vmem>>, %arg3: memref<2x5x128xf32, #tpu.memory_space<vmem>>, %arg4: memref<2x5x512xf32, #tpu.memory_space<vmem>>, %arg5: memref<2x1x128xf32, #tpu.memory_space<vmem>>, %arg6: memref<1x1xf32, #tpu.memory_space<smem>>, %arg7: memref<4x1xf32, #tpu.memory_space<vmem>>, %arg8: memref<2x512xf32, #tpu.memory_space<vmem>>, %arg9: memref<2x512xf32, #tpu.memory_space<vmem>>, %arg10: memref<8x5xbf16, #tpu.memory_space<vmem>>, %arg11: memref<8x512xf32, #tpu.memory_space<vmem>>, %arg12: memref<8x512xf32, #tpu.memory_space<vmem>>, %arg13: memref<2x8x128xf32, #tpu.memory_space<vmem>>) attributes {dimension_semantics = [#tpu.dimension_semantics<parallel>], iteration_bounds = array<i64: 2>, scalar_prefetch = 0 : i64, scratch_operands = 0 : i64, tpu.core_type = #tpu.core_type<tc>, window_params = [{transform_indices = @transform_0, window_bounds = array<i64: 2, 1, 512>}, {transform_indices = @transform_1, window_bounds = array<i64: 2, 4, 512>}, {transform_indices = @transform_2, window_bounds = array<i64: 2, 5, 128>}, {transform_indices = @transform_3, window_bounds = array<i64: 2, 5, 512>}, {transform_indices = @transform_4, window_bounds = array<i64: 2, 1, 128>}, {transform_indices = @transform_5, window_bounds = array<i64: 1, 1>}, {pipeline_mode = #tpu.pipeline_mode<synchronous>, transform_indices = @transform_6, window_bounds = array<i64: 4, 1>}, {pipeline_mode = #tpu.pipeline_mode<synchronous>, transform_indices = @transform_7, window_bounds = array<i64: 2, 512>}, {pipeline_mode = #tpu.pipeline_mode<synchronous>, transform_indices = @transform_8, window_bounds = array<i64: 2, 512>}, {pipeline_mode = #tpu.pipeline_mode<synchronous>, transform_indices = @transform_9, window_bounds = array<i64: 8, 5>}, {pipeline_mode = #tpu.pipeline_mode<synchronous>, transform_indices = @transform_10, window_bounds = array<i64: 8, 512>}, {pipeline_mode = #tpu.pipeline_mode<synchronous>, transform_indices = @transform_11, window_bounds = array<i64: 8, 512>}, {transform_indices = @transform_12, window_bounds = array<i64: 2, 8, 128>}]} {
    %c0 = arith.constant 0 : index
    %c0_0 = arith.constant 0 : index
    %c0_1 = arith.constant 0 : index
    %0 = vector.load %arg1[%c0, %c0_0, %c0_1] : memref<2x1x512xf32, #tpu.memory_space<vmem>>, vector<2x1x512xf32>
    %c0_2 = arith.constant 0 : index
    %c0_3 = arith.constant 0 : index
    %c0_4 = arith.constant 0 : index
    %1 = vector.load %arg2[%c0_2, %c0_3, %c0_4] : memref<2x4x512xf32, #tpu.memory_space<vmem>>, vector<2x4x512xf32>
    %c0_5 = arith.constant 0 : index
    %c0_6 = arith.constant 0 : index
    %c0_7 = arith.constant 0 : index
    %2 = vector.load %arg3[%c0_5, %c0_6, %c0_7] : memref<2x5x128xf32, #tpu.memory_space<vmem>>, vector<2x5x128xf32>
    %c0_8 = arith.constant 0 : index
    %c0_9 = arith.constant 0 : index
    %c0_10 = arith.constant 0 : index
    %3 = vector.load %arg4[%c0_8, %c0_9, %c0_10] : memref<2x5x512xf32, #tpu.memory_space<vmem>>, vector<2x5x512xf32>
    %c0_11 = arith.constant 0 : index
    %c0_12 = arith.constant 0 : index
    %c0_13 = arith.constant 0 : index
    %4 = vector.load %arg5[%c0_11, %c0_12, %c0_13] : memref<2x1x128xf32, #tpu.memory_space<vmem>>, vector<2x1x128xf32>
    %c0_14 = arith.constant 0 : index
    %c0_15 = arith.constant 0 : index
    %5 = memref.load %arg6[%c0_14, %c0_15] : memref<1x1xf32, #tpu.memory_space<smem>>
    %6 = vector.broadcast %5 : f32 to vector<2x1x512xf32>
    %7 = arith.mulf %0, %6 : vector<2x1x512xf32>
    %c0_16 = arith.constant 0 : index
    %c0_17 = arith.constant 0 : index
    %8 = vector.load %arg7[%c0_16, %c0_17] : memref<4x1xf32, #tpu.memory_space<vmem>>, vector<4x1xf32>
    %9 = vector.shape_cast %8 : vector<4x1xf32> to vector<1x4x1xf32>
    %10 = vector.broadcast %9 : vector<1x4x1xf32> to vector<2x4x512xf32>
    %11 = arith.mulf %1, %10 : vector<2x4x512xf32>
    %cst = arith.constant dense<0.000000e+00> : vector<2x512xf32>
    %12 = vector.multi_reduction <add>, %11, %cst [1] : vector<2x4x512xf32> to vector<2x512xf32>
    %13 = vector.shape_cast %12 : vector<2x512xf32> to vector<2x1x512xf32>
    %14 = tpu.concatenate %7, %13 in 1 : vector<2x1x512xf32>, vector<2x1x512xf32> -> vector<2x2x512xf32>
    %cst_18 = arith.constant dense<0.000000e+00> : vector<2x2xf32>
    %15 = vector.multi_reduction <add>, %14, %cst_18 [2] : vector<2x2x512xf32> to vector<2x2xf32>
    %16 = vector.shape_cast %15 : vector<2x2xf32> to vector<2x2x1xf32>
    %cst_19 = arith.constant 1.562500e-02 : f32
    %17 = vector.broadcast %cst_19 : f32 to vector<2x2x1xf32>
    %18 = arith.mulf %16, %17 : vector<2x2x1xf32>
    %19 = arith.mulf %14, %14 : vector<2x2x512xf32>
    %cst_20 = arith.constant dense<0.000000e+00> : vector<2x2xf32>
    %20 = vector.multi_reduction <add>, %19, %cst_20 [2] : vector<2x2x512xf32> to vector<2x2xf32>
    %21 = vector.shape_cast %20 : vector<2x2xf32> to vector<2x2x1xf32>
    %cst_21 = arith.constant 1.562500e-02 : f32
    %22 = vector.broadcast %cst_21 : f32 to vector<2x2x1xf32>
    %23 = arith.mulf %21, %22 : vector<2x2x1xf32>
    %24 = arith.mulf %18, %18 : vector<2x2x1xf32>
    %25 = arith.subf %23, %24 : vector<2x2x1xf32>
    %cst_22 = arith.constant 0.000000e+00 : f32
    %26 = vector.broadcast %cst_22 : f32 to vector<2x2x1xf32>
    %27 = arith.maximumf %25, %26 : vector<2x2x1xf32>
    %28 = vector.broadcast %18 : vector<2x2x1xf32> to vector<2x2x512xf32>
    %29 = arith.subf %14, %28 : vector<2x2x512xf32>
    %cst_23 = arith.constant 9.99999974E-6 : f32
    %30 = vector.broadcast %cst_23 : f32 to vector<2x2x1xf32>
    %31 = arith.addf %27, %30 : vector<2x2x1xf32>
    %32 = math.rsqrt %31 : vector<2x2x1xf32>
    %33 = vector.broadcast %32 : vector<2x2x1xf32> to vector<2x2x512xf32>
    %34 = arith.mulf %29, %33 : vector<2x2x512xf32>
    %c0_24 = arith.constant 0 : index
    %c0_25 = arith.constant 0 : index
    %35 = vector.load %arg8[%c0_24, %c0_25] : memref<2x512xf32, #tpu.memory_space<vmem>>, vector<2x512xf32>
    %36 = vector.shape_cast %35 : vector<2x512xf32> to vector<1x2x512xf32>
    %37 = vector.broadcast %36 : vector<1x2x512xf32> to vector<2x2x512xf32>
    %38 = arith.mulf %34, %37 : vector<2x2x512xf32>
    %c0_26 = arith.constant 0 : index
    %c0_27 = arith.constant 0 : index
    %39 = vector.load %arg9[%c0_26, %c0_27] : memref<2x512xf32, #tpu.memory_space<vmem>>, vector<2x512xf32>
    %40 = vector.shape_cast %39 : vector<2x512xf32> to vector<1x2x512xf32>
    %41 = vector.broadcast %40 : vector<1x2x512xf32> to vector<2x2x512xf32>
    %42 = arith.addf %38, %41 : vector<2x2x512xf32>
    %43 = arith.negf %42 : vector<2x2x512xf32>
    %44 = math.exp %43 : vector<2x2x512xf32>
    %cst_28 = arith.constant 1.000000e+00 : f32
    %45 = vector.broadcast %cst_28 : f32 to vector<2x2x512xf32>
    %46 = arith.addf %45, %44 : vector<2x2x512xf32>
    %47 = arith.divf %45, %46 : vector<2x2x512xf32>
    %48 = vector.extract_strided_slice %47 {offsets = [0, 0, 0], sizes = [2, 1, 512], strides = [1, 1, 1]} : vector<2x2x512xf32> to vector<2x1x512xf32>
    %49 = vector.extract_strided_slice %47 {offsets = [0, 1, 0], sizes = [2, 1, 512], strides = [1, 1, 1]} : vector<2x2x512xf32> to vector<2x1x512xf32>
    %50 = arith.mulf %48, %49 : vector<2x1x512xf32>
    %51 = tpu.concatenate %2, %2, %2, %2 in 2 : vector<2x5x128xf32>, vector<2x5x128xf32>, vector<2x5x128xf32>, vector<2x5x128xf32> -> vector<2x5x512xf32>
    %52 = arith.subf %3, %51 : vector<2x5x512xf32>
    %53 = vector.broadcast %50 : vector<2x1x512xf32> to vector<2x5x512xf32>
    %54 = arith.mulf %53, %52 : vector<2x5x512xf32>
    %55 = arith.addf %51, %54 : vector<2x5x512xf32>
    %c0_29 = arith.constant 0 : index
    %c0_30 = arith.constant 0 : index
    %56 = vector.load %arg10[%c0_29, %c0_30] : memref<8x5xbf16, #tpu.memory_space<vmem>>, vector<8x5xbf16>
    %c0_31 = arith.constant 0 : index
    %c0_32 = arith.constant 0 : index
    %57 = vector.load %arg11[%c0_31, %c0_32] : memref<8x512xf32, #tpu.memory_space<vmem>>, vector<8x512xf32>
    %c0_33 = arith.constant 0 : index
    %c0_34 = arith.constant 0 : index
    %58 = vector.load %arg12[%c0_33, %c0_34] : memref<8x512xf32, #tpu.memory_space<vmem>>, vector<8x512xf32>
    %59 = vector.extract_strided_slice %55 {offsets = [0, 0, 0], sizes = [1, 5, 512], strides = [1, 1, 1]} : vector<2x5x512xf32> to vector<1x5x512xf32>
    %60 = vector.shape_cast %59 : vector<1x5x512xf32> to vector<5x512xf32>
    %61 = arith.truncf %60 : vector<5x512xf32> to vector<5x512xbf16>
    %cst_35 = arith.constant dense<0.000000e+00> : vector<8x512xf32>
    %62 = tpu.matmul %56, %61, %cst_35 {dimension_numbers = #tpu.dot_dimension_numbers<[1], [0], [0], [1], [0, 0, 1, 1], [], []>} : vector<8x5xbf16>, vector<5x512xbf16>, vector<8x512xf32> -> vector<8x512xf32>
    %63 = vector.shape_cast %62 : vector<8x512xf32> to vector<1x8x512xf32>
    %cst_36 = arith.constant dense<0.000000e+00> : vector<1xf32>
    %64 = vector.multi_reduction <add>, %63, %cst_36 [1, 2] : vector<1x8x512xf32> to vector<1xf32>
    %65 = vector.shape_cast %64 : vector<1xf32> to vector<1x1x1xf32>
    %66 = vector.extract %65[0, 0, 0] : f32 from vector<1x1x1xf32>
    %cst_37 = arith.constant 0.001953125 : f32
    %67 = arith.mulf %66, %cst_37 : f32
    %68 = arith.mulf %62, %62 : vector<8x512xf32>
    %69 = vector.shape_cast %68 : vector<8x512xf32> to vector<1x8x512xf32>
    %cst_38 = arith.constant dense<0.000000e+00> : vector<1xf32>
    %70 = vector.multi_reduction <add>, %69, %cst_38 [1, 2] : vector<1x8x512xf32> to vector<1xf32>
    %71 = vector.shape_cast %70 : vector<1xf32> to vector<1x1x1xf32>
    %72 = vector.extract %71[0, 0, 0] : f32 from vector<1x1x1xf32>
    %cst_39 = arith.constant 0.001953125 : f32
    %73 = arith.mulf %72, %cst_39 : f32
    %74 = arith.mulf %67, %67 : f32
    %75 = arith.subf %73, %74 : f32
    %cst_40 = arith.constant 0.000000e+00 : f32
    %76 = arith.maximumf %75, %cst_40 : f32
    %77 = vector.broadcast %67 : f32 to vector<8x512xf32>
    %78 = arith.subf %62, %77 : vector<8x512xf32>
    %cst_41 = arith.constant 9.99999974E-6 : f32
    %79 = arith.addf %76, %cst_41 : f32
    %80 = math.rsqrt %79 : f32
    %81 = vector.broadcast %80 : f32 to vector<8x512xf32>
    %82 = arith.mulf %78, %81 : vector<8x512xf32>
    %83 = arith.mulf %82, %57 : vector<8x512xf32>
    %84 = arith.addf %83, %58 : vector<8x512xf32>
    %cst_42 = arith.constant 0.000000e+00 : f32
    %85 = vector.broadcast %cst_42 : f32 to vector<8x512xf32>
    %86 = arith.cmpf oge, %84, %85 : vector<8x512xf32>
    %cst_43 = arith.constant 2.000000e-02 : f32
    %87 = vector.broadcast %cst_43 : f32 to vector<8x512xf32>
    %88 = arith.mulf %87, %84 : vector<8x512xf32>
    %89 = arith.select %86, %84, %88 : vector<8x512xi1>, vector<8x512xf32>
    %90 = vector.extract_strided_slice %89 {offsets = [0, 0], sizes = [8, 128], strides = [1, 1]} : vector<8x512xf32> to vector<8x128xf32>
    %91 = vector.extract_strided_slice %89 {offsets = [0, 128], sizes = [8, 128], strides = [1, 1]} : vector<8x512xf32> to vector<8x128xf32>
    %92 = arith.addf %90, %91 : vector<8x128xf32>
    %93 = vector.extract_strided_slice %89 {offsets = [0, 256], sizes = [8, 128], strides = [1, 1]} : vector<8x512xf32> to vector<8x128xf32>
    %94 = arith.addf %92, %93 : vector<8x128xf32>
    %95 = vector.extract_strided_slice %89 {offsets = [0, 384], sizes = [8, 128], strides = [1, 1]} : vector<8x512xf32> to vector<8x128xf32>
    %96 = arith.addf %94, %95 : vector<8x128xf32>
    %cst_44 = arith.constant 2.500000e-01 : f32
    %97 = vector.broadcast %cst_44 : f32 to vector<8x128xf32>
    %98 = arith.mulf %96, %97 : vector<8x128xf32>
    %99 = vector.extract_strided_slice %4 {offsets = [0, 0, 0], sizes = [1, 1, 128], strides = [1, 1, 1]} : vector<2x1x128xf32> to vector<1x1x128xf32>
    %100 = vector.shape_cast %99 : vector<1x1x128xf32> to vector<1x128xf32>
    %101 = vector.broadcast %100 : vector<1x128xf32> to vector<8x128xf32>
    %102 = arith.mulf %98, %101 : vector<8x128xf32>
    %c0_45 = arith.constant 0 : index
    %c0_46 = arith.constant 0 : index
    %c0_47 = arith.constant 0 : index
    %103 = vector.load %arg13[%c0_45, %c0_46, %c0_47] : memref<2x8x128xf32, #tpu.memory_space<vmem>>, vector<1x8x128xf32>
    %104 = vector.shape_cast %103 : vector<1x8x128xf32> to vector<8x128xf32>
    %105 = vector.shape_cast %102 : vector<8x128xf32> to vector<1x8x128xf32>
    tpu.vector_store %arg13[%c0_45, %c0_46, %c0_47], %105 {strides = array<i32>} : memref<2x8x128xf32, #tpu.memory_space<vmem>>, vector<1x8x128xf32>,
    %106 = vector.extract_strided_slice %55 {offsets = [1, 0, 0], sizes = [1, 5, 512], strides = [1, 1, 1]} : vector<2x5x512xf32> to vector<1x5x512xf32>
    %107 = vector.shape_cast %106 : vector<1x5x512xf32> to vector<5x512xf32>
    %108 = arith.truncf %107 : vector<5x512xf32> to vector<5x512xbf16>
    %cst_48 = arith.constant dense<0.000000e+00> : vector<8x512xf32>
    %109 = tpu.matmul %56, %108, %cst_48 {dimension_numbers = #tpu.dot_dimension_numbers<[1], [0], [0], [1], [0, 0, 1, 1], [], []>} : vector<8x5xbf16>, vector<5x512xbf16>, vector<8x512xf32> -> vector<8x512xf32>
    %110 = vector.shape_cast %109 : vector<8x512xf32> to vector<1x8x512xf32>
    %cst_49 = arith.constant dense<0.000000e+00> : vector<1xf32>
    %111 = vector.multi_reduction <add>, %110, %cst_49 [1, 2] : vector<1x8x512xf32> to vector<1xf32>
    %112 = vector.shape_cast %111 : vector<1xf32> to vector<1x1x1xf32>
    %113 = vector.extract %112[0, 0, 0] : f32 from vector<1x1x1xf32>
    %cst_50 = arith.constant 0.001953125 : f32
    %114 = arith.mulf %113, %cst_50 : f32
    %115 = arith.mulf %109, %109 : vector<8x512xf32>
    %116 = vector.shape_cast %115 : vector<8x512xf32> to vector<1x8x512xf32>
    %cst_51 = arith.constant dense<0.000000e+00> : vector<1xf32>
    %117 = vector.multi_reduction <add>, %116, %cst_51 [1, 2] : vector<1x8x512xf32> to vector<1xf32>
    %118 = vector.shape_cast %117 : vector<1xf32> to vector<1x1x1xf32>
    %119 = vector.extract %118[0, 0, 0] : f32 from vector<1x1x1xf32>
    %cst_52 = arith.constant 0.001953125 : f32
    %120 = arith.mulf %119, %cst_52 : f32
    %121 = arith.mulf %114, %114 : f32
    %122 = arith.subf %120, %121 : f32
    %cst_53 = arith.constant 0.000000e+00 : f32
    %123 = arith.maximumf %122, %cst_53 : f32
    %124 = vector.broadcast %114 : f32 to vector<8x512xf32>
    %125 = arith.subf %109, %124 : vector<8x512xf32>
    %cst_54 = arith.constant 9.99999974E-6 : f32
    %126 = arith.addf %123, %cst_54 : f32
    %127 = math.rsqrt %126 : f32
    %128 = vector.broadcast %127 : f32 to vector<8x512xf32>
    %129 = arith.mulf %125, %128 : vector<8x512xf32>
    %130 = arith.mulf %129, %57 : vector<8x512xf32>
    %131 = arith.addf %130, %58 : vector<8x512xf32>
    %cst_55 = arith.constant 0.000000e+00 : f32
    %132 = vector.broadcast %cst_55 : f32 to vector<8x512xf32>
    %133 = arith.cmpf oge, %131, %132 : vector<8x512xf32>
    %cst_56 = arith.constant 2.000000e-02 : f32
    %134 = vector.broadcast %cst_56 : f32 to vector<8x512xf32>
    %135 = arith.mulf %134, %131 : vector<8x512xf32>
    %136 = arith.select %133, %131, %135 : vector<8x512xi1>, vector<8x512xf32>
    %137 = vector.extract_strided_slice %136 {offsets = [0, 0], sizes = [8, 128], strides = [1, 1]} : vector<8x512xf32> to vector<8x128xf32>
    %138 = vector.extract_strided_slice %136 {offsets = [0, 128], sizes = [8, 128], strides = [1, 1]} : vector<8x512xf32> to vector<8x128xf32>
    %139 = arith.addf %137, %138 : vector<8x128xf32>
    %140 = vector.extract_strided_slice %136 {offsets = [0, 256], sizes = [8, 128], strides = [1, 1]} : vector<8x512xf32> to vector<8x128xf32>
    %141 = arith.addf %139, %140 : vector<8x128xf32>
    %142 = vector.extract_strided_slice %136 {offsets = [0, 384], sizes = [8, 128], strides = [1, 1]} : vector<8x512xf32> to vector<8x128xf32>
    %143 = arith.addf %141, %142 : vector<8x128xf32>
    %cst_57 = arith.constant 2.500000e-01 : f32
    %144 = vector.broadcast %cst_57 : f32 to vector<8x128xf32>
    %145 = arith.mulf %143, %144 : vector<8x128xf32>
    %146 = vector.extract_strided_slice %4 {offsets = [1, 0, 0], sizes = [1, 1, 128], strides = [1, 1, 1]} : vector<2x1x128xf32> to vector<1x1x128xf32>
    %147 = vector.shape_cast %146 : vector<1x1x128xf32> to vector<1x128xf32>
    %148 = vector.broadcast %147 : vector<1x128xf32> to vector<8x128xf32>
    %149 = arith.mulf %145, %148 : vector<8x128xf32>
    %c1 = arith.constant 1 : index
    %c0_58 = arith.constant 0 : index
    %c0_59 = arith.constant 0 : index
    %150 = vector.load %arg13[%c1, %c0_58, %c0_59] : memref<2x8x128xf32, #tpu.memory_space<vmem>>, vector<1x8x128xf32>
    %151 = vector.shape_cast %150 : vector<1x8x128xf32> to vector<8x128xf32>
    %152 = vector.shape_cast %149 : vector<8x128xf32> to vector<1x8x128xf32>
    tpu.vector_store %arg13[%c1, %c0_58, %c0_59], %152 {strides = array<i32>} : memref<2x8x128xf32, #tpu.memory_space<vmem>>, vector<1x8x128xf32>,
    return
  }
  func.func @transform_0(%arg0: i32) -> (i32, i32, i32) {
    %c0_i32 = arith.constant 0 : i32
    %c0_i32_0 = arith.constant 0 : i32
    %c0_i32_1 = arith.constant 0 : i32
    return %arg0, %c0_i32, %c0_i32_0 : i32, i32, i32
  }
  func.func @transform_1(%arg0: i32) -> (i32, i32, i32) {
    %c0_i32 = arith.constant 0 : i32
    %c0_i32_0 = arith.constant 0 : i32
    %c0_i32_1 = arith.constant 0 : i32
    return %arg0, %c0_i32, %c0_i32_0 : i32, i32, i32
  }
  func.func @transform_2(%arg0: i32) -> (i32, i32, i32) {
    %c0_i32 = arith.constant 0 : i32
    %c0_i32_0 = arith.constant 0 : i32
    %c0_i32_1 = arith.constant 0 : i32
    return %arg0, %c0_i32, %c0_i32_0 : i32, i32, i32
  }
  func.func @transform_3(%arg0: i32) -> (i32, i32, i32) {
    %c0_i32 = arith.constant 0 : i32
    %c0_i32_0 = arith.constant 0 : i32
    %c0_i32_1 = arith.constant 0 : i32
    return %arg0, %c0_i32, %c0_i32_0 : i32, i32, i32
  }
  func.func @transform_4(%arg0: i32) -> (i32, i32, i32) {
    %c0_i32 = arith.constant 0 : i32
    %c0_i32_0 = arith.constant 0 : i32
    %c0_i32_1 = arith.constant 0 : i32
    return %arg0, %c0_i32, %c0_i32_0 : i32, i32, i32
  }
  func.func @transform_5(%arg0: i32) -> (i32, i32) {
    %c0_i32 = arith.constant 0 : i32
    %c0_i32_0 = arith.constant 0 : i32
    %c0_i32_1 = arith.constant 0 : i32
    return %c0_i32, %c0_i32_0 : i32, i32
  }
  func.func @transform_6(%arg0: i32) -> (i32, i32) {
    %c0_i32 = arith.constant 0 : i32
    %c0_i32_0 = arith.constant 0 : i32
    %c0_i32_1 = arith.constant 0 : i32
    return %c0_i32, %c0_i32_0 : i32, i32
  }
  func.func @transform_7(%arg0: i32) -> (i32, i32) {
    %c0_i32 = arith.constant 0 : i32
    %c0_i32_0 = arith.constant 0 : i32
    %c0_i32_1 = arith.constant 0 : i32
    return %c0_i32, %c0_i32_0 : i32, i32
  }
  func.func @transform_8(%arg0: i32) -> (i32, i32) {
    %c0_i32 = arith.constant 0 : i32
    %c0_i32_0 = arith.constant 0 : i32
    %c0_i32_1 = arith.constant 0 : i32
    return %c0_i32, %c0_i32_0 : i32, i32
  }
  func.func @transform_9(%arg0: i32) -> (i32, i32) {
    %c0_i32 = arith.constant 0 : i32
    %c0_i32_0 = arith.constant 0 : i32
    %c0_i32_1 = arith.constant 0 : i32
    return %c0_i32, %c0_i32_0 : i32, i32
  }
  func.func @transform_10(%arg0: i32) -> (i32, i32) {
    %c0_i32 = arith.constant 0 : i32
    %c0_i32_0 = arith.constant 0 : i32
    %c0_i32_1 = arith.constant 0 : i32
    return %c0_i32, %c0_i32_0 : i32, i32
  }
  func.func @transform_11(%arg0: i32) -> (i32, i32) {
    %c0_i32 = arith.constant 0 : i32
    %c0_i32_0 = arith.constant 0 : i32
    %c0_i32_1 = arith.constant 0 : i32
    return %c0_i32, %c0_i32_0 : i32, i32
  }
  func.func @transform_12(%arg0: i32) -> (i32, i32, i32) {
    %c0_i32 = arith.constant 0 : i32
    %c0_i32_0 = arith.constant 0 : i32
    %c0_i32_1 = arith.constant 0 : i32
    return %arg0, %c0_i32, %c0_i32_0 : i32, i32, i32
  }
}

module attributes {stable_mosaic.version = 11 : i64} {
  func.func @_molconv_kernel(%arg0: i32, %arg1: memref<2x1x512xf32, #tpu.memory_space<vmem>>, %arg2: memref<2x4x512xf32, #tpu.memory_space<vmem>>, %arg3: memref<2x8x128xf32, #tpu.memory_space<vmem>>, %arg4: memref<2x8x512xf32, #tpu.memory_space<vmem>>, %arg5: memref<2x1x128xf32, #tpu.memory_space<vmem>>, %arg6: memref<1x1xf32, #tpu.memory_space<smem>>, %arg7: memref<4x1xf32, #tpu.memory_space<vmem>>, %arg8: memref<2x512xf32, #tpu.memory_space<vmem>>, %arg9: memref<2x512xf32, #tpu.memory_space<vmem>>, %arg10: memref<16x8xbf16, #tpu.memory_space<vmem>>, %arg11: memref<16x512xf32, #tpu.memory_space<vmem>>, %arg12: memref<16x512xf32, #tpu.memory_space<vmem>>, %arg13: memref<2x16x128xf32, #tpu.memory_space<vmem>>) attributes {dimension_semantics = [#tpu.dimension_semantics<parallel>], iteration_bounds = array<i64: 2>, scalar_prefetch = 0 : i64, scratch_operands = 0 : i64, tpu.core_type = #tpu.core_type<tc>, window_params = [{transform_indices = @transform_0, window_bounds = array<i64: 2, 1, 512>}, {transform_indices = @transform_1, window_bounds = array<i64: 2, 4, 512>}, {transform_indices = @transform_2, window_bounds = array<i64: 2, 8, 128>}, {transform_indices = @transform_3, window_bounds = array<i64: 2, 8, 512>}, {transform_indices = @transform_4, window_bounds = array<i64: 2, 1, 128>}, {transform_indices = @transform_5, window_bounds = array<i64: 1, 1>}, {pipeline_mode = #tpu.pipeline_mode<synchronous>, transform_indices = @transform_6, window_bounds = array<i64: 4, 1>}, {pipeline_mode = #tpu.pipeline_mode<synchronous>, transform_indices = @transform_7, window_bounds = array<i64: 2, 512>}, {pipeline_mode = #tpu.pipeline_mode<synchronous>, transform_indices = @transform_8, window_bounds = array<i64: 2, 512>}, {pipeline_mode = #tpu.pipeline_mode<synchronous>, transform_indices = @transform_9, window_bounds = array<i64: 16, 8>}, {pipeline_mode = #tpu.pipeline_mode<synchronous>, transform_indices = @transform_10, window_bounds = array<i64: 16, 512>}, {pipeline_mode = #tpu.pipeline_mode<synchronous>, transform_indices = @transform_11, window_bounds = array<i64: 16, 512>}, {transform_indices = @transform_12, window_bounds = array<i64: 2, 16, 128>}]} {
    %c0 = arith.constant 0 : index
    %c0_0 = arith.constant 0 : index
    %c0_1 = arith.constant 0 : index
    %0 = vector.load %arg1[%c0, %c0_0, %c0_1] : memref<2x1x512xf32, #tpu.memory_space<vmem>>, vector<2x1x512xf32>
    %c0_2 = arith.constant 0 : index
    %c0_3 = arith.constant 0 : index
    %c0_4 = arith.constant 0 : index
    %1 = vector.load %arg2[%c0_2, %c0_3, %c0_4] : memref<2x4x512xf32, #tpu.memory_space<vmem>>, vector<2x4x512xf32>
    %c0_5 = arith.constant 0 : index
    %c0_6 = arith.constant 0 : index
    %c0_7 = arith.constant 0 : index
    %2 = vector.load %arg3[%c0_5, %c0_6, %c0_7] : memref<2x8x128xf32, #tpu.memory_space<vmem>>, vector<2x8x128xf32>
    %c0_8 = arith.constant 0 : index
    %c0_9 = arith.constant 0 : index
    %c0_10 = arith.constant 0 : index
    %3 = vector.load %arg4[%c0_8, %c0_9, %c0_10] : memref<2x8x512xf32, #tpu.memory_space<vmem>>, vector<2x8x512xf32>
    %c0_11 = arith.constant 0 : index
    %c0_12 = arith.constant 0 : index
    %c0_13 = arith.constant 0 : index
    %4 = vector.load %arg5[%c0_11, %c0_12, %c0_13] : memref<2x1x128xf32, #tpu.memory_space<vmem>>, vector<2x1x128xf32>
    %c0_14 = arith.constant 0 : index
    %c0_15 = arith.constant 0 : index
    %5 = memref.load %arg6[%c0_14, %c0_15] : memref<1x1xf32, #tpu.memory_space<smem>>
    %6 = vector.broadcast %5 : f32 to vector<2x1x512xf32>
    %7 = arith.mulf %0, %6 : vector<2x1x512xf32>
    %c0_16 = arith.constant 0 : index
    %c0_17 = arith.constant 0 : index
    %8 = vector.load %arg7[%c0_16, %c0_17] : memref<4x1xf32, #tpu.memory_space<vmem>>, vector<4x1xf32>
    %9 = vector.shape_cast %8 : vector<4x1xf32> to vector<1x4x1xf32>
    %10 = vector.broadcast %9 : vector<1x4x1xf32> to vector<2x4x512xf32>
    %11 = arith.mulf %1, %10 : vector<2x4x512xf32>
    %cst = arith.constant dense<0.000000e+00> : vector<2x512xf32>
    %12 = vector.multi_reduction <add>, %11, %cst [1] : vector<2x4x512xf32> to vector<2x512xf32>
    %13 = vector.shape_cast %12 : vector<2x512xf32> to vector<2x1x512xf32>
    %14 = tpu.concatenate %7, %13 in 1 : vector<2x1x512xf32>, vector<2x1x512xf32> -> vector<2x2x512xf32>
    %cst_18 = arith.constant dense<0.000000e+00> : vector<2x2xf32>
    %15 = vector.multi_reduction <add>, %14, %cst_18 [2] : vector<2x2x512xf32> to vector<2x2xf32>
    %16 = vector.shape_cast %15 : vector<2x2xf32> to vector<2x2x1xf32>
    %cst_19 = arith.constant 1.562500e-02 : f32
    %17 = vector.broadcast %cst_19 : f32 to vector<2x2x1xf32>
    %18 = arith.mulf %16, %17 : vector<2x2x1xf32>
    %19 = arith.mulf %14, %14 : vector<2x2x512xf32>
    %cst_20 = arith.constant dense<0.000000e+00> : vector<2x2xf32>
    %20 = vector.multi_reduction <add>, %19, %cst_20 [2] : vector<2x2x512xf32> to vector<2x2xf32>
    %21 = vector.shape_cast %20 : vector<2x2xf32> to vector<2x2x1xf32>
    %cst_21 = arith.constant 1.562500e-02 : f32
    %22 = vector.broadcast %cst_21 : f32 to vector<2x2x1xf32>
    %23 = arith.mulf %21, %22 : vector<2x2x1xf32>
    %24 = arith.mulf %18, %18 : vector<2x2x1xf32>
    %25 = arith.subf %23, %24 : vector<2x2x1xf32>
    %cst_22 = arith.constant 0.000000e+00 : f32
    %26 = vector.broadcast %cst_22 : f32 to vector<2x2x1xf32>
    %27 = arith.maximumf %25, %26 : vector<2x2x1xf32>
    %28 = vector.broadcast %18 : vector<2x2x1xf32> to vector<2x2x512xf32>
    %29 = arith.subf %14, %28 : vector<2x2x512xf32>
    %cst_23 = arith.constant 9.99999974E-6 : f32
    %30 = vector.broadcast %cst_23 : f32 to vector<2x2x1xf32>
    %31 = arith.addf %27, %30 : vector<2x2x1xf32>
    %32 = math.rsqrt %31 : vector<2x2x1xf32>
    %33 = vector.broadcast %32 : vector<2x2x1xf32> to vector<2x2x512xf32>
    %34 = arith.mulf %29, %33 : vector<2x2x512xf32>
    %c0_24 = arith.constant 0 : index
    %c0_25 = arith.constant 0 : index
    %35 = vector.load %arg8[%c0_24, %c0_25] : memref<2x512xf32, #tpu.memory_space<vmem>>, vector<2x512xf32>
    %36 = vector.shape_cast %35 : vector<2x512xf32> to vector<1x2x512xf32>
    %37 = vector.broadcast %36 : vector<1x2x512xf32> to vector<2x2x512xf32>
    %38 = arith.mulf %34, %37 : vector<2x2x512xf32>
    %c0_26 = arith.constant 0 : index
    %c0_27 = arith.constant 0 : index
    %39 = vector.load %arg9[%c0_26, %c0_27] : memref<2x512xf32, #tpu.memory_space<vmem>>, vector<2x512xf32>
    %40 = vector.shape_cast %39 : vector<2x512xf32> to vector<1x2x512xf32>
    %41 = vector.broadcast %40 : vector<1x2x512xf32> to vector<2x2x512xf32>
    %42 = arith.addf %38, %41 : vector<2x2x512xf32>
    %43 = arith.negf %42 : vector<2x2x512xf32>
    %44 = math.exp %43 : vector<2x2x512xf32>
    %cst_28 = arith.constant 1.000000e+00 : f32
    %45 = vector.broadcast %cst_28 : f32 to vector<2x2x512xf32>
    %46 = arith.addf %45, %44 : vector<2x2x512xf32>
    %47 = arith.divf %45, %46 : vector<2x2x512xf32>
    %48 = vector.extract_strided_slice %47 {offsets = [0, 0, 0], sizes = [2, 1, 512], strides = [1, 1, 1]} : vector<2x2x512xf32> to vector<2x1x512xf32>
    %49 = vector.extract_strided_slice %47 {offsets = [0, 1, 0], sizes = [2, 1, 512], strides = [1, 1, 1]} : vector<2x2x512xf32> to vector<2x1x512xf32>
    %50 = arith.mulf %48, %49 : vector<2x1x512xf32>
    %51 = tpu.concatenate %2, %2, %2, %2 in 2 : vector<2x8x128xf32>, vector<2x8x128xf32>, vector<2x8x128xf32>, vector<2x8x128xf32> -> vector<2x8x512xf32>
    %52 = arith.subf %3, %51 : vector<2x8x512xf32>
    %53 = vector.broadcast %50 : vector<2x1x512xf32> to vector<2x8x512xf32>
    %54 = arith.mulf %53, %52 : vector<2x8x512xf32>
    %55 = arith.addf %51, %54 : vector<2x8x512xf32>
    %c0_29 = arith.constant 0 : index
    %c0_30 = arith.constant 0 : index
    %56 = vector.load %arg10[%c0_29, %c0_30] : memref<16x8xbf16, #tpu.memory_space<vmem>>, vector<16x8xbf16>
    %c0_31 = arith.constant 0 : index
    %c0_32 = arith.constant 0 : index
    %57 = vector.load %arg11[%c0_31, %c0_32] : memref<16x512xf32, #tpu.memory_space<vmem>>, vector<16x512xf32>
    %c0_33 = arith.constant 0 : index
    %c0_34 = arith.constant 0 : index
    %58 = vector.load %arg12[%c0_33, %c0_34] : memref<16x512xf32, #tpu.memory_space<vmem>>, vector<16x512xf32>
    %59 = vector.extract_strided_slice %55 {offsets = [0, 0, 0], sizes = [1, 8, 512], strides = [1, 1, 1]} : vector<2x8x512xf32> to vector<1x8x512xf32>
    %60 = vector.shape_cast %59 : vector<1x8x512xf32> to vector<8x512xf32>
    %61 = arith.truncf %60 : vector<8x512xf32> to vector<8x512xbf16>
    %cst_35 = arith.constant dense<0.000000e+00> : vector<16x512xf32>
    %62 = tpu.matmul %56, %61, %cst_35 {dimension_numbers = #tpu.dot_dimension_numbers<[1], [0], [0], [1], [0, 0, 1, 1], [], []>} : vector<16x8xbf16>, vector<8x512xbf16>, vector<16x512xf32> -> vector<16x512xf32>
    %63 = vector.shape_cast %62 : vector<16x512xf32> to vector<1x16x512xf32>
    %cst_36 = arith.constant dense<0.000000e+00> : vector<1xf32>
    %64 = vector.multi_reduction <add>, %63, %cst_36 [1, 2] : vector<1x16x512xf32> to vector<1xf32>
    %65 = vector.shape_cast %64 : vector<1xf32> to vector<1x1x1xf32>
    %66 = vector.extract %65[0, 0, 0] : f32 from vector<1x1x1xf32>
    %cst_37 = arith.constant 9.765625E-4 : f32
    %67 = arith.mulf %66, %cst_37 : f32
    %68 = arith.mulf %62, %62 : vector<16x512xf32>
    %69 = vector.shape_cast %68 : vector<16x512xf32> to vector<1x16x512xf32>
    %cst_38 = arith.constant dense<0.000000e+00> : vector<1xf32>
    %70 = vector.multi_reduction <add>, %69, %cst_38 [1, 2] : vector<1x16x512xf32> to vector<1xf32>
    %71 = vector.shape_cast %70 : vector<1xf32> to vector<1x1x1xf32>
    %72 = vector.extract %71[0, 0, 0] : f32 from vector<1x1x1xf32>
    %cst_39 = arith.constant 9.765625E-4 : f32
    %73 = arith.mulf %72, %cst_39 : f32
    %74 = arith.mulf %67, %67 : f32
    %75 = arith.subf %73, %74 : f32
    %cst_40 = arith.constant 0.000000e+00 : f32
    %76 = arith.maximumf %75, %cst_40 : f32
    %77 = vector.broadcast %67 : f32 to vector<16x512xf32>
    %78 = arith.subf %62, %77 : vector<16x512xf32>
    %cst_41 = arith.constant 9.99999974E-6 : f32
    %79 = arith.addf %76, %cst_41 : f32
    %80 = math.rsqrt %79 : f32
    %81 = vector.broadcast %80 : f32 to vector<16x512xf32>
    %82 = arith.mulf %78, %81 : vector<16x512xf32>
    %83 = arith.mulf %82, %57 : vector<16x512xf32>
    %84 = arith.addf %83, %58 : vector<16x512xf32>
    %cst_42 = arith.constant 0.000000e+00 : f32
    %85 = vector.broadcast %cst_42 : f32 to vector<16x512xf32>
    %86 = arith.cmpf oge, %84, %85 : vector<16x512xf32>
    %cst_43 = arith.constant 2.000000e-02 : f32
    %87 = vector.broadcast %cst_43 : f32 to vector<16x512xf32>
    %88 = arith.mulf %87, %84 : vector<16x512xf32>
    %89 = arith.select %86, %84, %88 : vector<16x512xi1>, vector<16x512xf32>
    %90 = vector.extract_strided_slice %89 {offsets = [0, 0], sizes = [16, 128], strides = [1, 1]} : vector<16x512xf32> to vector<16x128xf32>
    %91 = vector.extract_strided_slice %89 {offsets = [0, 128], sizes = [16, 128], strides = [1, 1]} : vector<16x512xf32> to vector<16x128xf32>
    %92 = arith.addf %90, %91 : vector<16x128xf32>
    %93 = vector.extract_strided_slice %89 {offsets = [0, 256], sizes = [16, 128], strides = [1, 1]} : vector<16x512xf32> to vector<16x128xf32>
    %94 = arith.addf %92, %93 : vector<16x128xf32>
    %95 = vector.extract_strided_slice %89 {offsets = [0, 384], sizes = [16, 128], strides = [1, 1]} : vector<16x512xf32> to vector<16x128xf32>
    %96 = arith.addf %94, %95 : vector<16x128xf32>
    %cst_44 = arith.constant 2.500000e-01 : f32
    %97 = vector.broadcast %cst_44 : f32 to vector<16x128xf32>
    %98 = arith.mulf %96, %97 : vector<16x128xf32>
    %99 = vector.extract_strided_slice %4 {offsets = [0, 0, 0], sizes = [1, 1, 128], strides = [1, 1, 1]} : vector<2x1x128xf32> to vector<1x1x128xf32>
    %100 = vector.shape_cast %99 : vector<1x1x128xf32> to vector<1x128xf32>
    %101 = vector.broadcast %100 : vector<1x128xf32> to vector<16x128xf32>
    %102 = arith.mulf %98, %101 : vector<16x128xf32>
    %c0_45 = arith.constant 0 : index
    %c0_46 = arith.constant 0 : index
    %c0_47 = arith.constant 0 : index
    %103 = vector.load %arg13[%c0_45, %c0_46, %c0_47] : memref<2x16x128xf32, #tpu.memory_space<vmem>>, vector<1x16x128xf32>
    %104 = vector.shape_cast %103 : vector<1x16x128xf32> to vector<16x128xf32>
    %105 = vector.shape_cast %102 : vector<16x128xf32> to vector<1x16x128xf32>
    tpu.vector_store %arg13[%c0_45, %c0_46, %c0_47], %105 {strides = array<i32>} : memref<2x16x128xf32, #tpu.memory_space<vmem>>, vector<1x16x128xf32>,
    %106 = vector.extract_strided_slice %55 {offsets = [1, 0, 0], sizes = [1, 8, 512], strides = [1, 1, 1]} : vector<2x8x512xf32> to vector<1x8x512xf32>
    %107 = vector.shape_cast %106 : vector<1x8x512xf32> to vector<8x512xf32>
    %108 = arith.truncf %107 : vector<8x512xf32> to vector<8x512xbf16>
    %cst_48 = arith.constant dense<0.000000e+00> : vector<16x512xf32>
    %109 = tpu.matmul %56, %108, %cst_48 {dimension_numbers = #tpu.dot_dimension_numbers<[1], [0], [0], [1], [0, 0, 1, 1], [], []>} : vector<16x8xbf16>, vector<8x512xbf16>, vector<16x512xf32> -> vector<16x512xf32>
    %110 = vector.shape_cast %109 : vector<16x512xf32> to vector<1x16x512xf32>
    %cst_49 = arith.constant dense<0.000000e+00> : vector<1xf32>
    %111 = vector.multi_reduction <add>, %110, %cst_49 [1, 2] : vector<1x16x512xf32> to vector<1xf32>
    %112 = vector.shape_cast %111 : vector<1xf32> to vector<1x1x1xf32>
    %113 = vector.extract %112[0, 0, 0] : f32 from vector<1x1x1xf32>
    %cst_50 = arith.constant 9.765625E-4 : f32
    %114 = arith.mulf %113, %cst_50 : f32
    %115 = arith.mulf %109, %109 : vector<16x512xf32>
    %116 = vector.shape_cast %115 : vector<16x512xf32> to vector<1x16x512xf32>
    %cst_51 = arith.constant dense<0.000000e+00> : vector<1xf32>
    %117 = vector.multi_reduction <add>, %116, %cst_51 [1, 2] : vector<1x16x512xf32> to vector<1xf32>
    %118 = vector.shape_cast %117 : vector<1xf32> to vector<1x1x1xf32>
    %119 = vector.extract %118[0, 0, 0] : f32 from vector<1x1x1xf32>
    %cst_52 = arith.constant 9.765625E-4 : f32
    %120 = arith.mulf %119, %cst_52 : f32
    %121 = arith.mulf %114, %114 : f32
    %122 = arith.subf %120, %121 : f32
    %cst_53 = arith.constant 0.000000e+00 : f32
    %123 = arith.maximumf %122, %cst_53 : f32
    %124 = vector.broadcast %114 : f32 to vector<16x512xf32>
    %125 = arith.subf %109, %124 : vector<16x512xf32>
    %cst_54 = arith.constant 9.99999974E-6 : f32
    %126 = arith.addf %123, %cst_54 : f32
    %127 = math.rsqrt %126 : f32
    %128 = vector.broadcast %127 : f32 to vector<16x512xf32>
    %129 = arith.mulf %125, %128 : vector<16x512xf32>
    %130 = arith.mulf %129, %57 : vector<16x512xf32>
    %131 = arith.addf %130, %58 : vector<16x512xf32>
    %cst_55 = arith.constant 0.000000e+00 : f32
    %132 = vector.broadcast %cst_55 : f32 to vector<16x512xf32>
    %133 = arith.cmpf oge, %131, %132 : vector<16x512xf32>
    %cst_56 = arith.constant 2.000000e-02 : f32
    %134 = vector.broadcast %cst_56 : f32 to vector<16x512xf32>
    %135 = arith.mulf %134, %131 : vector<16x512xf32>
    %136 = arith.select %133, %131, %135 : vector<16x512xi1>, vector<16x512xf32>
    %137 = vector.extract_strided_slice %136 {offsets = [0, 0], sizes = [16, 128], strides = [1, 1]} : vector<16x512xf32> to vector<16x128xf32>
    %138 = vector.extract_strided_slice %136 {offsets = [0, 128], sizes = [16, 128], strides = [1, 1]} : vector<16x512xf32> to vector<16x128xf32>
    %139 = arith.addf %137, %138 : vector<16x128xf32>
    %140 = vector.extract_strided_slice %136 {offsets = [0, 256], sizes = [16, 128], strides = [1, 1]} : vector<16x512xf32> to vector<16x128xf32>
    %141 = arith.addf %139, %140 : vector<16x128xf32>
    %142 = vector.extract_strided_slice %136 {offsets = [0, 384], sizes = [16, 128], strides = [1, 1]} : vector<16x512xf32> to vector<16x128xf32>
    %143 = arith.addf %141, %142 : vector<16x128xf32>
    %cst_57 = arith.constant 2.500000e-01 : f32
    %144 = vector.broadcast %cst_57 : f32 to vector<16x128xf32>
    %145 = arith.mulf %143, %144 : vector<16x128xf32>
    %146 = vector.extract_strided_slice %4 {offsets = [1, 0, 0], sizes = [1, 1, 128], strides = [1, 1, 1]} : vector<2x1x128xf32> to vector<1x1x128xf32>
    %147 = vector.shape_cast %146 : vector<1x1x128xf32> to vector<1x128xf32>
    %148 = vector.broadcast %147 : vector<1x128xf32> to vector<16x128xf32>
    %149 = arith.mulf %145, %148 : vector<16x128xf32>
    %c1 = arith.constant 1 : index
    %c0_58 = arith.constant 0 : index
    %c0_59 = arith.constant 0 : index
    %150 = vector.load %arg13[%c1, %c0_58, %c0_59] : memref<2x16x128xf32, #tpu.memory_space<vmem>>, vector<1x16x128xf32>
    %151 = vector.shape_cast %150 : vector<1x16x128xf32> to vector<16x128xf32>
    %152 = vector.shape_cast %149 : vector<16x128xf32> to vector<1x16x128xf32>
    tpu.vector_store %arg13[%c1, %c0_58, %c0_59], %152 {strides = array<i32>} : memref<2x16x128xf32, #tpu.memory_space<vmem>>, vector<1x16x128xf32>,
    return
  }
  func.func @transform_0(%arg0: i32) -> (i32, i32, i32) {
    %c0_i32 = arith.constant 0 : i32
    %c0_i32_0 = arith.constant 0 : i32
    %c0_i32_1 = arith.constant 0 : i32
    return %arg0, %c0_i32, %c0_i32_0 : i32, i32, i32
  }
  func.func @transform_1(%arg0: i32) -> (i32, i32, i32) {
    %c0_i32 = arith.constant 0 : i32
    %c0_i32_0 = arith.constant 0 : i32
    %c0_i32_1 = arith.constant 0 : i32
    return %arg0, %c0_i32, %c0_i32_0 : i32, i32, i32
  }
  func.func @transform_2(%arg0: i32) -> (i32, i32, i32) {
    %c0_i32 = arith.constant 0 : i32
    %c0_i32_0 = arith.constant 0 : i32
    %c0_i32_1 = arith.constant 0 : i32
    return %arg0, %c0_i32, %c0_i32_0 : i32, i32, i32
  }
  func.func @transform_3(%arg0: i32) -> (i32, i32, i32) {
    %c0_i32 = arith.constant 0 : i32
    %c0_i32_0 = arith.constant 0 : i32
    %c0_i32_1 = arith.constant 0 : i32
    return %arg0, %c0_i32, %c0_i32_0 : i32, i32, i32
  }
  func.func @transform_4(%arg0: i32) -> (i32, i32, i32) {
    %c0_i32 = arith.constant 0 : i32
    %c0_i32_0 = arith.constant 0 : i32
    %c0_i32_1 = arith.constant 0 : i32
    return %arg0, %c0_i32, %c0_i32_0 : i32, i32, i32
  }
  func.func @transform_5(%arg0: i32) -> (i32, i32) {
    %c0_i32 = arith.constant 0 : i32
    %c0_i32_0 = arith.constant 0 : i32
    %c0_i32_1 = arith.constant 0 : i32
    return %c0_i32, %c0_i32_0 : i32, i32
  }
  func.func @transform_6(%arg0: i32) -> (i32, i32) {
    %c0_i32 = arith.constant 0 : i32
    %c0_i32_0 = arith.constant 0 : i32
    %c0_i32_1 = arith.constant 0 : i32
    return %c0_i32, %c0_i32_0 : i32, i32
  }
  func.func @transform_7(%arg0: i32) -> (i32, i32) {
    %c0_i32 = arith.constant 0 : i32
    %c0_i32_0 = arith.constant 0 : i32
    %c0_i32_1 = arith.constant 0 : i32
    return %c0_i32, %c0_i32_0 : i32, i32
  }
  func.func @transform_8(%arg0: i32) -> (i32, i32) {
    %c0_i32 = arith.constant 0 : i32
    %c0_i32_0 = arith.constant 0 : i32
    %c0_i32_1 = arith.constant 0 : i32
    return %c0_i32, %c0_i32_0 : i32, i32
  }
  func.func @transform_9(%arg0: i32) -> (i32, i32) {
    %c0_i32 = arith.constant 0 : i32
    %c0_i32_0 = arith.constant 0 : i32
    %c0_i32_1 = arith.constant 0 : i32
    return %c0_i32, %c0_i32_0 : i32, i32
  }
  func.func @transform_10(%arg0: i32) -> (i32, i32) {
    %c0_i32 = arith.constant 0 : i32
    %c0_i32_0 = arith.constant 0 : i32
    %c0_i32_1 = arith.constant 0 : i32
    return %c0_i32, %c0_i32_0 : i32, i32
  }
  func.func @transform_11(%arg0: i32) -> (i32, i32) {
    %c0_i32 = arith.constant 0 : i32
    %c0_i32_0 = arith.constant 0 : i32
    %c0_i32_1 = arith.constant 0 : i32
    return %c0_i32, %c0_i32_0 : i32, i32
  }
  func.func @transform_12(%arg0: i32) -> (i32, i32, i32) {
    %c0_i32 = arith.constant 0 : i32
    %c0_i32_0 = arith.constant 0 : i32
    %c0_i32_1 = arith.constant 0 : i32
    return %arg0, %c0_i32, %c0_i32_0 : i32, i32, i32
  }
}

module attributes {stable_mosaic.version = 11 : i64} {
  func.func @_head_kernel(%arg0: i32, %arg1: memref<2x128x24xbf16, #tpu.memory_space<vmem>>, %arg2: memref<2x128x1xf32, #tpu.memory_space<vmem>>, %arg3: memref<24x24xbf16, #tpu.memory_space<vmem>>, %arg4: memref<128x24xf32, #tpu.memory_space<vmem>>, %arg5: memref<128x24xf32, #tpu.memory_space<vmem>>, %arg6: memref<1x2x24xf32, #tpu.memory_space<vmem>>) attributes {dimension_semantics = [#tpu.dimension_semantics<parallel>], iteration_bounds = array<i64: 2>, scalar_prefetch = 0 : i64, scratch_operands = 0 : i64, tpu.core_type = #tpu.core_type<tc>, window_params = [{transform_indices = @transform_0, window_bounds = array<i64: 2, 128, 24>}, {transform_indices = @transform_1, window_bounds = array<i64: 2, 128, 1>}, {pipeline_mode = #tpu.pipeline_mode<synchronous>, transform_indices = @transform_2, window_bounds = array<i64: 24, 24>}, {pipeline_mode = #tpu.pipeline_mode<synchronous>, transform_indices = @transform_3, window_bounds = array<i64: 128, 24>}, {pipeline_mode = #tpu.pipeline_mode<synchronous>, transform_indices = @transform_4, window_bounds = array<i64: 128, 24>}, {transform_indices = @transform_5, window_bounds = array<i64: 1, 2, 24>}]} {
    %c0 = arith.constant 0 : index
    %c0_0 = arith.constant 0 : index
    %0 = vector.load %arg3[%c0, %c0_0] : memref<24x24xbf16, #tpu.memory_space<vmem>>, vector<24x24xbf16>
    %c0_1 = arith.constant 0 : index
    %c0_2 = arith.constant 0 : index
    %1 = vector.load %arg4[%c0_1, %c0_2] : memref<128x24xf32, #tpu.memory_space<vmem>>, vector<128x24xf32>
    %c0_3 = arith.constant 0 : index
    %c0_4 = arith.constant 0 : index
    %2 = vector.load %arg5[%c0_3, %c0_4] : memref<128x24xf32, #tpu.memory_space<vmem>>, vector<128x24xf32>
    %c0_5 = arith.constant 0 : index
    %c0_6 = arith.constant 0 : index
    %c0_7 = arith.constant 0 : index
    %3 = vector.load %arg1[%c0_5, %c0_6, %c0_7] : memref<2x128x24xbf16, #tpu.memory_space<vmem>>, vector<1x128x24xbf16>
    %4 = vector.shape_cast %3 : vector<1x128x24xbf16> to vector<128x24xbf16>
    %c0_8 = arith.constant 0 : index
    %c0_9 = arith.constant 0 : index
    %c0_10 = arith.constant 0 : index
    %5 = vector.load %arg2[%c0_8, %c0_9, %c0_10] : memref<2x128x1xf32, #tpu.memory_space<vmem>>, vector<1x128x1xf32>
    %6 = vector.shape_cast %5 : vector<1x128x1xf32> to vector<128x1xf32>
    %cst = arith.constant dense<0.000000e+00> : vector<128x24xf32>
    %7 = tpu.matmul %4, %0, %cst {dimension_numbers = #tpu.dot_dimension_numbers<[1], [0], [0], [1], [0, 0, 1, 1], [], []>} : vector<128x24xbf16>, vector<24x24xbf16>, vector<128x24xf32> -> vector<128x24xf32>
    %8 = vector.shape_cast %7 : vector<128x24xf32> to vector<1x128x24xf32>
    %cst_11 = arith.constant dense<0.000000e+00> : vector<1xf32>
    %9 = vector.multi_reduction <add>, %8, %cst_11 [1, 2] : vector<1x128x24xf32> to vector<1xf32>
    %10 = vector.shape_cast %9 : vector<1xf32> to vector<1x1x1xf32>
    %11 = vector.extract %10[0, 0, 0] : f32 from vector<1x1x1xf32>
    %cst_12 = arith.constant 0.00260416674 : f32
    %12 = arith.mulf %11, %cst_12 : f32
    %13 = arith.mulf %7, %7 : vector<128x24xf32>
    %14 = vector.shape_cast %13 : vector<128x24xf32> to vector<1x128x24xf32>
    %cst_13 = arith.constant dense<0.000000e+00> : vector<1xf32>
    %15 = vector.multi_reduction <add>, %14, %cst_13 [1, 2] : vector<1x128x24xf32> to vector<1xf32>
    %16 = vector.shape_cast %15 : vector<1xf32> to vector<1x1x1xf32>
    %17 = vector.extract %16[0, 0, 0] : f32 from vector<1x1x1xf32>
    %cst_14 = arith.constant 0.00260416674 : f32
    %18 = arith.mulf %17, %cst_14 : f32
    %19 = arith.mulf %12, %12 : f32
    %20 = arith.subf %18, %19 : f32
    %cst_15 = arith.constant 0.000000e+00 : f32
    %21 = arith.maximumf %20, %cst_15 : f32
    %22 = vector.broadcast %12 : f32 to vector<128x24xf32>
    %23 = arith.subf %7, %22 : vector<128x24xf32>
    %cst_16 = arith.constant 9.99999974E-6 : f32
    %24 = arith.addf %21, %cst_16 : f32
    %25 = math.rsqrt %24 : f32
    %26 = vector.broadcast %25 : f32 to vector<128x24xf32>
    %27 = arith.mulf %23, %26 : vector<128x24xf32>
    %28 = arith.mulf %27, %1 : vector<128x24xf32>
    %29 = arith.addf %28, %2 : vector<128x24xf32>
    %cst_17 = arith.constant 0.000000e+00 : f32
    %30 = vector.broadcast %cst_17 : f32 to vector<128x24xf32>
    %31 = arith.cmpf oge, %29, %30 : vector<128x24xf32>
    %cst_18 = arith.constant 2.000000e-01 : f32
    %32 = vector.broadcast %cst_18 : f32 to vector<128x24xf32>
    %33 = arith.mulf %32, %29 : vector<128x24xf32>
    %34 = arith.select %31, %29, %33 : vector<128x24xi1>, vector<128x24xf32>
    %cst_19 = arith.constant 5.000000e-01 : f32
    %35 = vector.broadcast %cst_19 : f32 to vector<128x1xf32>
    %36 = arith.cmpf ogt, %6, %35 : vector<128x1xf32>
    %cst_20 = arith.constant 0xFF800000 : f32
    %37 = vector.shape_cast %36 : vector<128x1xi1> to vector<128x1xi1>
    %38 = vector.broadcast %37 : vector<128x1xi1> to vector<128x24xi1>
    %39 = vector.broadcast %cst_20 : f32 to vector<128x24xf32>
    %40 = arith.select %38, %34, %39 : vector<128x24xi1>, vector<128x24xf32>
    %cst_21 = arith.constant dense<0xFF800000> : vector<24xf32>
    %41 = vector.multi_reduction <maximumf>, %40, %cst_21 [0] : vector<128x24xf32> to vector<24xf32>
    %42 = vector.shape_cast %41 : vector<24xf32> to vector<1x24xf32>
    %43 = vector.shape_cast %6 : vector<128x1xf32> to vector<1x128x1xf32>
    %cst_22 = arith.constant dense<0.000000e+00> : vector<1xf32>
    %44 = vector.multi_reduction <add>, %43, %cst_22 [1, 2] : vector<1x128x1xf32> to vector<1xf32>
    %45 = vector.shape_cast %44 : vector<1xf32> to vector<1x1x1xf32>
    %46 = vector.extract %45[0, 0, 0] : f32 from vector<1x1x1xf32>
    %cst_23 = arith.constant 1.000000e-01 : f32
    %47 = arith.maximumf %46, %cst_23 : f32
    %48 = vector.broadcast %6 : vector<128x1xf32> to vector<128x24xf32>
    %49 = arith.mulf %34, %48 : vector<128x24xf32>
    %cst_24 = arith.constant dense<0.000000e+00> : vector<24xf32>
    %50 = vector.multi_reduction <add>, %49, %cst_24 [0] : vector<128x24xf32> to vector<24xf32>
    %51 = vector.shape_cast %50 : vector<24xf32> to vector<1x24xf32>
    %52 = vector.broadcast %47 : f32 to vector<1x24xf32>
    %53 = arith.divf %51, %52 : vector<1x24xf32>
    %54 = arith.addf %42, %53 : vector<1x24xf32>
    %c1 = arith.constant 1 : index
    %c0_25 = arith.constant 0 : index
    %c0_26 = arith.constant 0 : index
    %55 = vector.load %arg1[%c1, %c0_25, %c0_26] : memref<2x128x24xbf16, #tpu.memory_space<vmem>>, vector<1x128x24xbf16>
    %56 = vector.shape_cast %55 : vector<1x128x24xbf16> to vector<128x24xbf16>
    %c1_27 = arith.constant 1 : index
    %c0_28 = arith.constant 0 : index
    %c0_29 = arith.constant 0 : index
    %57 = vector.load %arg2[%c1_27, %c0_28, %c0_29] : memref<2x128x1xf32, #tpu.memory_space<vmem>>, vector<1x128x1xf32>
    %58 = vector.shape_cast %57 : vector<1x128x1xf32> to vector<128x1xf32>
    %cst_30 = arith.constant dense<0.000000e+00> : vector<128x24xf32>
    %59 = tpu.matmul %56, %0, %cst_30 {dimension_numbers = #tpu.dot_dimension_numbers<[1], [0], [0], [1], [0, 0, 1, 1], [], []>} : vector<128x24xbf16>, vector<24x24xbf16>, vector<128x24xf32> -> vector<128x24xf32>
    %60 = vector.shape_cast %59 : vector<128x24xf32> to vector<1x128x24xf32>
    %cst_31 = arith.constant dense<0.000000e+00> : vector<1xf32>
    %61 = vector.multi_reduction <add>, %60, %cst_31 [1, 2] : vector<1x128x24xf32> to vector<1xf32>
    %62 = vector.shape_cast %61 : vector<1xf32> to vector<1x1x1xf32>
    %63 = vector.extract %62[0, 0, 0] : f32 from vector<1x1x1xf32>
    %cst_32 = arith.constant 0.00260416674 : f32
    %64 = arith.mulf %63, %cst_32 : f32
    %65 = arith.mulf %59, %59 : vector<128x24xf32>
    %66 = vector.shape_cast %65 : vector<128x24xf32> to vector<1x128x24xf32>
    %cst_33 = arith.constant dense<0.000000e+00> : vector<1xf32>
    %67 = vector.multi_reduction <add>, %66, %cst_33 [1, 2] : vector<1x128x24xf32> to vector<1xf32>
    %68 = vector.shape_cast %67 : vector<1xf32> to vector<1x1x1xf32>
    %69 = vector.extract %68[0, 0, 0] : f32 from vector<1x1x1xf32>
    %cst_34 = arith.constant 0.00260416674 : f32
    %70 = arith.mulf %69, %cst_34 : f32
    %71 = arith.mulf %64, %64 : f32
    %72 = arith.subf %70, %71 : f32
    %cst_35 = arith.constant 0.000000e+00 : f32
    %73 = arith.maximumf %72, %cst_35 : f32
    %74 = vector.broadcast %64 : f32 to vector<128x24xf32>
    %75 = arith.subf %59, %74 : vector<128x24xf32>
    %cst_36 = arith.constant 9.99999974E-6 : f32
    %76 = arith.addf %73, %cst_36 : f32
    %77 = math.rsqrt %76 : f32
    %78 = vector.broadcast %77 : f32 to vector<128x24xf32>
    %79 = arith.mulf %75, %78 : vector<128x24xf32>
    %80 = arith.mulf %79, %1 : vector<128x24xf32>
    %81 = arith.addf %80, %2 : vector<128x24xf32>
    %cst_37 = arith.constant 0.000000e+00 : f32
    %82 = vector.broadcast %cst_37 : f32 to vector<128x24xf32>
    %83 = arith.cmpf oge, %81, %82 : vector<128x24xf32>
    %cst_38 = arith.constant 2.000000e-01 : f32
    %84 = vector.broadcast %cst_38 : f32 to vector<128x24xf32>
    %85 = arith.mulf %84, %81 : vector<128x24xf32>
    %86 = arith.select %83, %81, %85 : vector<128x24xi1>, vector<128x24xf32>
    %cst_39 = arith.constant 5.000000e-01 : f32
    %87 = vector.broadcast %cst_39 : f32 to vector<128x1xf32>
    %88 = arith.cmpf ogt, %58, %87 : vector<128x1xf32>
    %cst_40 = arith.constant 0xFF800000 : f32
    %89 = vector.shape_cast %88 : vector<128x1xi1> to vector<128x1xi1>
    %90 = vector.broadcast %89 : vector<128x1xi1> to vector<128x24xi1>
    %91 = vector.broadcast %cst_40 : f32 to vector<128x24xf32>
    %92 = arith.select %90, %86, %91 : vector<128x24xi1>, vector<128x24xf32>
    %cst_41 = arith.constant dense<0xFF800000> : vector<24xf32>
    %93 = vector.multi_reduction <maximumf>, %92, %cst_41 [0] : vector<128x24xf32> to vector<24xf32>
    %94 = vector.shape_cast %93 : vector<24xf32> to vector<1x24xf32>
    %95 = vector.shape_cast %58 : vector<128x1xf32> to vector<1x128x1xf32>
    %cst_42 = arith.constant dense<0.000000e+00> : vector<1xf32>
    %96 = vector.multi_reduction <add>, %95, %cst_42 [1, 2] : vector<1x128x1xf32> to vector<1xf32>
    %97 = vector.shape_cast %96 : vector<1xf32> to vector<1x1x1xf32>
    %98 = vector.extract %97[0, 0, 0] : f32 from vector<1x1x1xf32>
    %cst_43 = arith.constant 1.000000e-01 : f32
    %99 = arith.maximumf %98, %cst_43 : f32
    %100 = vector.broadcast %58 : vector<128x1xf32> to vector<128x24xf32>
    %101 = arith.mulf %86, %100 : vector<128x24xf32>
    %cst_44 = arith.constant dense<0.000000e+00> : vector<24xf32>
    %102 = vector.multi_reduction <add>, %101, %cst_44 [0] : vector<128x24xf32> to vector<24xf32>
    %103 = vector.shape_cast %102 : vector<24xf32> to vector<1x24xf32>
    %104 = vector.broadcast %99 : f32 to vector<1x24xf32>
    %105 = arith.divf %103, %104 : vector<1x24xf32>
    %106 = arith.addf %94, %105 : vector<1x24xf32>
    %107 = tpu.concatenate %54, %106 in 0 : vector<1x24xf32>, vector<1x24xf32> -> vector<2x24xf32>
    %c0_45 = arith.constant 0 : index
    %c0_46 = arith.constant 0 : index
    %c0_47 = arith.constant 0 : index
    %108 = vector.load %arg6[%c0_45, %c0_46, %c0_47] : memref<1x2x24xf32, #tpu.memory_space<vmem>>, vector<1x2x24xf32>
    %109 = vector.shape_cast %108 : vector<1x2x24xf32> to vector<2x24xf32>
    %110 = vector.shape_cast %107 : vector<2x24xf32> to vector<1x2x24xf32>
    tpu.vector_store %arg6[%c0_45, %c0_46, %c0_47], %110 {strides = array<i32>} : memref<1x2x24xf32, #tpu.memory_space<vmem>>, vector<1x2x24xf32>,
    return
  }
  func.func @transform_0(%arg0: i32) -> (i32, i32, i32) {
    %c0_i32 = arith.constant 0 : i32
    %c0_i32_0 = arith.constant 0 : i32
    %c0_i32_1 = arith.constant 0 : i32
    return %arg0, %c0_i32, %c0_i32_0 : i32, i32, i32
  }
  func.func @transform_1(%arg0: i32) -> (i32, i32, i32) {
    %c0_i32 = arith.constant 0 : i32
    %c0_i32_0 = arith.constant 0 : i32
    %c0_i32_1 = arith.constant 0 : i32
    return %arg0, %c0_i32, %c0_i32_0 : i32, i32, i32
  }
  func.func @transform_2(%arg0: i32) -> (i32, i32) {
    %c0_i32 = arith.constant 0 : i32
    %c0_i32_0 = arith.constant 0 : i32
    %c0_i32_1 = arith.constant 0 : i32
    return %c0_i32, %c0_i32_0 : i32, i32
  }
  func.func @transform_3(%arg0: i32) -> (i32, i32) {
    %c0_i32 = arith.constant 0 : i32
    %c0_i32_0 = arith.constant 0 : i32
    %c0_i32_1 = arith.constant 0 : i32
    return %c0_i32, %c0_i32_0 : i32, i32
  }
  func.func @transform_4(%arg0: i32) -> (i32, i32) {
    %c0_i32 = arith.constant 0 : i32
    %c0_i32_0 = arith.constant 0 : i32
    %c0_i32_1 = arith.constant 0 : i32
    return %c0_i32, %c0_i32_0 : i32, i32
  }
  func.func @transform_5(%arg0: i32) -> (i32, i32, i32) {
    %c0_i32 = arith.constant 0 : i32
    %c0_i32_0 = arith.constant 0 : i32
    %c0_i32_1 = arith.constant 0 : i32
    return %arg0, %c0_i32, %c0_i32_0 : i32, i32, i32
  }
}

</mosaic_0001>

<bundles_post_ra>
// kernel: neg.0
= control target key start
LH: loop header
LB: loop body
LE: loop exit
PB: predicated region body
PF: predicated region fallthrough
CT: control target
= control target key end

     0   :  { %s24_s0 = inlined_call_operand.vmem [shape: f32[4,16], index: 0, kind: input, shape index: {}]   ;;  %s25_s1 = inlined_call_operand.vmem [shape: f32[4,16], index: 1, kind: output, shape index: {}]  }
   0x1   :  { %v2_v0 = vld [vmem:[%s24_s0] sm:$0xf] }
   0x2   :  { %v5_v1 = vxor.u32 2147483648, %v2_v0 }
   0x4   :  { %7 = vst [vmem:[%s25_s1] sm:$0xf] %v5_v1 }

// kernel: encoder_forward.4
= control target key start
LH: loop header
LB: loop body
LE: loop exit
PB: predicated region body
PF: predicated region fallthrough
CT: control target
= control target key end

     0   :  { %s1755_s23 = smov 0   ;;  %s2389_s0 = inlined_call_operand.vmem [shape: f32[4,1,512], index: 0, kind: input, shape index: {}]   ;;  %s2390_s1 = inlined_call_operand.vmem [shape: f32[4,4,512], index: 1, kind: input, shape index: {}]   ;;  %s2391_s2 = inlined_call_operand.vmem [shape: f32[4,8,128], index: 2, kind: input, shape index: {}]   ;;  %s2392_s3 = inlined_call_operand.vmem [shape: f32[4,8,512], index: 3, kind: input, shape index: {}]   ;;  %s2393_s4 = inlined_call_operand.vmem [shape: f32[4,1,128], index: 4, kind: input, shape index: {}]   ;;  %s2394_s5 = inlined_call_operand.<no memory space> [shape: f32[1,1], index: 5, kind: input, shape index: {}]   ;;  %s2395_s6 = inlined_call_operand.vmem [shape: f32[4,1], index: 6, kind: input, shape index: {}]   ;;  %s2396_s7 = inlined_call_operand.vmem [shape: f32[2,512], index: 7, kind: input, shape index: {}]   ;;  %s2397_s8 = inlined_call_operand.vmem [shape: f32[2,512], index: 8, kind: input, shape index: {}]   ;;  %s2398_s9 = inlined_call_operand.vmem [shape: bf16[16,8], index: 9, kind: input, shape index: {}]   ;;  %s2399_s10 = inlined_call_operand.vmem [shape: f32[16,512], index: 10, kind: input, shape index: {}]   ;;  %s2400_s11 = inlined_call_operand.vmem [shape: f32[16,512], index: 11, kind: input, shape index: {}]   ;;  %s2401_s12 = inlined_call_operand.vmem [shape: f32[4,16,128], index: 12, kind: output, shape index: {}]  }
   0x1   :  { %17 = sst [smem:[#allocation2]] %s2394_s5 }
   0x2 LB: > { %s1563_s24 = sadd.s32 4294967295, %s1682_s23   ;;  %p1567_p0 = scmp.ge.s32.totalorder %s1682_s23, 1  ;;  %s1682_s23 = sphi %s1755_s23, %s23_s23  }
   0x3   : > { %p409_p1 = scmp.lt.s32.totalorder %s1682_s23, 3 }
   0x5   : > { %p410_p2 = pnand %p1567_p0, %p409_p1 }
   0x6   : > { %s1568_s5 = sshll.u32 (!%p410_p2), %s1563_s24, 1  ;;  %s530_s28 = sld [smem:[#allocation2]] (!%p410_p2) }
   0x7   : > { %413 = sbr.rel (%p410_p2) target bundleno = 869 (0x365), region = 68  ;;  %p474_p3 = scmp.lt.s32.totalorder (!%p410_p2), %s1568_s5, 3 }
   0x8   : > { %s1686_s26 = smov (!%p410_p2), 0.0  }
   0xc   : > { %v534_v0 = vld [vmem:[%s2395_s6] sm:$0xf]  ;;  %v1684_v1 = vmov 0   ;;  %s2415_s5 = smov (!%p474_p3, %s1568_s5), 3  ;;  %v1685_v2 = vmov 839922192   ;;  %v531_v15 = vstv %s530_s28 }
   0xd   : > { %1633 = vset.pattern.permute.xlu0 %v1684_v1  ;;  %v540_v3 = vunpack.c.l.s4 %v1685_v2  ;;  %s1606_s27 = sshll.u32 %s2415_s5, 4  ;;  %s1569_s14 = sshll.u32 %s2415_s5, 2  ;;  %vm575_vm0 = vcmask 1043456   ;;  %v752_v24 = vld [vmem:[%s2396_s7] sm:$0xff]  ;;  %vm650_vm1 = vcmask 1040384   ;;  %vm659_vm2 = vcmask 1041408  }
   0xe   : > { %537 = vperm.xlu0 %1633, %v534_v0   ;;  %s484_s13 = scalar_lea.vmem %s2390_s1, %s1606_s27  ;;  %s477_s17 = scalar_lea.vmem %s2389_s0, %s1569_s14  ;;  %v781_v61 = vld [vmem:[%s2397_s8] sm:$0xff] }
   0xf   : > { %v541_v4 = vunpack.c.0.s8 %v540_v3  ;;  %v514_v6 = vld [vmem:[%s484_s13] sm:$0xff]  ;;  %v515_v7 = vld [vmem:[%s484_s13 + $0x8] sm:$0xff]  ;;  %v516_v8 = vld [vmem:[%s484_s13 + $0x10] sm:$0xff]  ;;  %s1574_s22 = sshll.u32 %s2415_s5, 3  ;;  %s1607_s24 = sshll.u32 %s2415_s5, 5 }
  0x10   : > { %v517_v9 = vld [vmem:[%s484_s13 + $0x18] sm:$0xff]  ;;  %v512_v14 = vld [vmem:[%s477_s17] sm:$0xf]  ;;  %v513_v17 = vld [vmem:[%s477_s17 + $0x4] sm:$0xf]  ;;  %s1929_s28 = scalar_lea.vmem %s2391_s2, %s1574_s22  ;;  %s1934_s13 = scalar_lea.vmem %s2392_s3, %s1607_s24 }
  0x11   : > { %v1778_v18 = vmul.f32 %v531_v15, %v512_v14  ;;  %v1780_v19 = vmul.f32 %v531_v15, %v513_v17  ;;  %s2228_s18 = scalar_lea.vmem %s2393_s4, %s2415_s5 }
  0x13   : > { %v634_v20 = vperm.slane %v1778_v18, 0  ;;  %v635_v21 = vperm.slane %v1778_v18, 1  ;;  %v636_v22 = vperm.slane %v1778_v18, 2  ;;  %v637_v23 = vperm.slane %v1778_v18, 3 }
  0x14   : > { %v638_v25 = vperm.slane %v1780_v19, 0  ;;  %v639_v26 = vperm.slane %v1780_v19, 1  ;;  %v640_v27 = vperm.slane %v1780_v19, 2  ;;  %v641_v28 = vperm.slane %v1780_v19, 3 }
  0x80   : > { %v538_v5 = vpop.permute.xlu0 %537 }
  0x81   : > { %v542_v10 = vperm.slane %v538_v5, %v541_v4 }
  0x83   : > { %v544_v11 = vmul.f32 %v542_v10, %v514_v6  ;;  %v545_v12 = vmul.f32 %v542_v10, %v515_v7  ;;  %v546_v13 = vmul.f32 %v542_v10, %v516_v8  ;;  %v547_v16 = vmul.f32 %v542_v10, %v517_v9 }
  0x85   : > { %552 = vst [vmem:[#allocation1] ss:$2 sm:$0xff] %v544_v11 }
  0x86   : > { %554 = vst [vmem:[#allocation1 + $0x10] ss:$2 sm:$0xff] %v545_v12 }
  0x87   : > { %560 = vst [vmem:[#allocation1 + $0x20] ss:$2 sm:$0xff] %v546_v13 }
  0x88   : > { %562 = vst [vmem:[#allocation1 + $0x30] ss:$2 sm:$0xff] %v547_v16 }
  0x8c   : > { %v555_v29 = vld.sshfl [vmem:[#allocation1] sm:$0xff pattern:$0x75316420]  ;;  %v556_v30 = vld.sshfl [vmem:[#allocation1 + $0x8] sm:$0xff pattern:$0x75316420] }
  0x8d   : > { %v557_v31 = vld.sshfl [vmem:[#allocation1 + $0x10] sm:$0xff pattern:$0x75316420]  ;;  %v558_v32 = vld.sshfl [vmem:[#allocation1 + $0x18] sm:$0xff pattern:$0x75316420] }
  0x8e   : > { %v576_v33 = vsel %vm575_vm0, %v555_v29, 0.0  ;;  %v583_v34 = vsel %vm575_vm0, %v556_v30, 0.0  ;;  %v590_v35 = vsel %vm575_vm0, %v557_v31, 0.0  ;;  %v597_v36 = vsel %vm575_vm0, %v558_v32, 0.0  ;;  %754 = vst [vmem:[#allocation1] ss:$4 sm:$0xff] %v752_v24 }
  0x8f   : > { %v577_v37 = vrot.slane %v576_v33, 4  ;;  %v584_v38 = vrot.slane %v583_v34, 4  ;;  %v591_v39 = vrot.slane %v590_v35, 4  ;;  %v598_v40 = vrot.slane %v597_v36, 4 }
  0x90   : > { %v563_v41 = vld.sshfl [vmem:[#allocation1 + $0x20] sm:$0xff pattern:$0x75316420]  ;;  %v564_v42 = vld.sshfl [vmem:[#allocation1 + $0x28] sm:$0xff pattern:$0x75316420] }
  0x91   : > { %v578_v43 = vadd.f32 %v577_v37, %v576_v33  ;;  %v585_v44 = vadd.f32 %v584_v38, %v583_v34  ;;  %v592_v45 = vadd.f32 %v591_v39, %v590_v35  ;;  %v599_v46 = vadd.f32 %v598_v40, %v597_v36  ;;  %v565_v47 = vld.sshfl [vmem:[#allocation1 + $0x30] sm:$0xff pattern:$0x75316420]  ;;  %v566_v48 = vld.sshfl [vmem:[#allocation1 + $0x38] sm:$0xff pattern:$0x75316420] }
  0x92   : > { %v604_v49 = vsel %vm575_vm0, %v563_v41, 0.0  ;;  %v611_v50 = vsel %vm575_vm0, %v564_v42, 0.0  ;;  %v618_v51 = vsel %vm575_vm0, %v565_v47, 0.0  ;;  %v625_v52 = vsel %vm575_vm0, %v566_v48, 0.0  ;;  %760 = vst [vmem:[#allocation1 + $0x20] ss:$4 sm:$0xff] %v752_v24 }
  0x93   : > { %v579_v53 = vrot.slane %v578_v43, 2  ;;  %v586_v54 = vrot.slane %v585_v44, 2  ;;  %v593_v55 = vrot.slane %v592_v45, 2  ;;  %v600_v56 = vrot.slane %v599_v46, 2 }
  0x94   : > { %v605_v57 = vrot.slane %v604_v49, 4  ;;  %v612_v58 = vrot.slane %v611_v50, 4  ;;  %v619_v59 = vrot.slane %v618_v51, 4  ;;  %v626_v60 = vrot.slane %v625_v52, 4 }
  0x95   : > { %v580_v62 = vadd.f32 %v579_v53, %v578_v43  ;;  %v587_v63 = vadd.f32 %v586_v54, %v585_v44  ;;  %v594_v0 = vadd.f32 %v593_v55, %v592_v45  ;;  %v601_v1 = vadd.f32 %v600_v56, %v599_v46  ;;  %v1804_v2 = vld.sshfl [vmem:[#allocation1] sm:$0xff pattern:$0x73625140]  ;;  %v1806_v3 = vld.sshfl [vmem:[#allocation1 + $0x8] sm:$0xff pattern:$0x73625140] }
  0x96   : > { %v606_v4 = vadd.f32 %v605_v57, %v604_v49  ;;  %v613_v5 = vadd.f32 %v612_v58, %v611_v50  ;;  %v620_v6 = vadd.f32 %v619_v59, %v618_v51  ;;  %v627_v7 = vadd.f32 %v626_v60, %v625_v52  ;;  %v1808_v8 = vld.sshfl [vmem:[#allocation1 + $0x10] sm:$0xff pattern:$0x73625140]  ;;  %v1810_v9 = vld.sshfl [vmem:[#allocation1 + $0x18] sm:$0xff pattern:$0x73625140] }
  0x97   : > { %v581_v10 = vrot.slane %v580_v62, 1  ;;  %v588_v11 = vrot.slane %v587_v63, 1  ;;  %v595_v12 = vrot.slane %v594_v0, 1  ;;  %v602_v13 = vrot.slane %v601_v1, 1  ;;  %783 = vst [vmem:[#allocation1] ss:$4 sm:$0xff] %v781_v61 }
  0x98   : > { %v607_v14 = vrot.slane %v606_v4, 2  ;;  %v614_v15 = vrot.slane %v613_v5, 2  ;;  %v621_v16 = vrot.slane %v620_v6, 2  ;;  %v628_v17 = vrot.slane %v627_v7, 2 }
  0x99   : > { %v582_v24 = vadd.f32 %v581_v10, %v580_v62  ;;  %v589_v29 = vadd.f32 %v588_v11, %v587_v63  ;;  %v596_v30 = vadd.f32 %v595_v12, %v594_v0  ;;  %v603_v31 = vadd.f32 %v602_v13, %v601_v1  ;;  %v1812_v32 = vld.sshfl [vmem:[#allocation1 + $0x20] sm:$0xff pattern:$0x73625140]  ;;  %v1814_v33 = vld.sshfl [vmem:[#allocation1 + $0x28] sm:$0xff pattern:$0x73625140] }
  0x9a   : > { %v608_v34 = vadd.f32 %v607_v14, %v606_v4  ;;  %v615_v35 = vadd.f32 %v614_v15, %v613_v5  ;;  %v622_v36 = vadd.f32 %v621_v16, %v620_v6  ;;  %v629_v37 = vadd.f32 %v628_v17, %v627_v7  ;;  %v1816_v38 = vld.sshfl [vmem:[#allocation1 + $0x30] sm:$0xff pattern:$0x73625140]  ;;  %v1818_v39 = vld.sshfl [vmem:[#allocation1 + $0x38] sm:$0xff pattern:$0x73625140] }
  0x9b   : > { %v1823_v40 = vsel %vm650_vm1, %v634_v20, %v582_v24  ;;  %v1828_v41 = vsel %vm650_vm1, %v635_v21, %v589_v29  ;;  %v1833_v42 = vsel %vm650_vm1, %v636_v22, %v596_v30  ;;  %v1838_v43 = vsel %vm650_vm1, %v637_v23, %v603_v31  ;;  %789 = vst [vmem:[#allocation1 + $0x20] ss:$4 sm:$0xff] %v781_v61 }
  0x9c   : > { %v660_v20 = vsel %vm659_vm2, %v1823_v40, 0.0  ;;  %v661_v44 = vsel %vm659_vm2, %v1828_v41, 0.0  ;;  %v663_v21 = vsel %vm659_vm2, %v1833_v42, 0.0  ;;  %v665_v45 = vsel %vm659_vm2, %v1838_v43, 0.0 }
  0x9d   : > { %v662_v22 = vadd.f32 %v661_v44, %v660_v20  ;;  %v609_v46 = vrot.slane %v608_v34, 1  ;;  %v616_v47 = vrot.slane %v615_v35, 1  ;;  %v623_v18 = vrot.slane %v622_v36, 1 }
  0x9e   : > { %v630_v48 = vrot.slane %v629_v37, 1  ;;  %v680_v23 = vmul.f32 %v1823_v40, %v1823_v40  ;;  %v681_v49 = vmul.f32 %v1828_v41, %v1828_v41  ;;  %v682_v50 = vmul.f32 %v1833_v42, %v1833_v42 }
  0x9f   : > { %v664_v51 = vadd.f32 %v663_v21, %v662_v22  ;;  %v610_v52 = vadd.f32 %v609_v46, %v608_v34  ;;  %v617_v53 = vadd.f32 %v616_v47, %v615_v35  ;;  %v624_v54 = vadd.f32 %v623_v18, %v622_v36 }
  0xa0   : > { %v631_v55 = vadd.f32 %v630_v48, %v629_v37  ;;  %v683_v56 = vmul.f32 %v1838_v43, %v1838_v43  ;;  %v688_v57 = vsel %vm659_vm2, %v680_v23, 0.0  ;;  %v689_v58 = vsel %vm659_vm2, %v681_v49, 0.0 }
  0xa1   : > { %v666_v59 = vadd.f32 %v665_v45, %v664_v51  ;;  %v1861_v60 = vsel %vm650_vm1, %v638_v25, %v610_v52  ;;  %v1866_v61 = vsel %vm650_vm1, %v639_v26, %v617_v53  ;;  %v1871_v62 = vsel %vm650_vm1, %v640_v27, %v624_v54 }
  0xa2   : > { %v1876_v63 = vsel %vm650_vm1, %v641_v28, %v631_v55  ;;  %v684_v0 = vmul.f32 %v1861_v60, %v1861_v60  ;;  %v685_v25 = vmul.f32 %v1866_v61, %v1866_v61  ;;  %v686_v26 = vmul.f32 %v1871_v62, %v1871_v62 }
  0xa3   : > { %667 = vadd.xlane.f32.xlu0 %v666_v59  ;;  %v687_v1 = vmul.f32 %v1876_v63, %v1876_v63  ;;  %v690_v27 = vadd.f32 %v689_v58, %v688_v57  ;;  %v691_v28 = vsel %vm659_vm2, %v682_v50, 0.0  ;;  %v669_v5 = vsel %vm659_vm2, %v1861_v60, 0.0 }
  0xa4   : > { %v697_v4 = vsel %vm659_vm2, %v684_v0, 0.0  ;;  %v698_v19 = vsel %vm659_vm2, %v685_v25, 0.0  ;;  %v670_v10 = vsel %vm659_vm2, %v1866_v61, 0.0  ;;  %v700_v11 = vsel %vm659_vm2, %v686_v26, 0.0 }
  0xa5   : > { %v699_v6 = vadd.f32 %v698_v19, %v697_v4  ;;  %v692_v7 = vadd.f32 %v691_v28, %v690_v27  ;;  %v693_v12 = vsel %vm659_vm2, %v683_v56, 0.0  ;;  %v671_v15 = vadd.f32 %v670_v10, %v669_v5  ;;  %v784_v5 = vld.sshfl [vmem:[#allocation1] sm:$0xff pattern:$0x73625140] }
  0xa6   : > { %v702_v16 = vsel %vm659_vm2, %v687_v1, 0.0  ;;  %v672_v24 = vsel %vm659_vm2, %v1871_v62, 0.0  ;;  %v674_v30 = vsel %vm659_vm2, %v1876_v63, 0.0  ;;  %v786_v10 = vld.sshfl [vmem:[#allocation1 + $0x10] sm:$0xff pattern:$0x73625140] }
  0xa7   : > { %v701_v13 = vadd.f32 %v700_v11, %v699_v6  ;;  %v694_v14 = vadd.f32 %v693_v12, %v692_v7  ;;  %v673_v29 = vadd.f32 %v672_v24, %v671_v15  ;;  %v785_v7 = vld.sshfl [vmem:[#allocation1 + $0x8] sm:$0xff pattern:$0x73625140] }
  0xa9   : > { %v703_v17 = vadd.f32 %v702_v16, %v701_v13  ;;  %695 = vadd.xlane.f32.xlu1 %v694_v14  ;;  %v675_v31 = vadd.f32 %v674_v30, %v673_v29 }
  0xab   : > { %704 = vadd.xlane.f32.xlu2 %v703_v17 }
  0xb1   : > { %676 = vadd.xlane.f32.xlu1 %v675_v31 }
 0x116   : > { %v668_v34 = vpop.xlane.xlu0 %667 }
 0x117   : > { %v678_v35 = vmul.f32 0.015625, %v668_v34 }
 0x119   : > { %v708_v36 = vmul.f32 %v678_v35, %v678_v35  ;;  %v714_v58 = vsub.f32 %v1823_v40, %v678_v35  ;;  %v715_v59 = vsub.f32 %v1828_v41, %v678_v35  ;;  %v716_v0 = vsub.f32 %v1833_v42, %v678_v35 }
 0x11a   : > { %v717_v25 = vsub.f32 %v1838_v43, %v678_v35  ;;  %v787_v43 = vld.sshfl [vmem:[#allocation1 + $0x18] sm:$0xff pattern:$0x73625140] }
 0x11c   : > { %v696_v37 = vpop.xlane.xlu1 %695 }
 0x11d   : > { %v706_v20 = vmul.f32 0.015625, %v696_v37 }
 0x11e   : > { %v705_v22 = vpop.xlane.xlu2 %704 }
 0x11f   : > { %v710_v44 = vsub.f32 %v706_v20, %v708_v36  ;;  %v707_v18 = vmul.f32 0.015625, %v705_v22 }
 0x121   : > { %v712_v21 = vmax.f32 %v710_v44, 0.0 }
 0x123   : > { %v722_v45 = vadd.f32 1e-05, %v712_v21  ;;  %v790_v21 = vld.sshfl [vmem:[#allocation1 + $0x20] sm:$0xff pattern:$0x73625140] }
 0x124   : > { %v677_v46 = vpop.xlane.xlu1 %676 }
 0x125   : > { %1636 = vrsqrt.f32 %v722_v45  ;;  %v1900_v47 = vmul.f32 0.015625, %v677_v46  ;;  %vm730_vm4 = vweird.f32 %v722_v45 }
 0x127   : > { %v709_v48 = vmul.f32 %v1900_v47, %v1900_v47  ;;  %v721_v34 = vsub.f32 %v1876_v63, %v1900_v47 }
 0x129   : > { %v711_v23 = vsub.f32 %v707_v18, %v709_v48 }
 0x12b   : > { %v1637_v49 = vpop.eup %1636  ;;  %v713_v50 = vmax.f32 %v711_v23, 0.0 }
 0x12c   : > { %v725_v51 = vmul.f32 %v1637_v49, %v722_v45  ;;  %vm731_vm3 = vweird.f32 %v1637_v49  ;;  %v791_v45 = vld.sshfl [vmem:[#allocation1 + $0x28] sm:$0xff pattern:$0x73625140] }
 0x12d   : > { %v723_v52 = vadd.f32 1e-05, %v713_v50  ;;  %vm732_vm5 = vmor %vm730_vm4, %vm731_vm3  ;;  %v1941_v50 = vld [vmem:[%s1929_s28] sm:$0xff] }
 0x12e   : > { %v726_v53 = vmul.f32 %v1637_v49, %v725_v51  ;;  %v1944_v51 = vld [vmem:[%s1934_s13] sm:$0xff] }
 0x12f   : > { %1638 = vrsqrt.f32 %v723_v52  ;;  %vm740_vm7 = vweird.f32 %v723_v52 }
 0x130   : > { %v727_v54 = vmul.f32 0.5, %v726_v53 }
 0x132   : > { %v728_v55 = vsub.f32 1.5, %v727_v54 }
 0x134   : > { %v729_v56 = vmul.f32 %v1637_v49, %v728_v55 }
 0x135   : > { %v1639_v57 = vpop.eup %1638 }
 0x136   : > { %v733_v26 = vsel %vm732_vm5, %v1637_v49, %v729_v56  ;;  %v735_v1 = vmul.f32 %v1639_v57, %v723_v52  ;;  %vm741_vm6 = vweird.f32 %v1639_v57 }
 0x137   : > { %v744_v27 = vmul.f32 %v733_v26, %v714_v58  ;;  %v745_v4 = vmul.f32 %v733_v26, %v715_v59  ;;  %v746_v19 = vmul.f32 %v733_v26, %v716_v0  ;;  %v747_v28 = vmul.f32 %v733_v26, %v717_v25  ;;  %vm742_vm8 = vmor %vm740_vm7, %vm741_vm6  ;;  %v1959_v0 = vld [vmem:[%s1934_s13 + $0x10] sm:$0xff]  ;;  %v1962_v25 = vld [vmem:[%s1934_s13 + $0x18] sm:$0xff] }
 0x138   : > { %v736_v6 = vmul.f32 %v1639_v57, %v735_v1  ;;  %v994_v59 = vsub.f32 %v1944_v51, %v1941_v50 }
 0x139   : > { %v773_v11 = vmul.f32 %v1804_v2, %v744_v27  ;;  %v774_v40 = vmul.f32 %v1806_v3, %v745_v4  ;;  %v775_v41 = vmul.f32 %v1808_v8, %v746_v19  ;;  %v776_v42 = vmul.f32 %v1810_v9, %v747_v28 }
 0x13a   : > { %v737_v12 = vmul.f32 0.5, %v736_v6  ;;  %v718_v3 = vsub.f32 %v1861_v60, %v1900_v47  ;;  %v719_v8 = vsub.f32 %v1866_v61, %v1900_v47  ;;  %v720_v9 = vsub.f32 %v1871_v62, %v1900_v47 }
 0x13b   : > { %v802_v13 = vadd.f32 %v784_v5, %v773_v11  ;;  %v803_v14 = vadd.f32 %v785_v7, %v774_v40  ;;  %v804_v15 = vadd.f32 %v786_v10, %v775_v41  ;;  %v805_v16 = vadd.f32 %v787_v43, %v776_v42 }
 0x13c   : > { %v738_v17 = vsub.f32 1.5, %v737_v12  ;;  %v996_v6 = vsub.f32 %v1959_v0, %v1941_v50  ;;  %v997_v7 = vsub.f32 %v1962_v25, %v1941_v50  ;;  %v2074_v25 = vld [vmem:[%s1929_s28 + $0x8] sm:$0xff] }
 0x13d   : > { %v1582_v24 = vmul.f32 -1.442695, %v802_v13  ;;  %v1583_v29 = vmul.f32 -1.442695, %v803_v14  ;;  %v1584_v30 = vmul.f32 -1.442695, %v804_v15 }
 0x13e   : > { %v1585_v31 = vmul.f32 -1.442695, %v805_v16  ;;  %v739_v2 = vmul.f32 %v1639_v57, %v738_v17 }
 0x13f   : > { %1640 = vpow2.f32 %v1582_v24 }
 0x140   : > { %1642 = vpow2.f32 %v1583_v29  ;;  %v743_v35 = vsel %vm742_vm8, %v1639_v57, %v739_v2  ;;  %v1953_v57 = vld [vmem:[%s1934_s13 + $0x8] sm:$0xff] }
 0x141   : > { %1644 = vpow2.f32 %v1584_v30  ;;  %v748_v36 = vmul.f32 %v743_v35, %v718_v3  ;;  %v749_v37 = vmul.f32 %v743_v35, %v719_v8  ;;  %v750_v20 = vmul.f32 %v743_v35, %v720_v9 }
 0x142   : > { %1646 = vpow2.f32 %v1585_v31  ;;  %v751_v60 = vmul.f32 %v743_v35, %v721_v34  ;;  %v995_v28 = vsub.f32 %v1953_v57, %v1941_v50 }
 0x143   : > { %v777_v44 = vmul.f32 %v1812_v32, %v748_v36  ;;  %v778_v61 = vmul.f32 %v1814_v33, %v749_v37  ;;  %v779_v62 = vmul.f32 %v1816_v38, %v750_v20  ;;  %v792_v33 = vld.sshfl [vmem:[#allocation1 + $0x30] sm:$0xff pattern:$0x73625140] }
 0x144   : > { %v780_v22 = vmul.f32 %v1818_v39, %v751_v60  ;;  %v793_v39 = vld.sshfl [vmem:[#allocation1 + $0x38] sm:$0xff pattern:$0x73625140] }
 0x145   : > { %v1641_v32 = vpop.eup %1640  ;;  %v806_v63 = vadd.f32 %v790_v21, %v777_v44  ;;  %v807_v38 = vadd.f32 %v791_v45, %v778_v61  ;;  %v808_v18 = vadd.f32 %v792_v33, %v779_v62 }
 0x146   : > { %v1643_v46 = vpop.eup %1642  ;;  %v1936_v47 = vadd.f32 1.0, %v1641_v32  ;;  %v809_v49 = vadd.f32 %v793_v39, %v780_v22 }
 0x147   : > { %v1645_v48 = vpop.eup %1644  ;;  %v1938_v23 = vadd.f32 1.0, %v1643_v46  ;;  %v1586_v54 = vmul.f32 -1.442695, %v806_v63  ;;  %v1587_v56 = vmul.f32 -1.442695, %v807_v38 }
 0x148   : > { %v1647_v52 = vpop.eup %1646  ;;  %v1946_v53 = vadd.f32 1.0, %v1645_v48  ;;  %1648 = vrcp.f32 %v1936_v47  ;;  %v1588_v58 = vmul.f32 -1.442695, %v808_v18  ;;  %v1589_v26 = vmul.f32 -1.442695, %v809_v49 }
 0x149   : > { %v1949_v55 = vadd.f32 1.0, %v1647_v52  ;;  %1650 = vrcp.f32 %v1938_v23  ;;  %v851_v1 = vand.u32 2147483647, %v1936_v47  ;;  %v853_v27 = vand.u32 2147483648, %v1936_v47 }
 0x14a   : > { %1652 = vrcp.f32 %v1946_v53  ;;  %v866_v4 = vand.u32 2147483647, %v1938_v23  ;;  %v868_v19 = vand.u32 2147483648, %v1938_v23  ;;  %v881_v5 = vand.u32 2147483647, %v1946_v53 }
 0x14b   : > { %1654 = vrcp.f32 %v1949_v55  ;;  %vm847_vm9 = vweird.f32 %v1936_v47  ;;  %vm862_vm10 = vweird.f32 %v1938_v23  ;;  %v883_v11 = vand.u32 2147483648, %v1946_v53 }
 0x14c   : > { %1656 = vpow2.f32 %v1586_v54  ;;  %vm1980_vm11 = vcmp.eq.f32.partialorder %v851_v1, 8.507059e+37  ;;  %v854_v43 = vor.u32 1.1754944e-38, %v853_v27  ;;  %vm877_vm12 = vweird.f32 %v1946_v53 }
 0x14d   : > { %1658 = vpow2.f32 %v1587_v56  ;;  %v896_v12 = vand.u32 2147483647, %v1949_v55  ;;  %vm1987_vm13 = vcmp.eq.f32.partialorder %v866_v4, 8.507059e+37  ;;  %v869_v16 = vor.u32 1.1754944e-38, %v868_v19 }
 0x14e   : > { %v1649_v10 = vpop.eup %1648  ;;  %1660 = vpow2.f32 %v1588_v58  ;;  %vm892_vm14 = vweird.f32 %v1949_v55  ;;  %vm1993_vm1 = vcmp.eq.f32.partialorder %v881_v5, 8.507059e+37  ;;  %v898_v31 = vand.u32 2147483648, %v1949_v55 }
 0x14f   : > { %v1651_v40 = vpop.eup %1650  ;;  %1662 = vpow2.f32 %v1589_v26  ;;  %v843_v41 = vmul.f32 %v1649_v10, %v1936_v47  ;;  %vm848_vm15 = vweird.f32 %v1649_v10  ;;  %v884_v8 = vor.u32 1.1754944e-38, %v883_v11 }
 0x150   : > { %v1653_v13 = vpop.eup %1652  ;;  %v858_v14 = vmul.f32 %v1651_v40, %v1938_v23  ;;  %vm863_vm2 = vweird.f32 %v1651_v40  ;;  %vm2001_vm3 = vcmp.eq.f32.partialorder %v896_v12, 8.507059e+37  ;;  %vm849_vm5 = vmor %vm847_vm9, %vm848_vm15  ;;  %v899_v18 = vor.u32 1.1754944e-38, %v898_v31 }
 0x151   : > { %v1655_v17 = vpop.eup %1654  ;;  %v844_v24 = vsub.f32 1.0, %v843_v41  ;;  %v873_v29 = vmul.f32 %v1653_v13, %v1946_v53  ;;  %vm878_vm4 = vweird.f32 %v1653_v13  ;;  %vm864_vm7 = vmor %vm862_vm10, %vm863_vm2 }
 0x152   : > { %v1657_v2 = vpop.eup %1656  ;;  %v859_v3 = vsub.f32 1.0, %v858_v14  ;;  %v888_v9 = vmul.f32 %v1655_v17, %v1949_v55  ;;  %vm893_vm6 = vweird.f32 %v1655_v17  ;;  %vm879_vm8 = vmor %vm877_vm12, %vm878_vm4 }
 0x153   : > { %v1659_v34 = vpop.eup %1658  ;;  %v1999_v35 = vadd.f32 1.0, %v1657_v2  ;;  %v845_v36 = vmul.f32 %v1649_v10, %v844_v24  ;;  %v874_v37 = vsub.f32 1.0, %v873_v29  ;;  %vm894_vm9 = vmor %vm892_vm14, %vm893_vm6 }
 0x154   : > { %v1661_v60 = vpop.eup %1660  ;;  %v2005_v44 = vadd.f32 1.0, %v1659_v34  ;;  %v860_v61 = vmul.f32 %v1651_v40, %v859_v3  ;;  %v889_v62 = vsub.f32 1.0, %v888_v9 }
 0x155   : > { %v1663_v21 = vpop.eup %1662  ;;  %v2007_v45 = vadd.f32 1.0, %v1661_v60  ;;  %1664 = vrcp.f32 %v1999_v35  ;;  %v846_v22 = vadd.f32 %v1649_v10, %v845_v36  ;;  %v875_v32 = vmul.f32 %v1653_v13, %v874_v37 }
 0x156   : > { %1666 = vrcp.f32 %v2005_v44  ;;  %v861_v33 = vadd.f32 %v1651_v40, %v860_v61  ;;  %v890_v63 = vmul.f32 %v1655_v17, %v889_v62  ;;  %v2014_v38 = vadd.f32 1.0, %v1663_v21 }
 0x157   : > { %v850_v46 = vsel %vm849_vm5, %v1649_v10, %v846_v22  ;;  %v876_v39 = vadd.f32 %v1653_v13, %v875_v32  ;;  %1668 = vrcp.f32 %v2007_v45  ;;  %v911_v23 = vand.u32 2147483647, %v1999_v35 }
 0x158   : > { %v855_v48 = vsel %vm1980_vm11, %v854_v43, %v850_v46  ;;  %v865_v49 = vsel %vm864_vm7, %v1651_v40, %v861_v33  ;;  %v891_v47 = vadd.f32 %v1655_v17, %v890_v63  ;;  %vm907_vm10 = vweird.f32 %v1999_v35  ;;  %v2086_v63 = vld [vmem:[%s2398_s9] sm:$0xff]  ;;  %v525_v46 = vld [vmem:[%s1934_s13 + $0x28] sm:$0xff] }
 0x159   : > { %v970_v52 = vrot.slane %v855_v48, 1  ;;  %v870_v54 = vsel %vm1987_vm13, %v869_v16, %v865_v49  ;;  %v880_v56 = vsel %vm879_vm8, %v1653_v13, %v876_v39  ;;  %v913_v53 = vand.u32 2147483648, %v1999_v35 }
 0x15a   : > { %v971_v58 = vrot.slane %v870_v54, 1  ;;  %v885_v26 = vsel %vm1993_vm1, %v884_v8, %v880_v56  ;;  %v895_v1 = vsel %vm894_vm9, %v1655_v17, %v891_v47  ;;  %1670 = vrcp.f32 %v2014_v38 }
 0x15b   : > { %v1665_v27 = vpop.eup %1664  ;;  %v986_v4 = vmul.f32 %v970_v52, %v855_v48  ;;  %v972_v19 = vrot.slane %v885_v26, 1  ;;  %v900_v55 = vsel %vm2001_vm3, %v899_v18, %v895_v1  ;;  %vm2038_vm12 = vcmp.eq.f32.partialorder %v911_v23, 8.507059e+37 }
 0x15c   : > { %v1667_v5 = vpop.eup %1666  ;;  %v987_v10 = vmul.f32 %v971_v58, %v870_v54  ;;  %v973_v11 = vrot.slane %v900_v55, 1  ;;  %v903_v40 = vmul.f32 %v1665_v27, %v1999_v35  ;;  %vm908_vm11 = vweird.f32 %v1665_v27 }
 0x15d   : > { %v1002_v42 = vperm.slane %v986_v4, 0  ;;  %v988_v43 = vmul.f32 %v972_v19, %v885_v26  ;;  %v914_v12 = vor.u32 1.1754944e-38, %v913_v53  ;;  %v918_v13 = vmul.f32 %v1667_v5, %v2005_v44  ;;  %v2043_v14 = vpop.eup %1668  ;;  %vm909_vm2 = vmor %vm907_vm10, %vm908_vm11 }
 0x15e   : > { %v1003_v15 = vperm.slane %v987_v10, 0  ;;  %v989_v16 = vmul.f32 %v973_v11, %v900_v55  ;;  %vm1053_vm13 = vcmask 64512   ;;  %v904_v17 = vsub.f32 1.0, %v903_v40 }
 0x15f   : > { %vm922_vm14 = vweird.f32 %v2005_v44  ;;  %v1010_v24 = vmul.f32 %v1002_v42, %v994_v59  ;;  %v1004_v29 = vperm.slane %v988_v43, 0  ;;  %v919_v30 = vsub.f32 1.0, %v918_v13 }
 0x160   : > { %vm923_vm15 = vweird.f32 %v1667_v5  ;;  %v1011_v31 = vmul.f32 %v1003_v15, %v995_v28  ;;  %v1005_v2 = vperm.slane %v989_v16, 0  ;;  %v905_v3 = vmul.f32 %v1665_v27, %v904_v17  ;;  %v2053_v9 = vpop.eup %1670  ;;  %v526_v15 = vld [vmem:[%s1934_s13 + $0x30] sm:$0xff] }
 0x161   : > { %v926_v8 = vand.u32 2147483647, %v2005_v44  ;;  %v1018_v34 = vadd.f32 %v1010_v24, %v1941_v50  ;;  %v1012_v51 = vmul.f32 %v1004_v29, %v996_v6  ;;  %v920_v59 = vmul.f32 %v1667_v5, %v919_v30  ;;  %vm924_vm3 = vmor %vm922_vm14, %vm923_vm15 }
 0x162   : > { %v928_v36 = vand.u32 2147483648, %v2005_v44  ;;  %v1019_v57 = vadd.f32 %v1011_v31, %v1941_v50  ;;  %v1013_v28 = vmul.f32 %v1005_v2, %v997_v7  ;;  %v906_v37 = vadd.f32 %v1665_v27, %v905_v3  ;;  %v524_v7 = vld [vmem:[%s1934_s13 + $0x20] sm:$0xff] }
 0x163   : > { %vm2064_vm1 = vcmp.eq.f32.partialorder %v926_v8, 8.507059e+37  ;;  %v1044_v60 = vpack.c.bf16 %v1018_v34, %v1018_v34  ;;  %v1020_v0 = vadd.f32 %v1012_v51, %v1941_v50  ;;  %v921_v6 = vadd.f32 %v1667_v5, %v920_v59 }
 0x164   : > { %v929_v61 = vor.u32 1.1754944e-38, %v928_v36  ;;  %v1045_v62 = vpack.c.bf16 %v1019_v57, %v1019_v57  ;;  %v1021_v21 = vadd.f32 %v1013_v28, %v1941_v50  ;;  %v910_v22 = vsel %vm909_vm2, %v1665_v27, %v906_v37  ;;  %v527_v57 = vld [vmem:[%s1934_s13 + $0x38] sm:$0xff]  ;;  %s2353_s13 = scalar_lea.vmem %s2401_s12, %s1606_s27 }
 0x165   : > { %v933_v32 = vmul.f32 %v2043_v14, %v2007_v45  ;;  %v1058_v33 = vsel %vm575_vm0, %v1044_v60, 0  ;;  %v1046_v35 = vpack.c.bf16 %v1020_v0, %v1020_v0  ;;  %v915_v50 = vsel %vm2038_vm12, %v914_v12, %v910_v22 }
 0x166   : > { %v925_v39 = vsel %vm924_vm3, %v1667_v5, %v921_v6  ;;  %1076 = vmatpush.bf16.msra.mxu0 %v1058_v33  ;;  %v1061_v44 = vsel %vm575_vm0, %v1045_v62, 0  ;;  %v1047_v18 = vpack.c.bf16 %v1021_v21, %v1021_v21  ;;  %v974_v48 = vrot.slane %v915_v50, 1 }
 0x167   : > { %v930_v49 = vsel %vm2064_vm1, %v929_v61, %v925_v39  ;;  %1090 = vmatpush.bf16.msra.mxu1 %v1061_v44  ;;  %v1064_v47 = vsel %vm575_vm0, %v1046_v35, 0  ;;  %v998_v52 = vsub.f32 %v524_v7, %v2074_v25  ;;  %v934_v56 = vsub.f32 1.0, %v933_v32 }
 0x168   : > { %v975_v54 = vrot.slane %v930_v49, 1  ;;  %1104 = vmatpush.bf16.msra.mxu2 %v1064_v47  ;;  %v1067_v23 = vsel %vm575_vm0, %v1047_v18, 0  ;;  %v990_v58 = vmul.f32 %v974_v48, %v915_v50  ;;  %v999_v26 = vsub.f32 %v525_v46, %v2074_v25 }
 0x169   : > { %v941_v1 = vand.u32 2147483647, %v2007_v45  ;;  %1118 = vmatpush.bf16.msra.mxu3 %v1067_v23  ;;  %1594 = vmatmul.msk.bf16.vlgmr.msra.gmra.mxu0 %vm1053_vm13, %v2086_v63  ;;  %v935_v27 = vmul.f32 %v2043_v14, %v934_v56  ;;  %vm938_vm4 = vweird.f32 %v2043_v14  ;;  %v943_v4 = vand.u32 2147483648, %v2007_v45 }
 0x16a   : > { %v991_v53 = vmul.f32 %v975_v54, %v930_v49  ;;  %1595 = vmatmul.msk.bf16.vlgmr.msra.gmra.mxu1 %vm1053_vm13, %v2086_v63  ;;  %v1006_v19 = vperm.slane %v990_v58, 0  ;;  %v948_v55 = vmul.f32 %v2053_v9, %v2014_v38  ;;  %vm937_vm5 = vweird.f32 %v2007_v45 }
 0x16b   : > { %1596 = vmatmul.msk.bf16.vlgmr.msra.gmra.mxu2 %vm1053_vm13, %v2086_v63  ;;  %v936_v10 = vadd.f32 %v2043_v14, %v935_v27  ;;  %vm939_vm6 = vmor %vm937_vm5, %vm938_vm4  ;;  %vm942_vm7 = vcmp.eq.f32.partialorder %v941_v1, 8.507059e+37  ;;  %v944_v40 = vor.u32 1.1754944e-38, %v943_v4  ;;  %vm953_vm8 = vweird.f32 %v2053_v9 }
 0x16c   : > { %v1007_v5 = vperm.slane %v991_v53, 0  ;;  %1597 = vmatmul.msk.bf16.vlgmr.msra.gmra.mxu3 %vm1053_vm13, %v2086_v63  ;;  %v1014_v11 = vmul.f32 %v1006_v19, %v998_v52  ;;  %v949_v41 = vsub.f32 1.0, %v948_v55  ;;  %v958_v12 = vand.u32 2147483648, %v2014_v38 }
 0x16d   : > { %v940_v43 = vsel %vm939_vm6, %v2043_v14, %v936_v10  ;;  %v956_v17 = vand.u32 2147483647, %v2014_v38  ;;  %vm952_vm9 = vweird.f32 %v2014_v38  ;;  %v1000_v3 = vsub.f32 %v526_v15, %v2074_v25 }
 0x16e   : > { %v1015_v42 = vmul.f32 %v1007_v5, %v999_v26  ;;  %v1022_v13 = vadd.f32 %v1014_v11, %v2074_v25  ;;  %v945_v16 = vsel %vm942_vm7, %v944_v40, %v940_v43  ;;  %v950_v45 = vmul.f32 %v2053_v9, %v949_v41  ;;  %vm954_vm10 = vmor %vm952_vm9, %vm953_vm8 }
 0x16f   : > { %v976_v29 = vrot.slane %v945_v16, 1  ;;  %v959_v8 = vor.u32 1.1754944e-38, %v958_v12  ;;  %vm957_vm11 = vcmp.eq.f32.partialorder %v956_v17, 8.507059e+37  ;;  %v1001_v60 = vsub.f32 %v527_v57, %v2074_v25 }
 0x170   : > { %v1023_v24 = vadd.f32 %v1015_v42, %v2074_v25  ;;  %v1256_v30 = vpack.c.bf16 %v1022_v13, %v1022_v13  ;;  %v951_v31 = vadd.f32 %v2053_v9, %v950_v45 }
 0x171   : > { %v992_v2 = vmul.f32 %v976_v29, %v945_v16 }
 0x172   : > { %v1257_v14 = vpack.c.bf16 %v1023_v24, %v1023_v24  ;;  %v1261_v34 = vsel %vm575_vm0, %v1256_v30, 0  ;;  %v955_v51 = vsel %vm954_vm10, %v2053_v9, %v951_v31 }
 0x173   : > { %1279 = vmatpush.bf16.msrb.mxu0 %v1261_v34  ;;  %v1008_v36 = vperm.slane %v992_v2, 0  ;;  %v960_v28 = vsel %vm957_vm11, %v959_v8, %v955_v51 }
 0x174   : > { %v1264_v59 = vsel %vm575_vm0, %v1257_v14, 0  ;;  %v977_v38 = vrot.slane %v960_v28, 1 }
 0x175   : > { %1293 = vmatpush.bf16.msrb.mxu1 %v1264_v59  ;;  %v1016_v37 = vmul.f32 %v1008_v36, %v1000_v3 }
 0x176   : > { %v993_v20 = vmul.f32 %v977_v38, %v960_v28 }
 0x177   : > { %v1024_v0 = vadd.f32 %v1016_v37, %v2074_v25 }
 0x178   : > { %v1009_v6 = vperm.slane %v993_v20, 0 }
 0x179   : > { %v1258_v61 = vpack.c.bf16 %v1024_v0, %v1024_v0  ;;  %1598 = vmatmul.msk.bf16.vlgmr.msrb.gmra.mxu0 %vm1053_vm13, %v2086_v63 }
 0x17a   : > { %v1017_v9 = vmul.f32 %v1009_v6, %v1001_v60  ;;  %1599 = vmatmul.msk.bf16.vlgmr.msrb.gmra.mxu1 %vm1053_vm13, %v2086_v63 }
 0x17b   : > { %v1267_v62 = vsel %vm575_vm0, %v1258_v61, 0 }
 0x17c   : > { %1307 = vmatpush.bf16.msrb.mxu2 %v1267_v62  ;;  %v1025_v21 = vadd.f32 %v1017_v9, %v2074_v25 }
 0x17e   : > { %v1259_v7 = vpack.c.bf16 %v1025_v21, %v1025_v21 }
 0x17f   : > { %1600 = vmatmul.msk.bf16.vlgmr.msrb.gmra.mxu2 %vm1053_vm13, %v2086_v63 }
 0x180   : > { %v1270_v22 = vsel %vm575_vm0, %v1259_v7, 0 }
 0x181   : > { %1321 = vmatpush.bf16.msrb.mxu3 %v1270_v22 }
 0x184   : > { %1601 = vmatmul.msk.bf16.vlgmr.msrb.gmra.mxu3 %vm1053_vm13, %v2086_v63 }
 0x1e6   : > { %v2144_v32 = vpop.f32.mrf.mxu0 }
 0x1e7   : > { %v2146_v33 = vpop.f32.mrf.mxu1  ;;  %v1142_v35 = vmul.f32 %v2144_v32, %v2144_v32 }
 0x1e8   : > { %v1143_v25 = vmul.f32 %v2146_v33, %v2146_v33  ;;  %v1125_v50 = vadd.f32 %v2146_v33, %v2144_v32 }
 0x1ea   : > { %v1150_v39 = vadd.f32 %v1143_v25, %v1142_v35 }
 0x1ee   : > { %v2154_v46 = vpop.f32.mrf.mxu2  ;;  %v2163_v49 = vpop.f32.mrf.mxu0 }
 0x1ef   : > { %v1126_v44 = vadd.f32 %v1125_v50, %v2154_v46  ;;  %v1144_v63 = vmul.f32 %v2154_v46, %v2154_v46  ;;  %v2159_v18 = vpop.f32.mrf.mxu3  ;;  %v2166_v54 = vpop.f32.mrf.mxu1  ;;  %v1146_v58 = vmul.f32 %v2163_v49, %v2163_v49 }
 0x1f0   : > { %v1145_v48 = vmul.f32 %v2159_v18, %v2159_v18  ;;  %v1147_v53 = vmul.f32 %v2166_v54, %v2166_v54 }
 0x1f1   : > { %v1151_v47 = vadd.f32 %v1150_v39, %v1144_v63  ;;  %v1127_v52 = vadd.f32 %v1126_v44, %v2159_v18 }
 0x1f3   : > { %v1152_v56 = vadd.f32 %v1151_v47, %v1145_v48  ;;  %v1128_v23 = vadd.f32 %v1127_v52, %v2163_v49 }
 0x1f5   : > { %v1153_v26 = vadd.f32 %v1152_v56, %v1146_v58  ;;  %v1129_v1 = vadd.f32 %v1128_v23, %v2166_v54 }
 0x1f6   : > { %v2174_v27 = vpop.f32.mrf.mxu2  ;;  %v2184_v42 = vpop.f32.mrf.mxu0 }
 0x1f7   : > { %v1148_v4 = vmul.f32 %v2174_v27, %v2174_v27  ;;  %v2178_v19 = vpop.f32.mrf.mxu3  ;;  %v1130_v55 = vadd.f32 %v1129_v1, %v2174_v27  ;;  %v1154_v5 = vadd.f32 %v1153_v26, %v1147_v53  ;;  %v2186_v43 = vpop.f32.mrf.mxu1  ;;  %v1345_v12 = vmul.f32 %v2184_v42, %v2184_v42 }
 0x1f8   : > { %v1149_v11 = vmul.f32 %v2178_v19, %v2178_v19  ;;  %v1346_v13 = vmul.f32 %v2186_v43, %v2186_v43  ;;  %v1328_v15 = vadd.f32 %v2186_v43, %v2184_v42 }
 0x1f9   : > { %v1131_v10 = vadd.f32 %v1130_v55, %v2178_v19  ;;  %v1155_v40 = vadd.f32 %v1154_v5, %v1148_v4 }
 0x1fa   : > { %v1353_v16 = vadd.f32 %v1346_v13, %v1345_v12 }
 0x1fb   : > { %1132 = vadd.xlane.f32.xlu2 %v1131_v10  ;;  %v1156_v41 = vadd.f32 %v1155_v40, %v1149_v11 }
 0x1fd   : > { %1157 = vadd.xlane.f32.xlu1 %v1156_v41 }
 0x1fe   : > { %v2199_v29 = vpop.f32.mrf.mxu0 }
 0x1ff   : > { %v2203_v14 = vpop.f32.mrf.mxu1  ;;  %v1349_v8 = vmul.f32 %v2199_v29, %v2199_v29 }
 0x200   : > { %v1350_v59 = vmul.f32 %v2203_v14, %v2203_v14 }
 0x202   : > { %v2194_v45 = vpop.f32.mrf.mxu2 }
 0x203   : > { %v1347_v17 = vmul.f32 %v2194_v45, %v2194_v45  ;;  %v1329_v24 = vadd.f32 %v1328_v15, %v2194_v45 }
 0x205   : > { %v1354_v30 = vadd.f32 %v1353_v16, %v1347_v17 }
 0x207   : > { %v2201_v31 = vpop.f32.mrf.mxu3 }
 0x208   : > { %v1330_v2 = vadd.f32 %v1329_v24, %v2201_v31  ;;  %v1348_v3 = vmul.f32 %v2201_v31, %v2201_v31 }
 0x20a   : > { %v1355_v34 = vadd.f32 %v1354_v30, %v1348_v3  ;;  %v1331_v51 = vadd.f32 %v1330_v2, %v2199_v29  ;;  %v2213_v36 = vpop.f32.mrf.mxu2 }
 0x20b   : > { %v1351_v38 = vmul.f32 %v2213_v36, %v2213_v36 }
 0x20c   : > { %v1356_v57 = vadd.f32 %v1355_v34, %v1349_v8  ;;  %v1332_v28 = vadd.f32 %v1331_v51, %v2203_v14 }
 0x20e   : > { %v1357_v37 = vadd.f32 %v1356_v57, %v1350_v59  ;;  %v1333_v20 = vadd.f32 %v1332_v28, %v2213_v36  ;;  %v2240_v59 = vld [vmem:[%s2399_s10] sm:$0xff]  ;;  %v2245_v57 = vld [vmem:[%s2399_s10 + $0x8] sm:$0xff] }
 0x20f   : > { %v2219_v60 = vpop.f32.mrf.mxu3 }
 0x210   : > { %v1352_v0 = vmul.f32 %v2219_v60, %v2219_v60  ;;  %v1334_v6 = vadd.f32 %v1333_v20, %v2219_v60  ;;  %v1358_v61 = vadd.f32 %v1357_v37, %v1351_v38 }
 0x212   : > { %1335 = vadd.xlane.f32.xlu2 %v1334_v6  ;;  %v1359_v9 = vadd.f32 %v1358_v61, %v1352_v0  ;;  %v2259_v0 = vld [vmem:[%s2399_s10 + $0x18] sm:$0xff]  ;;  %v2272_v61 = vld [vmem:[%s2399_s10 + $0x28] sm:$0xff] }
 0x214   : > { %1360 = vadd.xlane.f32.xlu1 %v1359_v9  ;;  %v2277_v9 = vld [vmem:[%s2399_s10 + $0x30] sm:$0xff] }
 0x26e   : > { %v1133_v62 = vpop.xlane.xlu2 %1132 }
 0x26f   : > { %v1134_v21 = vrot.slane %v1133_v62, 4 }
 0x270   : > { %v1158_v7 = vpop.xlane.xlu1 %1157 }
 0x271   : > { %v1135_v22 = vadd.f32 %v1134_v21, %v1133_v62  ;;  %v1159_v35 = vrot.slane %v1158_v7, 4 }
 0x273   : > { %v1136_v25 = vrot.slane %v1135_v22, 2  ;;  %v1160_v50 = vadd.f32 %v1159_v35, %v1158_v7  ;;  %v2289_v7 = vld [vmem:[%s2400_s11] sm:$0xff]  ;;  %v2299_v35 = vld [vmem:[%s2400_s11 + $0x10] sm:$0xff] }
 0x275   : > { %v1161_v39 = vrot.slane %v1160_v50, 2  ;;  %v1137_v44 = vadd.f32 %v1136_v25, %v1135_v22  ;;  %v2294_v22 = vld [vmem:[%s2400_s11 + $0x8] sm:$0xff] }
 0x277   : > { %v1138_v63 = vrot.slane %v1137_v44, 1  ;;  %v1162_v48 = vadd.f32 %v1161_v39, %v1160_v50 }
 0x279   : > { %v1139_v47 = vadd.f32 %v1138_v63, %v1137_v44  ;;  %v1163_v52 = vrot.slane %v1162_v48, 1  ;;  %v2304_v63 = vld [vmem:[%s2400_s11 + $0x20] sm:$0xff] }
 0x27b   : > { %1610 = vpush %v1139_v47  ;;  %v1164_v56 = vadd.f32 %v1163_v52, %v1162_v48  ;;  %v2309_v48 = vld [vmem:[%s2400_s11 + $0x28] sm:$0xff]  ;;  %v2314_v47 = vld [vmem:[%s2400_s11 + $0x30] sm:$0xff] }
 0x27d   : > { %1612 = vpush %v1164_v56 }
 0x285   : > { %v1336_v23 = vpop.xlane.xlu2 %1335 }
 0x286   : > { %v1337_v26 = vrot.slane %v1336_v23, 4 }
 0x287   : > { %v1361_v58 = vpop.xlane.xlu1 %1360 }
 0x288   : > { %v1362_v1 = vrot.slane %v1361_v58, 4  ;;  %v1338_v4 = vadd.f32 %v1337_v26, %v1336_v23  ;;  %v2325_v26 = vld [vmem:[%s2400_s11 + $0x18] sm:$0xff] }
 0x28a   : > { %v1363_v55 = vadd.f32 %v1362_v1, %v1361_v58  ;;  %v1339_v5 = vrot.slane %v1338_v4, 2  ;;  %v2330_v1 = vld [vmem:[%s2400_s11 + $0x38] sm:$0xff] }
 0x28c   : > { %v1364_v11 = vrot.slane %v1363_v55, 2  ;;  %v1340_v41 = vadd.f32 %v1339_v5, %v1338_v4 }
 0x28e   : > { %v1365_v13 = vadd.f32 %v1364_v11, %v1363_v55  ;;  %v1341_v17 = vrot.slane %v1340_v41, 1 }
 0x290   : > { %v1366_v24 = vrot.slane %v1365_v13, 1  ;;  %v1342_v3 = vadd.f32 %v1341_v17, %v1340_v41 }
 0x292   : > { %v1367_v8 = vadd.f32 %v1366_v24, %v1365_v13 }
 0x2ac   : > { %s1611_s19 = spop %1610 }
 0x2ad   : > { %s2230_s20 = smul.f32 0.0009765625, %s1611_s19 }
 0x2ae   : > { %s1613_s21 = spop %1612 }
 0x2af   : > { %s1167_s22 = smul.f32 %s2230_s20, %s2230_s20  ;;  %v1170_v34 = vstv %s2230_s20 }
 0x2b0   : > { %s1166_s24 = smul.f32 0.0009765625, %s1613_s21  ;;  %v1171_v51 = vsub.f32 %v2144_v32, %v1170_v34  ;;  %v1172_v28 = vsub.f32 %v2146_v33, %v1170_v34  ;;  %v1173_v38 = vsub.f32 %v2154_v46, %v1170_v34  ;;  %v1174_v37 = vsub.f32 %v2159_v18, %v1170_v34  ;;  %v2254_v32 = vld [vmem:[%s2399_s10 + $0x10] sm:$0xff]  ;;  %v2264_v33 = vld [vmem:[%s2399_s10 + $0x20] sm:$0xff] }
 0x2b1   : > { %v1175_v20 = vsub.f32 %v2163_v49, %v1170_v34  ;;  %v1176_v46 = vsub.f32 %v2166_v54, %v1170_v34  ;;  %v1177_v18 = vsub.f32 %v2174_v27, %v1170_v34  ;;  %v1178_v49 = vsub.f32 %v2178_v19, %v1170_v34  ;;  %v2282_v54 = vld [vmem:[%s2399_s10 + $0x38] sm:$0xff] }
 0x2b2   : > { %s1168_s25 = ssub.f32 %s1166_s24, %s1167_s22 }
 0x2b4   : > { %s1169_s28 = smax.f32 %s1686_s26, %s1168_s25 }
 0x2b5   : > { %s1179_s29 = sadd.f32 1e-05, %s1169_s28 }
 0x2b7   : > { %v1180_v53 = vstv %s1179_s29 }
 0x2b8   : > { %1672 = vrsqrt.f32 %v1180_v53  ;;  %vm1187_vm12 = vweird.f32 %v1180_v53 }
 0x2be   : > { %v1673_v10 = vpop.eup %1672 }
 0x2bf   : > { %v1182_v40 = vmul.f32 %v1673_v10, %v1180_v53  ;;  %vm1188_vm0 = vweird.f32 %v1673_v10 }
 0x2c0   : > { %vm1189_vm13 = vmor %vm1187_vm12, %vm1188_vm0 }
 0x2c1   : > { %v1183_v12 = vmul.f32 %v1673_v10, %v1182_v40 }
 0x2c3   : > { %v1184_v15 = vmul.f32 0.5, %v1183_v12 }
 0x2c5   : > { %v1185_v16 = vsub.f32 1.5, %v1184_v15 }
 0x2c7   : > { %v1186_v30 = vmul.f32 %v1673_v10, %v1185_v16 }
 0x2c9   : > { %v1190_v2 = vsel %vm1189_vm13, %v1673_v10, %v1186_v30 }
 0x2ca   : > { %1614 = vpush %v1190_v2 }
 0x2cb   : > { %1616 = vpush %v1342_v3 }
 0x2cc   : > { %1618 = vpush %v1367_v8 }
 0x2fb   : > { %s1615_s16 = spop %1614 }
 0x2fc   : > { %v1192_v6 = vstv %s1615_s16  ;;  %s1617_s25 = spop %1616 }
 0x2fd   : > { %v1193_v27 = vmul.f32 %v1192_v6, %v1171_v51  ;;  %v1194_v62 = vmul.f32 %v1192_v6, %v1172_v28  ;;  %v1195_v19 = vmul.f32 %v1192_v6, %v1173_v38  ;;  %v1196_v21 = vmul.f32 %v1192_v6, %v1174_v37  ;;  %s2284_s16 = smul.f32 0.0009765625, %s1617_s25  ;;  %s1619_s17 = spop %1618 }
 0x2fe   : > { %v1197_v25 = vmul.f32 %v1192_v6, %v1175_v20  ;;  %v1198_v50 = vmul.f32 %v1192_v6, %v1176_v46  ;;  %v1199_v39 = vmul.f32 %v1192_v6, %v1177_v18  ;;  %v1200_v44 = vmul.f32 %v1192_v6, %v1178_v49  ;;  %s1369_s25 = smul.f32 0.0009765625, %s1619_s17 }
 0x2ff   : > { %v1201_v52 = vmul.f32 %v1193_v27, %v2240_v59  ;;  %v1202_v56 = vmul.f32 %v1194_v62, %v2245_v57  ;;  %v1203_v23 = vmul.f32 %v1195_v19, %v2254_v32  ;;  %v1204_v58 = vmul.f32 %v1196_v21, %v2259_v0  ;;  %s1370_s17 = smul.f32 %s2284_s16, %s2284_s16 }
 0x300   : > { %v1205_v53 = vmul.f32 %v1197_v25, %v2264_v33  ;;  %v1206_v4 = vmul.f32 %v1198_v50, %v2272_v61  ;;  %v1207_v55 = vmul.f32 %v1199_v39, %v2277_v9  ;;  %v1208_v5 = vmul.f32 %v1200_v44, %v2282_v54  ;;  %v1634_v44 = vld [vmem:[%s2228_s18] ss:$0 sm:$0xff] }
 0x301   : > { %v1209_v10 = vadd.f32 %v1201_v52, %v2289_v7  ;;  %v1210_v11 = vadd.f32 %v1202_v56, %v2294_v22  ;;  %v1211_v40 = vadd.f32 %v1203_v23, %v2299_v35  ;;  %s1371_s28 = ssub.f32 %s1369_s25, %s1370_s17  ;;  %v1212_v15 = vadd.f32 %v1204_v58, %v2325_v26 }
 0x302   : > { %v1213_v41 = vadd.f32 %v1205_v53, %v2304_v63  ;;  %v1214_v12 = vadd.f32 %v1206_v4, %v2309_v48  ;;  %v1215_v13 = vadd.f32 %v1207_v55, %v2314_v47  ;;  %v1216_v16 = vadd.f32 %v1208_v5, %v2330_v1 }
 0x303   : > { %s1372_s29 = smax.f32 %s1686_s26, %s1371_s28  ;;  %vm1217_vm14 = vcmp.ge.f32.partialorder %v1209_v10, 0.0  ;;  %vm1218_vm15 = vcmp.ge.f32.partialorder %v1210_v11, 0.0  ;;  %vm1219_vm1 = vcmp.ge.f32.partialorder %v1211_v40, 0.0  ;;  %v1225_v17 = vmul.f32 0.02, %v1209_v10 }
 0x304   : > { %vm1221_vm2 = vcmp.ge.f32.partialorder %v1213_v41, 0.0  ;;  %s1382_s30 = sadd.f32 1e-05, %s1372_s29  ;;  %vm1222_vm3 = vcmp.ge.f32.partialorder %v1214_v12, 0.0  ;;  %vm1223_vm4 = vcmp.ge.f32.partialorder %v1215_v13, 0.0  ;;  %vm1220_vm5 = vcmp.ge.f32.partialorder %v1212_v15, 0.0 }
 0x305   : > { %v1226_v24 = vmul.f32 0.02, %v1210_v11  ;;  %v1227_v30 = vmul.f32 0.02, %v1211_v40  ;;  %v1229_v2 = vmul.f32 0.02, %v1213_v41  ;;  %v1233_v34 = vsel %vm1217_vm14, %v1209_v10, %v1225_v17 }
 0x306   : > { %v1230_v3 = vmul.f32 0.02, %v1214_v12  ;;  %v1231_v8 = vmul.f32 0.02, %v1215_v13  ;;  %v1383_v28 = vstv %s1382_s30  ;;  %v1228_v38 = vmul.f32 0.02, %v1212_v15 }
 0x307   : > { %v1234_v51 = vsel %vm1218_vm15, %v1210_v11, %v1226_v24  ;;  %v1232_v37 = vmul.f32 0.02, %v1216_v16  ;;  %v1237_v20 = vsel %vm1221_vm2, %v1213_v41, %v1229_v2  ;;  %vm1224_vm6 = vcmp.ge.f32.partialorder %v1216_v16, 0.0 }
 0x308   : > { %v1238_v46 = vsel %vm1222_vm3, %v1214_v12, %v1230_v3  ;;  %v1241_v18 = vadd.f32 %v1234_v51, %v1233_v34  ;;  %v1235_v6 = vsel %vm1219_vm1, %v1211_v40, %v1227_v30  ;;  %v1239_v27 = vsel %vm1223_vm4, %v1215_v13, %v1231_v8 }
 0x309   : > { %v1242_v49 = vadd.f32 %v1238_v46, %v1237_v20  ;;  %1674 = vrsqrt.f32 %v1383_v28  ;;  %v1236_v21 = vsel %vm1220_vm5, %v1212_v15, %v1228_v38  ;;  %v1240_v25 = vsel %vm1224_vm6, %v1216_v16, %v1232_v37 }
 0x30a   : > { %v1243_v62 = vadd.f32 %v1241_v18, %v1235_v6  ;;  %vm1390_vm8 = vweird.f32 %v1383_v28  ;;  %v1373_v41 = vstv %s2284_s16 }
 0x30b   : > { %v1244_v19 = vadd.f32 %v1242_v49, %v1239_v27  ;;  %v1374_v12 = vsub.f32 %v2184_v42, %v1373_v41  ;;  %v1375_v13 = vsub.f32 %v2186_v43, %v1373_v41  ;;  %v1376_v15 = vsub.f32 %v2194_v45, %v1373_v41 }
 0x30c   : > { %v1245_v50 = vadd.f32 %v1243_v62, %v1236_v21  ;;  %v1377_v16 = vsub.f32 %v2201_v31, %v1373_v41  ;;  %v1378_v17 = vsub.f32 %v2199_v29, %v1373_v41  ;;  %v1379_v24 = vsub.f32 %v2203_v14, %v1373_v41 }
 0x30d   : > { %v1246_v39 = vadd.f32 %v1244_v19, %v1240_v25  ;;  %v1380_v30 = vsub.f32 %v2213_v36, %v1373_v41  ;;  %v1381_v2 = vsub.f32 %v2219_v60, %v1373_v41 }
 0x30e   : > { %v1247_v52 = vmul.f32 0.25, %v1245_v50 }
 0x30f   : > { %v1248_v56 = vmul.f32 0.25, %v1246_v39  ;;  %v1675_v23 = vpop.eup %1674 }
 0x310   : > { %v1252_v58 = vmul.f32 %v1634_v44, %v1247_v52  ;;  %v1385_v4 = vmul.f32 %v1675_v23, %v1383_v28  ;;  %vm1391_vm7 = vweird.f32 %v1675_v23 }
 0x311   : > { %v1253_v53 = vmul.f32 %v1634_v44, %v1248_v56  ;;  %vm1392_vm9 = vmor %vm1390_vm8, %vm1391_vm7 }
 0x312   : > { %1254 = vst [vmem:[%s2353_s13] sm:$0xff] %v1252_v58  ;;  %v1386_v55 = vmul.f32 %v1675_v23, %v1385_v4  ;;  %v1635_v58 = vld [vmem:[%s2228_s18 + $0x1] ss:$0 sm:$0xff] }
 0x313   : > { %1255 = vst [vmem:[%s2353_s13 + $0x8] sm:$0xff] %v1253_v53 }
 0x314   : > { %v1387_v5 = vmul.f32 0.5, %v1386_v55 }
 0x316   : > { %v1388_v10 = vsub.f32 1.5, %v1387_v5 }
 0x318   : > { %v1389_v11 = vmul.f32 %v1675_v23, %v1388_v10 }
 0x31a   : > { %v1393_v40 = vsel %vm1392_vm9, %v1675_v23, %v1389_v11 }
 0x31b   : > { %1620 = vpush %v1393_v40 }
 0x34c   : > { %s1621_s5 = spop %1620 }
 0x34d   : > { %v1395_v3 = vstv %s1621_s5 }
 0x34e   : > { %v1396_v8 = vmul.f32 %v1395_v3, %v1374_v12  ;;  %v1397_v34 = vmul.f32 %v1395_v3, %v1375_v13  ;;  %v1398_v51 = vmul.f32 %v1395_v3, %v1376_v15  ;;  %v1399_v42 = vmul.f32 %v1395_v3, %v1377_v16 }
 0x34f   : > { %v1400_v28 = vmul.f32 %v1395_v3, %v1378_v17  ;;  %v1401_v43 = vmul.f32 %v1395_v3, %v1379_v24  ;;  %v1402_v38 = vmul.f32 %v1395_v3, %v1380_v30  ;;  %v1403_v45 = vmul.f32 %v1395_v3, %v1381_v2 }
 0x350   : > { %v1404_v31 = vmul.f32 %v1396_v8, %v2240_v59  ;;  %v1405_v29 = vmul.f32 %v1397_v34, %v2245_v57  ;;  %v1406_v37 = vmul.f32 %v1398_v51, %v2254_v32  ;;  %v1407_v14 = vmul.f32 %v1399_v42, %v2259_v0 }
 0x351   : > { %v1408_v36 = vmul.f32 %v1400_v28, %v2264_v33  ;;  %v1409_v60 = vmul.f32 %v1401_v43, %v2272_v61  ;;  %v1410_v20 = vmul.f32 %v1402_v38, %v2277_v9  ;;  %v1411_v46 = vmul.f32 %v1403_v45, %v2282_v54 }
 0x352   : > { %v1412_v18 = vadd.f32 %v1404_v31, %v2289_v7  ;;  %v1413_v49 = vadd.f32 %v1405_v29, %v2294_v22  ;;  %v1414_v59 = vadd.f32 %v1406_v37, %v2299_v35  ;;  %v1415_v0 = vadd.f32 %v1407_v14, %v2325_v26 }
 0x353   : > { %v1416_v57 = vadd.f32 %v1408_v36, %v2304_v63  ;;  %v1417_v32 = vadd.f32 %v1409_v60, %v2309_v48  ;;  %v1418_v33 = vadd.f32 %v1410_v20, %v2314_v47  ;;  %v1419_v61 = vadd.f32 %v1411_v46, %v2330_v1 }
 0x354   : > { %vm1420_vm10 = vcmp.ge.f32.partialorder %v1412_v18, 0.0  ;;  %vm1421_vm11 = vcmp.ge.f32.partialorder %v1413_v49, 0.0  ;;  %vm1422_vm0 = vcmp.ge.f32.partialorder %v1414_v59, 0.0  ;;  %v1428_v9 = vmul.f32 0.02, %v1412_v18 }
 0x355   : > { %vm1424_vm12 = vcmp.ge.f32.partialorder %v1416_v57, 0.0  ;;  %vm1425_vm13 = vcmp.ge.f32.partialorder %v1417_v32, 0.0  ;;  %v1429_v54 = vmul.f32 0.02, %v1413_v49  ;;  %v1430_v7 = vmul.f32 0.02, %v1414_v59 }
 0x356   : > { %v1432_v22 = vmul.f32 0.02, %v1416_v57  ;;  %v1433_v35 = vmul.f32 0.02, %v1417_v32  ;;  %vm1426_vm14 = vcmp.ge.f32.partialorder %v1418_v33, 0.0  ;;  %v1436_v6 = vsel %vm1420_vm10, %v1412_v18, %v1428_v9 }
 0x357   : > { %v1434_v63 = vmul.f32 0.02, %v1418_v33  ;;  %v1437_v48 = vsel %vm1421_vm11, %v1413_v49, %v1429_v54  ;;  %v1431_v27 = vmul.f32 0.02, %v1415_v0  ;;  %v1435_v26 = vmul.f32 0.02, %v1419_v61 }
 0x358   : > { %v1440_v47 = vsel %vm1424_vm12, %v1416_v57, %v1432_v22  ;;  %v1441_v62 = vsel %vm1425_vm13, %v1417_v32, %v1433_v35  ;;  %vm1423_vm15 = vcmp.ge.f32.partialorder %v1415_v0, 0.0  ;;  %vm1427_vm1 = vcmp.ge.f32.partialorder %v1419_v61, 0.0 }
 0x359   : > { %v1444_v1 = vadd.f32 %v1437_v48, %v1436_v6  ;;  %v1445_v19 = vadd.f32 %v1441_v62, %v1440_v47  ;;  %v1438_v21 = vsel %vm1422_vm0, %v1414_v59, %v1430_v7  ;;  %v1442_v25 = vsel %vm1426_vm14, %v1418_v33, %v1434_v63 }
 0x35a   : > { %v1439_v44 = vsel %vm1423_vm15, %v1415_v0, %v1431_v27  ;;  %v1443_v52 = vsel %vm1427_vm1, %v1419_v61, %v1435_v26 }
 0x35b   : > { %v1446_v50 = vadd.f32 %v1444_v1, %v1438_v21  ;;  %v1447_v39 = vadd.f32 %v1445_v19, %v1442_v25 }
 0x35d   : > { %v1448_v56 = vadd.f32 %v1446_v50, %v1439_v44  ;;  %v1449_v23 = vadd.f32 %v1447_v39, %v1443_v52 }
 0x35f   : > { %v1450_v53 = vmul.f32 0.25, %v1448_v56  ;;  %v1451_v4 = vmul.f32 0.25, %v1449_v23 }
 0x361   : > { %v1455_v55 = vmul.f32 %v1635_v58, %v1450_v53  ;;  %v1456_v5 = vmul.f32 %v1635_v58, %v1451_v4 }
 0x363   : > { %1602 = vst [vmem:[%s2353_s13 + $0x10] sm:$0xff] %v1455_v55 }
 0x364   : > { %1603 = vst [vmem:[%s2353_s13 + $0x18] sm:$0xff] %v1456_v5 }
 0x365 PF: > { %s23_s23 = sadd.s32 1, %s1682_s23  }
 0x366   : > { %p20_p4 = scmp.ge.s32.totalorder %s23_s23, 4  }
 0x368   :  { %22 = sbr.rel (!%p20_p4) target bundleno = 2 (0x2), region = 116 }

// kernel: encoder_forward.3
= control target key start
LH: loop header
LB: loop body
LE: loop exit
PB: predicated region body
PF: predicated region fallthrough
CT: control target
= control target key end

     0   :  { %s1634_s23 = smov 0   ;;  %s2163_s0 = inlined_call_operand.vmem [shape: f32[4,1,512], index: 0, kind: input, shape index: {}]   ;;  %s2164_s1 = inlined_call_operand.vmem [shape: f32[4,4,512], index: 1, kind: input, shape index: {}]   ;;  %s2165_s2 = inlined_call_operand.vmem [shape: f32[4,5,128], index: 2, kind: input, shape index: {}]   ;;  %s2166_s3 = inlined_call_operand.vmem [shape: f32[4,5,512], index: 3, kind: input, shape index: {}]   ;;  %s2167_s4 = inlined_call_operand.vmem [shape: f32[4,1,128], index: 4, kind: input, shape index: {}]   ;;  %s2168_s5 = inlined_call_operand.<no memory space> [shape: f32[1,1], index: 5, kind: input, shape index: {}]   ;;  %s2169_s6 = inlined_call_operand.vmem [shape: f32[4,1], index: 6, kind: input, shape index: {}]   ;;  %s2170_s7 = inlined_call_operand.vmem [shape: f32[2,512], index: 7, kind: input, shape index: {}]   ;;  %s2171_s8 = inlined_call_operand.vmem [shape: f32[2,512], index: 8, kind: input, shape index: {}]   ;;  %s2172_s9 = inlined_call_operand.vmem [shape: bf16[8,5], index: 9, kind: input, shape index: {}]   ;;  %s2173_s10 = inlined_call_operand.vmem [shape: f32[8,512], index: 10, kind: input, shape index: {}]   ;;  %s2174_s11 = inlined_call_operand.vmem [shape: f32[8,512], index: 11, kind: input, shape index: {}]   ;;  %s2175_s12 = inlined_call_operand.vmem [shape: f32[4,8,128], index: 12, kind: output, shape index: {}]  }
   0x1   :  { %17 = sst [smem:[#allocation2]] %s2168_s5 }
   0x2 LB: > { %s1448_s24 = sadd.s32 4294967295, %s1560_s23   ;;  %p1452_p0 = scmp.ge.s32.totalorder %s1560_s23, 1  ;;  %s1560_s23 = sphi %s1634_s23, %s23_s23  }
   0x3   : > { %p409_p1 = scmp.lt.s32.totalorder %s1560_s23, 3 }
   0x5   : > { %p410_p2 = pnand %p1452_p0, %p409_p1 }
   0x6   : > { %s1453_s5 = sshll.u32 (!%p410_p2), %s1448_s24, 1  ;;  %s528_s28 = sld [smem:[#allocation2]] (!%p410_p2) }
   0x7   : > { %413 = sbr.rel (%p410_p2) target bundleno = 857 (0x359), region = 68  ;;  %p473_p3 = scmp.lt.s32.totalorder (!%p410_p2), %s1453_s5, 3 }
   0x8   : > { %s1565_s26 = smov (!%p410_p2), 0.0  }
   0xc   : > { %v532_v0 = vld [vmem:[%s2169_s6] sm:$0xf]  ;;  %v1562_v1 = vmov 0   ;;  %s2189_s5 = smov (!%p473_p3, %s1453_s5), 3  ;;  %v1563_v2 = vmov 839922192   ;;  %v529_v15 = vstv %s528_s28 }
   0xd   : > { %1511 = vset.pattern.permute.xlu0 %v1562_v1  ;;  %v538_v3 = vunpack.c.l.s4 %v1563_v2  ;;  %s1485_s27 = sshll.u32 %s2189_s5, 4  ;;  %s1454_s14 = sshll.u32 %s2189_s5, 2  ;;  %vm573_vm0 = vcmask 1043456   ;;  %v750_v24 = vld [vmem:[%s2170_s7] sm:$0xff]  ;;  %vm648_vm1 = vcmask 1040384   ;;  %vm657_vm2 = vcmask 1041408  }
   0xe   : > { %535 = vperm.xlu0 %1511, %v532_v0   ;;  %s483_s13 = scalar_lea.vmem %s2164_s1, %s1485_s27  ;;  %s476_s17 = scalar_lea.vmem %s2163_s0, %s1454_s14  ;;  %v779_v61 = vld [vmem:[%s2171_s8] sm:$0xff]  ;;  %vm1041_vm9 = vcmask 1042432  }
   0xf   : > { %v539_v4 = vunpack.c.0.s8 %v538_v3  ;;  %v512_v6 = vld [vmem:[%s483_s13] sm:$0xff]  ;;  %v513_v7 = vld [vmem:[%s483_s13 + $0x8] sm:$0xff]  ;;  %v514_v8 = vld [vmem:[%s483_s13 + $0x10] sm:$0xff]  ;;  %s1459_s22 = sshll.u32 %s2189_s5, 3  ;;  %s1486_s24 = sshll.u32 %s2189_s5, 5 }
  0x10   : > { %v515_v9 = vld [vmem:[%s483_s13 + $0x18] sm:$0xff]  ;;  %v510_v14 = vld [vmem:[%s476_s17] sm:$0xf]  ;;  %v511_v17 = vld [vmem:[%s476_s17 + $0x4] sm:$0xf]  ;;  %s1804_s27 = scalar_lea.vmem %s2165_s2, %s1459_s22  ;;  %s1809_s30 = scalar_lea.vmem %s2166_s3, %s1486_s24 }
  0x11   : > { %v1655_v18 = vmul.f32 %v529_v15, %v510_v14  ;;  %v1657_v19 = vmul.f32 %v529_v15, %v511_v17  ;;  %s2071_s17 = scalar_lea.vmem %s2167_s4, %s2189_s5 }
  0x13   : > { %v632_v20 = vperm.slane %v1655_v18, 0  ;;  %v633_v21 = vperm.slane %v1655_v18, 1  ;;  %v634_v22 = vperm.slane %v1655_v18, 2  ;;  %v635_v23 = vperm.slane %v1655_v18, 3 }
  0x14   : > { %v636_v25 = vperm.slane %v1657_v19, 0  ;;  %v637_v26 = vperm.slane %v1657_v19, 1  ;;  %v638_v27 = vperm.slane %v1657_v19, 2  ;;  %v639_v28 = vperm.slane %v1657_v19, 3 }
  0x80   : > { %v536_v5 = vpop.permute.xlu0 %535 }
  0x81   : > { %v540_v10 = vperm.slane %v536_v5, %v539_v4 }
  0x83   : > { %v542_v11 = vmul.f32 %v540_v10, %v512_v6  ;;  %v543_v12 = vmul.f32 %v540_v10, %v513_v7  ;;  %v544_v13 = vmul.f32 %v540_v10, %v514_v8  ;;  %v545_v16 = vmul.f32 %v540_v10, %v515_v9 }
  0x85   : > { %550 = vst [vmem:[#allocation1] ss:$2 sm:$0xff] %v542_v11 }
  0x86   : > { %552 = vst [vmem:[#allocation1 + $0x10] ss:$2 sm:$0xff] %v543_v12 }
  0x87   : > { %558 = vst [vmem:[#allocation1 + $0x20] ss:$2 sm:$0xff] %v544_v13 }
  0x88   : > { %560 = vst [vmem:[#allocation1 + $0x30] ss:$2 sm:$0xff] %v545_v16 }
  0x8c   : > { %v553_v29 = vld.sshfl [vmem:[#allocation1] sm:$0xff pattern:$0x75316420]  ;;  %v554_v30 = vld.sshfl [vmem:[#allocation1 + $0x8] sm:$0xff pattern:$0x75316420] }
  0x8d   : > { %v555_v31 = vld.sshfl [vmem:[#allocation1 + $0x10] sm:$0xff pattern:$0x75316420]  ;;  %v556_v32 = vld.sshfl [vmem:[#allocation1 + $0x18] sm:$0xff pattern:$0x75316420] }
  0x8e   : > { %v574_v33 = vsel %vm573_vm0, %v553_v29, 0.0  ;;  %v581_v34 = vsel %vm573_vm0, %v554_v30, 0.0  ;;  %v588_v35 = vsel %vm573_vm0, %v555_v31, 0.0  ;;  %v595_v36 = vsel %vm573_vm0, %v556_v32, 0.0  ;;  %752 = vst [vmem:[#allocation1] ss:$4 sm:$0xff] %v750_v24 }
  0x8f   : > { %v575_v37 = vrot.slane %v574_v33, 4  ;;  %v582_v38 = vrot.slane %v581_v34, 4  ;;  %v589_v39 = vrot.slane %v588_v35, 4  ;;  %v596_v40 = vrot.slane %v595_v36, 4 }
  0x90   : > { %v561_v41 = vld.sshfl [vmem:[#allocation1 + $0x20] sm:$0xff pattern:$0x75316420]  ;;  %v562_v42 = vld.sshfl [vmem:[#allocation1 + $0x28] sm:$0xff pattern:$0x75316420] }
  0x91   : > { %v576_v43 = vadd.f32 %v575_v37, %v574_v33  ;;  %v583_v44 = vadd.f32 %v582_v38, %v581_v34  ;;  %v590_v45 = vadd.f32 %v589_v39, %v588_v35  ;;  %v597_v46 = vadd.f32 %v596_v40, %v595_v36  ;;  %v563_v47 = vld.sshfl [vmem:[#allocation1 + $0x30] sm:$0xff pattern:$0x75316420]  ;;  %v564_v48 = vld.sshfl [vmem:[#allocation1 + $0x38] sm:$0xff pattern:$0x75316420] }
  0x92   : > { %v602_v49 = vsel %vm573_vm0, %v561_v41, 0.0  ;;  %v609_v50 = vsel %vm573_vm0, %v562_v42, 0.0  ;;  %v616_v51 = vsel %vm573_vm0, %v563_v47, 0.0  ;;  %v623_v52 = vsel %vm573_vm0, %v564_v48, 0.0  ;;  %758 = vst [vmem:[#allocation1 + $0x20] ss:$4 sm:$0xff] %v750_v24 }
  0x93   : > { %v577_v53 = vrot.slane %v576_v43, 2  ;;  %v584_v54 = vrot.slane %v583_v44, 2  ;;  %v591_v55 = vrot.slane %v590_v45, 2  ;;  %v598_v56 = vrot.slane %v597_v46, 2 }
  0x94   : > { %v603_v57 = vrot.slane %v602_v49, 4  ;;  %v610_v58 = vrot.slane %v609_v50, 4  ;;  %v617_v59 = vrot.slane %v616_v51, 4  ;;  %v624_v60 = vrot.slane %v623_v52, 4 }
  0x95   : > { %v578_v62 = vadd.f32 %v577_v53, %v576_v43  ;;  %v585_v63 = vadd.f32 %v584_v54, %v583_v44  ;;  %v592_v0 = vadd.f32 %v591_v55, %v590_v45  ;;  %v599_v1 = vadd.f32 %v598_v56, %v597_v46  ;;  %v1681_v2 = vld.sshfl [vmem:[#allocation1] sm:$0xff pattern:$0x73625140]  ;;  %v1683_v3 = vld.sshfl [vmem:[#allocation1 + $0x8] sm:$0xff pattern:$0x73625140] }
  0x96   : > { %v604_v4 = vadd.f32 %v603_v57, %v602_v49  ;;  %v611_v5 = vadd.f32 %v610_v58, %v609_v50  ;;  %v618_v6 = vadd.f32 %v617_v59, %v616_v51  ;;  %v625_v7 = vadd.f32 %v624_v60, %v623_v52  ;;  %v1685_v8 = vld.sshfl [vmem:[#allocation1 + $0x10] sm:$0xff pattern:$0x73625140]  ;;  %v1687_v9 = vld.sshfl [vmem:[#allocation1 + $0x18] sm:$0xff pattern:$0x73625140] }
  0x97   : > { %v579_v10 = vrot.slane %v578_v62, 1  ;;  %v586_v11 = vrot.slane %v585_v63, 1  ;;  %v593_v12 = vrot.slane %v592_v0, 1  ;;  %v600_v13 = vrot.slane %v599_v1, 1  ;;  %781 = vst [vmem:[#allocation1] ss:$4 sm:$0xff] %v779_v61 }
  0x98   : > { %v605_v14 = vrot.slane %v604_v4, 2  ;;  %v612_v15 = vrot.slane %v611_v5, 2  ;;  %v619_v16 = vrot.slane %v618_v6, 2  ;;  %v626_v17 = vrot.slane %v625_v7, 2 }
  0x99   : > { %v580_v24 = vadd.f32 %v579_v10, %v578_v62  ;;  %v587_v29 = vadd.f32 %v586_v11, %v585_v63  ;;  %v594_v30 = vadd.f32 %v593_v12, %v592_v0  ;;  %v601_v31 = vadd.f32 %v600_v13, %v599_v1  ;;  %v1689_v32 = vld.sshfl [vmem:[#allocation1 + $0x20] sm:$0xff pattern:$0x73625140]  ;;  %v1691_v33 = vld.sshfl [vmem:[#allocation1 + $0x28] sm:$0xff pattern:$0x73625140] }
  0x9a   : > { %v606_v34 = vadd.f32 %v605_v14, %v604_v4  ;;  %v613_v35 = vadd.f32 %v612_v15, %v611_v5  ;;  %v620_v36 = vadd.f32 %v619_v16, %v618_v6  ;;  %v627_v37 = vadd.f32 %v626_v17, %v625_v7  ;;  %v1693_v38 = vld.sshfl [vmem:[#allocation1 + $0x30] sm:$0xff pattern:$0x73625140]  ;;  %v1695_v39 = vld.sshfl [vmem:[#allocation1 + $0x38] sm:$0xff pattern:$0x73625140] }
  0x9b   : > { %v1700_v40 = vsel %vm648_vm1, %v632_v20, %v580_v24  ;;  %v1705_v41 = vsel %vm648_vm1, %v633_v21, %v587_v29  ;;  %v1710_v42 = vsel %vm648_vm1, %v634_v22, %v594_v30  ;;  %v1715_v43 = vsel %vm648_vm1, %v635_v23, %v601_v31  ;;  %787 = vst [vmem:[#allocation1 + $0x20] ss:$4 sm:$0xff] %v779_v61 }
  0x9c   : > { %v658_v20 = vsel %vm657_vm2, %v1700_v40, 0.0  ;;  %v659_v44 = vsel %vm657_vm2, %v1705_v41, 0.0  ;;  %v661_v21 = vsel %vm657_vm2, %v1710_v42, 0.0  ;;  %v663_v45 = vsel %vm657_vm2, %v1715_v43, 0.0 }
  0x9d   : > { %v660_v22 = vadd.f32 %v659_v44, %v658_v20  ;;  %v607_v46 = vrot.slane %v606_v34, 1  ;;  %v614_v47 = vrot.slane %v613_v35, 1  ;;  %v621_v18 = vrot.slane %v620_v36, 1 }
  0x9e   : > { %v628_v48 = vrot.slane %v627_v37, 1  ;;  %v678_v23 = vmul.f32 %v1700_v40, %v1700_v40  ;;  %v679_v49 = vmul.f32 %v1705_v41, %v1705_v41  ;;  %v680_v50 = vmul.f32 %v1710_v42, %v1710_v42 }
  0x9f   : > { %v662_v51 = vadd.f32 %v661_v21, %v660_v22  ;;  %v608_v52 = vadd.f32 %v607_v46, %v606_v34  ;;  %v615_v53 = vadd.f32 %v614_v47, %v613_v35  ;;  %v622_v54 = vadd.f32 %v621_v18, %v620_v36 }
  0xa0   : > { %v629_v55 = vadd.f32 %v628_v48, %v627_v37  ;;  %v681_v56 = vmul.f32 %v1715_v43, %v1715_v43  ;;  %v686_v57 = vsel %vm657_vm2, %v678_v23, 0.0  ;;  %v687_v58 = vsel %vm657_vm2, %v679_v49, 0.0 }
  0xa1   : > { %v664_v59 = vadd.f32 %v663_v45, %v662_v51  ;;  %v1738_v60 = vsel %vm648_vm1, %v636_v25, %v608_v52  ;;  %v1743_v61 = vsel %vm648_vm1, %v637_v26, %v615_v53  ;;  %v1748_v62 = vsel %vm648_vm1, %v638_v27, %v622_v54 }
  0xa2   : > { %v1753_v63 = vsel %vm648_vm1, %v639_v28, %v629_v55  ;;  %v682_v0 = vmul.f32 %v1738_v60, %v1738_v60  ;;  %v683_v25 = vmul.f32 %v1743_v61, %v1743_v61  ;;  %v684_v26 = vmul.f32 %v1748_v62, %v1748_v62 }
  0xa3   : > { %665 = vadd.xlane.f32.xlu0 %v664_v59  ;;  %v685_v1 = vmul.f32 %v1753_v63, %v1753_v63  ;;  %v688_v27 = vadd.f32 %v687_v58, %v686_v57  ;;  %v689_v28 = vsel %vm657_vm2, %v680_v50, 0.0  ;;  %v667_v5 = vsel %vm657_vm2, %v1738_v60, 0.0 }
  0xa4   : > { %v695_v4 = vsel %vm657_vm2, %v682_v0, 0.0  ;;  %v696_v19 = vsel %vm657_vm2, %v683_v25, 0.0  ;;  %v668_v10 = vsel %vm657_vm2, %v1743_v61, 0.0  ;;  %v698_v11 = vsel %vm657_vm2, %v684_v26, 0.0 }
  0xa5   : > { %v697_v6 = vadd.f32 %v696_v19, %v695_v4  ;;  %v690_v7 = vadd.f32 %v689_v28, %v688_v27  ;;  %v691_v12 = vsel %vm657_vm2, %v681_v56, 0.0  ;;  %v669_v15 = vadd.f32 %v668_v10, %v667_v5  ;;  %v782_v5 = vld.sshfl [vmem:[#allocation1] sm:$0xff pattern:$0x73625140] }
  0xa6   : > { %v700_v16 = vsel %vm657_vm2, %v685_v1, 0.0  ;;  %v670_v24 = vsel %vm657_vm2, %v1748_v62, 0.0  ;;  %v672_v30 = vsel %vm657_vm2, %v1753_v63, 0.0  ;;  %v784_v10 = vld.sshfl [vmem:[#allocation1 + $0x10] sm:$0xff pattern:$0x73625140] }
  0xa7   : > { %v699_v13 = vadd.f32 %v698_v11, %v697_v6  ;;  %v692_v14 = vadd.f32 %v691_v12, %v690_v7  ;;  %v671_v29 = vadd.f32 %v670_v24, %v669_v15  ;;  %v783_v7 = vld.sshfl [vmem:[#allocation1 + $0x8] sm:$0xff pattern:$0x73625140] }
  0xa9   : > { %v701_v17 = vadd.f32 %v700_v16, %v699_v13  ;;  %693 = vadd.xlane.f32.xlu1 %v692_v14  ;;  %v673_v31 = vadd.f32 %v672_v30, %v671_v29 }
  0xab   : > { %702 = vadd.xlane.f32.xlu2 %v701_v17 }
  0xb1   : > { %674 = vadd.xlane.f32.xlu1 %v673_v31 }
 0x116   : > { %v666_v34 = vpop.xlane.xlu0 %665 }
 0x117   : > { %v676_v35 = vmul.f32 0.015625, %v666_v34 }
 0x119   : > { %v706_v36 = vmul.f32 %v676_v35, %v676_v35  ;;  %v712_v58 = vsub.f32 %v1700_v40, %v676_v35  ;;  %v713_v59 = vsub.f32 %v1705_v41, %v676_v35  ;;  %v714_v0 = vsub.f32 %v1710_v42, %v676_v35 }
 0x11a   : > { %v715_v25 = vsub.f32 %v1715_v43, %v676_v35  ;;  %v785_v43 = vld.sshfl [vmem:[#allocation1 + $0x18] sm:$0xff pattern:$0x73625140] }
 0x11c   : > { %v694_v37 = vpop.xlane.xlu1 %693 }
 0x11d   : > { %v704_v20 = vmul.f32 0.015625, %v694_v37 }
 0x11e   : > { %v703_v22 = vpop.xlane.xlu2 %702 }
 0x11f   : > { %v708_v44 = vsub.f32 %v704_v20, %v706_v36  ;;  %v705_v18 = vmul.f32 0.015625, %v703_v22 }
 0x121   : > { %v710_v21 = vmax.f32 %v708_v44, 0.0 }
 0x123   : > { %v720_v45 = vadd.f32 1e-05, %v710_v21  ;;  %v789_v21 = vld.sshfl [vmem:[#allocation1 + $0x28] sm:$0xff pattern:$0x73625140] }
 0x124   : > { %v675_v46 = vpop.xlane.xlu1 %674 }
 0x125   : > { %1514 = vrsqrt.f32 %v720_v45  ;;  %v1777_v47 = vmul.f32 0.015625, %v675_v46  ;;  %vm728_vm4 = vweird.f32 %v720_v45 }
 0x127   : > { %v707_v48 = vmul.f32 %v1777_v47, %v1777_v47  ;;  %v719_v34 = vsub.f32 %v1753_v63, %v1777_v47 }
 0x129   : > { %v709_v23 = vsub.f32 %v705_v18, %v707_v48  ;;  %v1816_v48 = vld [vmem:[%s1804_s27] sm:$0x1f] }
 0x12b   : > { %v1515_v49 = vpop.eup %1514  ;;  %v711_v50 = vmax.f32 %v709_v23, 0.0  ;;  %v1819_v23 = vld [vmem:[%s1809_s30] sm:$0x1f] }
 0x12c   : > { %v723_v51 = vmul.f32 %v1515_v49, %v720_v45  ;;  %vm729_vm3 = vweird.f32 %v1515_v49  ;;  %v790_v45 = vld.sshfl [vmem:[#allocation1 + $0x30] sm:$0xff pattern:$0x73625140] }
 0x12d   : > { %v721_v52 = vadd.f32 1e-05, %v711_v50  ;;  %vm730_vm5 = vmor %vm728_vm4, %vm729_vm3 }
 0x12e   : > { %v724_v53 = vmul.f32 %v1515_v49, %v723_v51 }
 0x12f   : > { %1516 = vrsqrt.f32 %v721_v52  ;;  %vm738_vm7 = vweird.f32 %v721_v52 }
 0x130   : > { %v725_v54 = vmul.f32 0.5, %v724_v53  ;;  %v1826_v53 = vld [vmem:[%s1809_s30 + $0x8] sm:$0x1f] }
 0x132   : > { %v726_v55 = vsub.f32 1.5, %v725_v54 }
 0x134   : > { %v727_v56 = vmul.f32 %v1515_v49, %v726_v55 }
 0x135   : > { %v1517_v57 = vpop.eup %1516 }
 0x136   : > { %v731_v26 = vsel %vm730_vm5, %v1515_v49, %v727_v56  ;;  %v733_v1 = vmul.f32 %v1517_v57, %v721_v52  ;;  %vm739_vm6 = vweird.f32 %v1517_v57  ;;  %v992_v56 = vsub.f32 %v1819_v23, %v1816_v48 }
 0x137   : > { %v742_v27 = vmul.f32 %v731_v26, %v712_v58  ;;  %v743_v4 = vmul.f32 %v731_v26, %v713_v59  ;;  %v744_v19 = vmul.f32 %v731_v26, %v714_v0  ;;  %v745_v28 = vmul.f32 %v731_v26, %v715_v25  ;;  %vm740_vm8 = vmor %vm738_vm7, %vm739_vm6  ;;  %v1837_v59 = vld [vmem:[%s1809_s30 + $0x10] sm:$0x1f] }
 0x138   : > { %v734_v6 = vmul.f32 %v1517_v57, %v733_v1  ;;  %v1564_v25 = vmov 65535   ;;  %v993_v1 = vsub.f32 %v1826_v53, %v1816_v48 }
 0x139   : > { %v771_v11 = vmul.f32 %v1681_v2, %v742_v27  ;;  %v772_v40 = vmul.f32 %v1683_v3, %v743_v4  ;;  %v773_v41 = vmul.f32 %v1685_v8, %v744_v19  ;;  %v774_v42 = vmul.f32 %v1687_v9, %v745_v28  ;;  %v1844_v27 = vld [vmem:[%s1809_s30 + $0x18] sm:$0x1f] }
 0x13a   : > { %v735_v12 = vmul.f32 0.5, %v734_v6  ;;  %v716_v3 = vsub.f32 %v1738_v60, %v1777_v47  ;;  %v717_v8 = vsub.f32 %v1743_v61, %v1777_v47  ;;  %v718_v9 = vsub.f32 %v1748_v62, %v1777_v47  ;;  %v788_v61 = vld.sshfl [vmem:[#allocation1 + $0x20] sm:$0xff pattern:$0x73625140] }
 0x13b   : > { %v800_v13 = vadd.f32 %v782_v5, %v771_v11  ;;  %v801_v14 = vadd.f32 %v783_v7, %v772_v40  ;;  %v802_v15 = vadd.f32 %v784_v10, %v773_v41  ;;  %v803_v16 = vadd.f32 %v785_v43, %v774_v42 }
 0x13c   : > { %v736_v17 = vsub.f32 1.5, %v735_v12  ;;  %v1042_v26 = vsel %vm657_vm2, 4294967295, %v1564_v25  ;;  %v994_v7 = vsub.f32 %v1837_v59, %v1816_v48  ;;  %v995_v40 = vsub.f32 %v1844_v27, %v1816_v48  ;;  %v1957_v27 = vld [vmem:[%s1804_s27 + $0x8] sm:$0x1f] }
 0x13d   : > { %v1466_v24 = vmul.f32 -1.442695, %v800_v13  ;;  %v1467_v29 = vmul.f32 -1.442695, %v801_v14  ;;  %v1468_v30 = vmul.f32 -1.442695, %v802_v15 }
 0x13e   : > { %v1469_v2 = vmul.f32 -1.442695, %v803_v16  ;;  %v737_v31 = vmul.f32 %v1517_v57, %v736_v17  ;;  %v1854_v10 = vsel %vm1041_vm9, %v1042_v26, 0 }
 0x13f   : > { %1518 = vpow2.f32 %v1466_v24 }
 0x140   : > { %1520 = vpow2.f32 %v1467_v29  ;;  %v741_v35 = vsel %vm740_vm8, %v1517_v57, %v737_v31 }
 0x141   : > { %1522 = vpow2.f32 %v1468_v30  ;;  %v746_v36 = vmul.f32 %v741_v35, %v716_v3  ;;  %v747_v37 = vmul.f32 %v741_v35, %v717_v8  ;;  %v748_v20 = vmul.f32 %v741_v35, %v718_v9 }
 0x142   : > { %1524 = vpow2.f32 %v1469_v2  ;;  %v749_v60 = vmul.f32 %v741_v35, %v719_v34 }
 0x143   : > { %v775_v62 = vmul.f32 %v1689_v32, %v746_v36  ;;  %v776_v63 = vmul.f32 %v1691_v33, %v747_v37  ;;  %v777_v44 = vmul.f32 %v1693_v38, %v748_v20  ;;  %v791_v32 = vld.sshfl [vmem:[#allocation1 + $0x38] sm:$0xff pattern:$0x73625140] }
 0x144   : > { %v778_v22 = vmul.f32 %v1695_v39, %v749_v60 }
 0x145   : > { %v1519_v46 = vpop.eup %1518  ;;  %v804_v47 = vadd.f32 %v788_v61, %v775_v62  ;;  %v805_v18 = vadd.f32 %v789_v21, %v776_v63  ;;  %v806_v33 = vadd.f32 %v790_v45, %v777_v44 }
 0x146   : > { %v1521_v49 = vpop.eup %1520  ;;  %v1821_v50 = vadd.f32 1.0, %v1519_v46  ;;  %v807_v52 = vadd.f32 %v791_v32, %v778_v22 }
 0x147   : > { %v1523_v51 = vpop.eup %1522  ;;  %v1823_v38 = vadd.f32 1.0, %v1521_v49  ;;  %v1470_v55 = vmul.f32 -1.442695, %v804_v47  ;;  %v1471_v58 = vmul.f32 -1.442695, %v805_v18 }
 0x148   : > { %v1525_v39 = vpop.eup %1524  ;;  %v1828_v54 = vadd.f32 1.0, %v1523_v51  ;;  %1526 = vrcp.f32 %v1821_v50  ;;  %v1472_v0 = vmul.f32 -1.442695, %v806_v33  ;;  %v1473_v4 = vmul.f32 -1.442695, %v807_v52 }
 0x149   : > { %v1833_v57 = vadd.f32 1.0, %v1525_v39  ;;  %1528 = vrcp.f32 %v1823_v38  ;;  %v849_v19 = vand.u32 2147483647, %v1821_v50  ;;  %v851_v28 = vand.u32 2147483648, %v1821_v50 }
 0x14a   : > { %1530 = vrcp.f32 %v1828_v54  ;;  %v864_v5 = vand.u32 2147483647, %v1823_v38  ;;  %v866_v6 = vand.u32 2147483648, %v1823_v38  ;;  %v879_v11 = vand.u32 2147483647, %v1828_v54 }
 0x14b   : > { %1532 = vrcp.f32 %v1833_v57  ;;  %vm845_vm10 = vweird.f32 %v1821_v50  ;;  %vm860_vm11 = vweird.f32 %v1823_v38  ;;  %v881_v42 = vand.u32 2147483648, %v1828_v54 }
 0x14c   : > { %1534 = vpow2.f32 %v1470_v55  ;;  %vm1863_vm12 = vcmp.eq.f32.partialorder %v849_v19, 8.507059e+37  ;;  %v852_v14 = vor.u32 1.1754944e-38, %v851_v28  ;;  %vm875_vm13 = vweird.f32 %v1828_v54 }
 0x14d   : > { %1536 = vpow2.f32 %v1471_v58  ;;  %v894_v15 = vand.u32 2147483647, %v1833_v57  ;;  %vm1870_vm14 = vcmp.eq.f32.partialorder %v864_v5, 8.507059e+37  ;;  %v867_v29 = vor.u32 1.1754944e-38, %v866_v6 }
 0x14e   : > { %v1527_v41 = vpop.eup %1526  ;;  %1538 = vpow2.f32 %v1472_v0  ;;  %vm890_vm15 = vweird.f32 %v1833_v57  ;;  %vm1876_vm1 = vcmp.eq.f32.partialorder %v879_v11, 8.507059e+37  ;;  %v896_v8 = vand.u32 2147483648, %v1833_v57 }
 0x14f   : > { %v1529_v43 = vpop.eup %1528  ;;  %1540 = vpow2.f32 %v1473_v4  ;;  %v841_v12 = vmul.f32 %v1527_v41, %v1821_v50  ;;  %vm846_vm0 = vweird.f32 %v1527_v41  ;;  %v882_v35 = vor.u32 1.1754944e-38, %v881_v42 }
 0x150   : > { %v1531_v16 = vpop.eup %1530  ;;  %v856_v17 = vmul.f32 %v1529_v43, %v1823_v38  ;;  %vm861_vm2 = vweird.f32 %v1529_v43  ;;  %vm1884_vm3 = vcmp.eq.f32.partialorder %v894_v15, 8.507059e+37  ;;  %vm847_vm5 = vmor %vm845_vm10, %vm846_vm0  ;;  %v897_v39 = vor.u32 1.1754944e-38, %v896_v8 }
 0x151   : > { %v1533_v30 = vpop.eup %1532  ;;  %v842_v2 = vsub.f32 1.0, %v841_v12  ;;  %v871_v31 = vmul.f32 %v1531_v16, %v1828_v54  ;;  %vm876_vm4 = vweird.f32 %v1531_v16  ;;  %vm862_vm7 = vmor %vm860_vm11, %vm861_vm2 }
 0x152   : > { %v1535_v9 = vpop.eup %1534  ;;  %v857_v34 = vsub.f32 1.0, %v856_v17  ;;  %v886_v36 = vmul.f32 %v1533_v30, %v1833_v57  ;;  %vm891_vm6 = vweird.f32 %v1533_v30  ;;  %vm877_vm8 = vmor %vm875_vm13, %vm876_vm4 }
 0x153   : > { %v1537_v37 = vpop.eup %1536  ;;  %v1882_v20 = vadd.f32 1.0, %v1535_v9  ;;  %v843_v60 = vmul.f32 %v1527_v41, %v842_v2  ;;  %v872_v61 = vsub.f32 1.0, %v871_v31  ;;  %vm892_vm9 = vmor %vm890_vm15, %vm891_vm6 }
 0x154   : > { %v1539_v63 = vpop.eup %1538  ;;  %v1888_v44 = vadd.f32 1.0, %v1537_v37  ;;  %v858_v21 = vmul.f32 %v1529_v43, %v857_v34  ;;  %v887_v45 = vsub.f32 1.0, %v886_v36 }
 0x155   : > { %v1541_v22 = vpop.eup %1540  ;;  %v1890_v46 = vadd.f32 1.0, %v1539_v63  ;;  %1542 = vrcp.f32 %v1882_v20  ;;  %v844_v47 = vadd.f32 %v1527_v41, %v843_v60  ;;  %v873_v18 = vmul.f32 %v1531_v16, %v872_v61 }
 0x156   : > { %1544 = vrcp.f32 %v1888_v44  ;;  %v859_v49 = vadd.f32 %v1529_v43, %v858_v21  ;;  %v888_v32 = vmul.f32 %v1533_v30, %v887_v45  ;;  %v1897_v33 = vadd.f32 1.0, %v1541_v22 }
 0x157   : > { %v848_v51 = vsel %vm847_vm5, %v1527_v41, %v844_v47  ;;  %v874_v52 = vadd.f32 %v1531_v16, %v873_v18  ;;  %1546 = vrcp.f32 %v1890_v46  ;;  %v909_v38 = vand.u32 2147483647, %v1882_v20 }
 0x158   : > { %v853_v55 = vsel %vm1863_vm12, %v852_v14, %v848_v51  ;;  %v863_v58 = vsel %vm862_vm7, %v1529_v43, %v859_v49  ;;  %v889_v50 = vadd.f32 %v1533_v30, %v888_v32  ;;  %vm905_vm10 = vweird.f32 %v1882_v20 }
 0x159   : > { %v968_v0 = vrot.slane %v853_v55, 1  ;;  %v868_v25 = vsel %vm1870_vm14, %v867_v29, %v863_v58  ;;  %v878_v26 = vsel %vm877_vm8, %v1531_v16, %v874_v52  ;;  %v911_v54 = vand.u32 2147483648, %v1882_v20  ;;  %v523_v52 = vld [vmem:[%s1809_s30 + $0x28] sm:$0x1f] }
 0x15a   : > { %v969_v4 = vrot.slane %v868_v25, 1  ;;  %v883_v19 = vsel %vm1876_vm1, %v882_v35, %v878_v26  ;;  %v893_v28 = vsel %vm892_vm9, %v1533_v30, %v889_v50  ;;  %1548 = vrcp.f32 %v1897_v33 }
 0x15b   : > { %v1543_v5 = vpop.eup %1542  ;;  %v984_v6 = vmul.f32 %v968_v0, %v853_v55  ;;  %v970_v11 = vrot.slane %v883_v19, 1  ;;  %v898_v57 = vsel %vm1884_vm3, %v897_v39, %v893_v28  ;;  %vm1921_vm12 = vcmp.eq.f32.partialorder %v909_v38, 8.507059e+37  ;;  %v1976_v0 = vld [vmem:[%s2172_s9] sm:$0xf] }
 0x15c   : > { %v1545_v41 = vpop.eup %1544  ;;  %v985_v42 = vmul.f32 %v969_v4, %v868_v25  ;;  %v971_v43 = vrot.slane %v898_v57, 1  ;;  %v901_v12 = vmul.f32 %v1543_v5, %v1882_v20  ;;  %vm906_vm11 = vweird.f32 %v1543_v5 }
 0x15d   : > { %v1000_v14 = vperm.slane %v984_v6, 0  ;;  %v986_v15 = vmul.f32 %v970_v11, %v883_v19  ;;  %v912_v16 = vor.u32 1.1754944e-38, %v911_v54  ;;  %v916_v17 = vmul.f32 %v1545_v41, %v1888_v44  ;;  %v1926_v24 = vpop.eup %1546  ;;  %vm907_vm1 = vmor %vm905_vm10, %vm906_vm11 }
 0x15e   : > { %v1001_v29 = vperm.slane %v985_v42, 0  ;;  %v987_v30 = vmul.f32 %v971_v43, %v898_v57  ;;  %v902_v2 = vsub.f32 1.0, %v901_v12  ;;  %vm920_vm13 = vweird.f32 %v1888_v44 }
 0x15f   : > { %v1008_v31 = vmul.f32 %v1000_v14, %v992_v56  ;;  %v1002_v3 = vperm.slane %v986_v15, 0  ;;  %vm1037_vm14 = vcmask 39936   ;;  %v917_v8 = vsub.f32 1.0, %v916_v17 }
 0x160   : > { %vm921_vm15 = vweird.f32 %v1545_v41  ;;  %v1009_v9 = vmul.f32 %v1001_v29, %v993_v1  ;;  %v1003_v34 = vperm.slane %v987_v30, 0  ;;  %v903_v35 = vmul.f32 %v1543_v5, %v902_v2  ;;  %v1936_v37 = vpop.eup %1548  ;;  %v524_v29 = vld [vmem:[%s1809_s30 + $0x30] sm:$0x1f] }
 0x161   : > { %v924_v36 = vand.u32 2147483647, %v1888_v44  ;;  %v1016_v60 = vadd.f32 %v1008_v31, %v1816_v48  ;;  %v1010_v23 = vmul.f32 %v1002_v3, %v994_v7  ;;  %v918_v56 = vmul.f32 %v1545_v41, %v917_v8  ;;  %vm922_vm2 = vmor %vm920_vm13, %vm921_vm15 }
 0x162   : > { %v926_v61 = vand.u32 2147483648, %v1888_v44  ;;  %v1017_v53 = vadd.f32 %v1009_v9, %v1816_v48  ;;  %v1011_v1 = vmul.f32 %v1003_v34, %v995_v40  ;;  %v904_v62 = vadd.f32 %v1543_v5, %v903_v35  ;;  %v522_v40 = vld [vmem:[%s1809_s30 + $0x20] sm:$0x1f] }
 0x163   : > { %vm1947_vm0 = vcmp.eq.f32.partialorder %v924_v36, 8.507059e+37  ;;  %v1033_v21 = vpack.c.bf16 %v1016_v60, %v1016_v60  ;;  %v1018_v59 = vadd.f32 %v1010_v23, %v1816_v48  ;;  %v919_v7 = vadd.f32 %v1545_v41, %v918_v56 }
 0x164   : > { %v927_v45 = vor.u32 1.1754944e-38, %v926_v61  ;;  %v1034_v22 = vpack.c.bf16 %v1017_v53, %v1017_v53  ;;  %v1019_v47 = vadd.f32 %v1011_v1, %v1816_v48  ;;  %v908_v18 = vsel %vm907_vm1, %v1543_v5, %v904_v62  ;;  %v525_v1 = vld [vmem:[%s1809_s30 + $0x38] sm:$0x1f] }
 0x165   : > { %v931_v49 = vmul.f32 %v1926_v24, %v1890_v46  ;;  %v1045_v32 = vand.u32 %v1854_v10, %v1033_v21  ;;  %v1035_v20 = vpack.c.bf16 %v1018_v59, %v1018_v59  ;;  %v913_v51 = vsel %vm1921_vm12, %v912_v16, %v908_v18 }
 0x166   : > { %v923_v39 = vsel %vm922_vm2, %v1545_v41, %v919_v7  ;;  %v1048_v48 = vand.u32 %v1854_v10, %v1034_v22  ;;  %v1036_v55 = vpack.c.bf16 %v1019_v47, %v1019_v47  ;;  %v972_v58 = vrot.slane %v913_v51, 1 }
 0x167   : > { %v928_v50 = vsel %vm1947_vm0, %v927_v45, %v923_v39  ;;  %1063 = vmatpush.bf16.msra.mxu0 %v1045_v32  ;;  %v1051_v44 = vand.u32 %v1854_v10, %v1035_v20  ;;  %v996_v25 = vsub.f32 %v522_v40, %v1957_v27  ;;  %v932_v38 = vsub.f32 1.0, %v931_v49 }
 0x168   : > { %v973_v26 = vrot.slane %v928_v50, 1  ;;  %1076 = vmatpush.bf16.msra.mxu1 %v1048_v48  ;;  %v1054_v4 = vand.u32 %v1854_v10, %v1036_v55  ;;  %v988_v19 = vmul.f32 %v972_v58, %v913_v51  ;;  %v997_v28 = vsub.f32 %v523_v52, %v1957_v27 }
 0x169   : > { %v939_v54 = vand.u32 2147483647, %v1890_v46  ;;  %1089 = vmatpush.bf16.msra.mxu2 %v1051_v44  ;;  %v933_v6 = vmul.f32 %v1926_v24, %v932_v38  ;;  %vm936_vm3 = vweird.f32 %v1926_v24  ;;  %v941_v11 = vand.u32 2147483648, %v1890_v46 }
 0x16a   : > { %v989_v5 = vmul.f32 %v973_v26, %v928_v50  ;;  %1102 = vmatpush.bf16.msra.mxu3 %v1054_v4  ;;  %1474 = vmatmul.msk.bf16.vlgmr.msra.gmra.mxu0 %vm1037_vm14, %v1976_v0  ;;  %v1004_v57 = vperm.slane %v988_v19, 0  ;;  %v946_v41 = vmul.f32 %v1936_v37, %v1897_v33  ;;  %vm935_vm4 = vweird.f32 %v1890_v46 }
 0x16b   : > { %1475 = vmatmul.msk.bf16.vlgmr.msra.gmra.mxu1 %vm1037_vm14, %v1976_v0  ;;  %v934_v43 = vadd.f32 %v1926_v24, %v933_v6  ;;  %vm937_vm5 = vmor %vm935_vm4, %vm936_vm3  ;;  %vm940_vm6 = vcmp.eq.f32.partialorder %v939_v54, 8.507059e+37  ;;  %v942_v13 = vor.u32 1.1754944e-38, %v941_v11  ;;  %vm951_vm7 = vweird.f32 %v1936_v37 }
 0x16c   : > { %v1005_v42 = vperm.slane %v989_v5, 0  ;;  %1476 = vmatmul.msk.bf16.vlgmr.msra.gmra.mxu2 %vm1037_vm14, %v1976_v0  ;;  %v1012_v12 = vmul.f32 %v1004_v57, %v996_v25  ;;  %v947_v14 = vsub.f32 1.0, %v946_v41  ;;  %v956_v17 = vand.u32 2147483648, %v1897_v33 }
 0x16d   : > { %1477 = vmatmul.msk.bf16.vlgmr.msra.gmra.mxu3 %vm1037_vm14, %v1976_v0  ;;  %v938_v16 = vsel %vm937_vm5, %v1926_v24, %v934_v43  ;;  %v954_v31 = vand.u32 2147483647, %v1897_v33  ;;  %vm950_vm8 = vweird.f32 %v1897_v33  ;;  %v998_v36 = vsub.f32 %v524_v29, %v1957_v27 }
 0x16e   : > { %v1013_v15 = vmul.f32 %v1005_v42, %v997_v28  ;;  %v1020_v46 = vadd.f32 %v1012_v12, %v1957_v27  ;;  %v943_v30 = vsel %vm940_vm6, %v942_v13, %v938_v16  ;;  %v948_v2 = vmul.f32 %v1936_v37, %v947_v14  ;;  %vm952_vm9 = vmor %vm950_vm8, %vm951_vm7 }
 0x16f   : > { %v974_v8 = vrot.slane %v943_v30, 1  ;;  %v957_v60 = vor.u32 1.1754944e-38, %v956_v17  ;;  %vm955_vm10 = vcmp.eq.f32.partialorder %v954_v31, 8.507059e+37  ;;  %v999_v59 = vsub.f32 %v525_v1, %v1957_v27 }
 0x170   : > { %v1021_v3 = vadd.f32 %v1013_v15, %v1957_v27  ;;  %v1193_v9 = vpack.c.bf16 %v1020_v46, %v1020_v46  ;;  %v949_v34 = vadd.f32 %v1936_v37, %v948_v2 }
 0x171   : > { %v990_v35 = vmul.f32 %v974_v8, %v943_v30 }
 0x172   : > { %v1194_v24 = vpack.c.bf16 %v1021_v3, %v1021_v3  ;;  %v1198_v23 = vand.u32 %v1193_v9, %v1854_v10  ;;  %v953_v56 = vsel %vm952_vm9, %v1936_v37, %v949_v34 }
 0x173   : > { %v1006_v53 = vperm.slane %v990_v35, 0  ;;  %v958_v62 = vsel %vm955_vm10, %v957_v60, %v953_v56 }
 0x174   : > { %v1201_v61 = vand.u32 %v1194_v24, %v1854_v10  ;;  %1216 = vmatpush.bf16.msrb.mxu0 %v1198_v23  ;;  %v975_v33 = vrot.slane %v958_v62, 1 }
 0x175   : > { %v1014_v63 = vmul.f32 %v1006_v53, %v998_v36 }
 0x176   : > { %1229 = vmatpush.bf16.msrb.mxu1 %v1201_v61  ;;  %v991_v21 = vmul.f32 %v975_v33, %v958_v62 }
 0x177   : > { %v1022_v7 = vadd.f32 %v1014_v63, %v1957_v27 }
 0x178   : > { %v1007_v45 = vperm.slane %v991_v21, 0 }
 0x179   : > { %v1195_v22 = vpack.c.bf16 %v1022_v7, %v1022_v7 }
 0x17a   : > { %v1015_v47 = vmul.f32 %v1007_v45, %v999_v59  ;;  %1478 = vmatmul.msk.bf16.vlgmr.msrb.gmra.mxu0 %vm1037_vm14, %v1976_v0 }
 0x17b   : > { %v1204_v37 = vand.u32 %v1195_v22, %v1854_v10  ;;  %1479 = vmatmul.msk.bf16.vlgmr.msrb.gmra.mxu1 %vm1037_vm14, %v1976_v0 }
 0x17c   : > { %v1023_v40 = vadd.f32 %v1015_v47, %v1957_v27 }
 0x17d   : > { %1242 = vmatpush.bf16.msrb.mxu2 %v1204_v37 }
 0x17e   : > { %v1196_v18 = vpack.c.bf16 %v1023_v40, %v1023_v40 }
 0x180   : > { %v1207_v49 = vand.u32 %v1196_v18, %v1854_v10  ;;  %1480 = vmatmul.msk.bf16.vlgmr.msrb.gmra.mxu2 %vm1037_vm14, %v1976_v0 }
 0x182   : > { %1255 = vmatpush.bf16.msrb.mxu3 %v1207_v49 }
 0x185   : > { %1481 = vmatmul.msk.bf16.vlgmr.msrb.gmra.mxu3 %vm1037_vm14, %v1976_v0 }
 0x1e7   : > { %v2027_v32 = vpop.f32.mrf.mxu0 }
 0x1e8   : > { %v2029_v20 = vpop.f32.mrf.mxu1  ;;  %v1121_v51 = vmul.f32 %v2027_v32, %v2027_v32 }
 0x1e9   : > { %v1122_v27 = vmul.f32 %v2029_v20, %v2029_v20  ;;  %v1108_v10 = vadd.f32 %v2029_v20, %v2027_v32 }
 0x1eb   : > { %v1125_v52 = vadd.f32 %v1122_v27, %v1121_v51 }
 0x1ef   : > { %v2037_v39 = vpop.f32.mrf.mxu2  ;;  %v1067_v48 = vpop.f32.mrf.mxu0 }
 0x1f0   : > { %v1123_v55 = vmul.f32 %v2037_v39, %v2037_v39  ;;  %v2041_v58 = vpop.f32.mrf.mxu3  ;;  %v1080_v50 = vpop.f32.mrf.mxu1  ;;  %v1109_v44 = vadd.f32 %v1108_v10, %v2037_v39 }
 0x1f1   : > { %v1124_v0 = vmul.f32 %v2041_v58, %v2041_v58 }
 0x1f2   : > { %v1110_v25 = vadd.f32 %v1109_v44, %v2041_v58  ;;  %v1126_v26 = vadd.f32 %v1125_v52, %v1123_v55 }
 0x1f4   : > { %1111 = vadd.xlane.f32.xlu2 %v1110_v25  ;;  %v1127_v38 = vadd.f32 %v1126_v26, %v1124_v0  ;;  %v2082_v25 = vld [vmem:[%s2173_s10] sm:$0xff] }
 0x1f6   : > { %1128 = vadd.xlane.f32.xlu1 %v1127_v38 }
 0x1f7   : > { %v1093_v4 = vpop.f32.mrf.mxu2  ;;  %v2047_v19 = vpop.f32.mrf.mxu0 }
 0x1f8   : > { %v1106_v28 = vpop.f32.mrf.mxu3  ;;  %v2049_v54 = vpop.f32.mrf.mxu1  ;;  %v1274_v5 = vmul.f32 %v2047_v19, %v2047_v19 }
 0x1f9   : > { %v1275_v6 = vmul.f32 %v2049_v54, %v2049_v54  ;;  %v1261_v41 = vadd.f32 %v2049_v54, %v2047_v19 }
 0x1fb   : > { %v1278_v43 = vadd.f32 %v1275_v6, %v1274_v5  ;;  %v2091_v5 = vld [vmem:[%s2173_s10 + $0x8] sm:$0xff]  ;;  %v2096_v6 = vld [vmem:[%s2173_s10 + $0x10] sm:$0xff] }
 0x1ff   : > { %v1220_v11 = vpop.f32.mrf.mxu0 }
 0x200   : > { %v1233_v57 = vpop.f32.mrf.mxu1 }
 0x203   : > { %v2057_v42 = vpop.f32.mrf.mxu2 }
 0x204   : > { %v1276_v12 = vmul.f32 %v2057_v42, %v2057_v42  ;;  %v1262_v13 = vadd.f32 %v1261_v41, %v2057_v42  ;;  %v2108_v41 = vld [vmem:[%s2174_s11] sm:$0xff] }
 0x206   : > { %v1279_v14 = vadd.f32 %v1278_v43, %v1276_v12  ;;  %v2113_v43 = vld [vmem:[%s2174_s11 + $0x8] sm:$0xff]  ;;  %v2118_v12 = vld [vmem:[%s2174_s11 + $0x10] sm:$0xff] }
 0x208   : > { %v2062_v15 = vpop.f32.mrf.mxu3 }
 0x209   : > { %v1263_v16 = vadd.f32 %v1262_v13, %v2062_v15  ;;  %v1277_v17 = vmul.f32 %v2062_v15, %v2062_v15  ;;  %v2123_v13 = vld [vmem:[%s2174_s11 + $0x18] sm:$0xff] }
 0x20b   : > { %1264 = vadd.xlane.f32.xlu2 %v1263_v16  ;;  %v1246_v46 = vpop.f32.mrf.mxu2  ;;  %v1280_v29 = vadd.f32 %v1279_v14, %v1277_v17 }
 0x20d   : > { %1281 = vadd.xlane.f32.xlu1 %v1280_v29 }
 0x210   : > { %v1259_v30 = vpop.f32.mrf.mxu3 }
 0x267   : > { %v1112_v2 = vpop.xlane.xlu2 %1111 }
 0x268   : > { %v1113_v31 = vrot.slane %v1112_v2, 4 }
 0x269   : > { %v1129_v3 = vpop.xlane.xlu1 %1128 }
 0x26a   : > { %v1114_v8 = vadd.f32 %v1113_v31, %v1112_v2  ;;  %v1130_v9 = vrot.slane %v1129_v3, 4 }
 0x26c   : > { %v1115_v34 = vrot.slane %v1114_v8, 2  ;;  %v1131_v24 = vadd.f32 %v1130_v9, %v1129_v3 }
 0x26e   : > { %v1132_v35 = vrot.slane %v1131_v24, 2  ;;  %v1116_v36 = vadd.f32 %v1115_v34, %v1114_v8 }
 0x270   : > { %v1117_v60 = vrot.slane %v1116_v36, 1  ;;  %v1133_v23 = vadd.f32 %v1132_v35, %v1131_v24 }
 0x272   : > { %v1118_v56 = vadd.f32 %v1117_v60, %v1116_v36  ;;  %v1134_v61 = vrot.slane %v1133_v23, 1 }
 0x274   : > { %1487 = vpush %v1118_v56  ;;  %v1135_v53 = vadd.f32 %v1134_v61, %v1133_v23 }
 0x276   : > { %1489 = vpush %v1135_v53 }
 0x27e   : > { %v1265_v1 = vpop.xlane.xlu2 %1264 }
 0x27f   : > { %v1266_v33 = vrot.slane %v1265_v1, 4 }
 0x280   : > { %v1282_v62 = vpop.xlane.xlu1 %1281 }
 0x281   : > { %v1283_v63 = vrot.slane %v1282_v62, 4  ;;  %v1267_v59 = vadd.f32 %v1266_v33, %v1265_v1  ;;  %v1512_v1 = vld [vmem:[%s2071_s17] ss:$0 sm:$0xff] }
 0x283   : > { %v1284_v7 = vadd.f32 %v1283_v63, %v1282_v62  ;;  %v1268_v45 = vrot.slane %v1267_v59, 2 }
 0x285   : > { %v1285_v47 = vrot.slane %v1284_v7, 2  ;;  %v1269_v40 = vadd.f32 %v1268_v45, %v1267_v59 }
 0x287   : > { %v1286_v49 = vadd.f32 %v1285_v47, %v1284_v7  ;;  %v1270_v10 = vrot.slane %v1269_v40, 1 }
 0x289   : > { %v1287_v52 = vrot.slane %v1286_v49, 1  ;;  %v1271_v50 = vadd.f32 %v1270_v10, %v1269_v40 }
 0x28b   : > { %v1288_v44 = vadd.f32 %v1287_v52, %v1286_v49 }
 0x2a5   : > { %s1488_s18 = spop %1487 }
 0x2a6   : > { %s2073_s19 = smul.f32 0.001953125, %s1488_s18 }
 0x2a7   : > { %s1490_s20 = spop %1489 }
 0x2a8   : > { %s1138_s21 = smul.f32 %s2073_s19, %s2073_s19  ;;  %v1141_v0 = vstv %s2073_s19 }
 0x2a9   : > { %s1137_s24 = smul.f32 0.001953125, %s1490_s20  ;;  %v1142_v26 = vsub.f32 %v2027_v32, %v1141_v0  ;;  %v1143_v38 = vsub.f32 %v2029_v20, %v1141_v0  ;;  %v1144_v4 = vsub.f32 %v2037_v39, %v1141_v0  ;;  %v1145_v28 = vsub.f32 %v2041_v58, %v1141_v0  ;;  %v2101_v32 = vld [vmem:[%s2173_s10 + $0x18] sm:$0xff] }
 0x2ab   : > { %s1139_s25 = ssub.f32 %s1137_s24, %s1138_s21 }
 0x2ad   : > { %s1140_s27 = smax.f32 %s1565_s26, %s1139_s25 }
 0x2ae   : > { %s1146_s28 = sadd.f32 1e-05, %s1140_s27 }
 0x2b0   : > { %v1147_v21 = vstv %s1146_s28  ;;  %s2142_s28 = scalar_lea.vmem %s2175_s12, %s1459_s22 }
 0x2b1   : > { %1550 = vrsqrt.f32 %v1147_v21  ;;  %vm1154_vm12 = vweird.f32 %v1147_v21 }
 0x2b7   : > { %v1551_v22 = vpop.eup %1550 }
 0x2b8   : > { %v1149_v37 = vmul.f32 %v1551_v22, %v1147_v21  ;;  %vm1155_vm11 = vweird.f32 %v1551_v22 }
 0x2b9   : > { %vm1156_vm13 = vmor %vm1154_vm12, %vm1155_vm11 }
 0x2ba   : > { %v1150_v18 = vmul.f32 %v1551_v22, %v1149_v37 }
 0x2bc   : > { %v1151_v51 = vmul.f32 0.5, %v1150_v18 }
 0x2be   : > { %v1152_v27 = vsub.f32 1.5, %v1151_v51 }
 0x2c0   : > { %v1153_v48 = vmul.f32 %v1551_v22, %v1152_v27 }
 0x2c2   : > { %v1157_v55 = vsel %vm1156_vm13, %v1551_v22, %v1153_v48 }
 0x2c3   : > { %1491 = vpush %v1157_v55 }
 0x2c4   : > { %1493 = vpush %v1271_v50 }
 0x2c5   : > { %1495 = vpush %v1288_v44 }
 0x2f4   : > { %s1492_s13 = spop %1491 }
 0x2f5   : > { %v1159_v20 = vstv %s1492_s13  ;;  %s1494_s21 = spop %1493 }
 0x2f6   : > { %v1160_v39 = vmul.f32 %v1159_v20, %v1142_v26  ;;  %v1161_v58 = vmul.f32 %v1159_v20, %v1143_v38  ;;  %v1162_v11 = vmul.f32 %v1159_v20, %v1144_v4  ;;  %v1163_v57 = vmul.f32 %v1159_v20, %v1145_v28  ;;  %s2103_s24 = smul.f32 0.001953125, %s1494_s21  ;;  %s1496_s25 = spop %1495 }
 0x2f7   : > { %s1290_s15 = smul.f32 0.001953125, %s1496_s25 }
 0x2f8   : > { %v1164_v14 = vmul.f32 %v1160_v39, %v2082_v25  ;;  %v1165_v16 = vmul.f32 %v1161_v58, %v2091_v5  ;;  %v1166_v17 = vmul.f32 %v1162_v11, %v2096_v6  ;;  %v1167_v46 = vmul.f32 %v1163_v57, %v2101_v32  ;;  %s1291_s19 = smul.f32 %s2103_s24, %s2103_s24  ;;  %v1513_v57 = vld [vmem:[%s2071_s17 + $0x1] ss:$0 sm:$0xff] }
 0x2f9   : > { %v1294_v37 = vstv %s2103_s24 }
 0x2fa   : > { %v1168_v29 = vadd.f32 %v1164_v14, %v2108_v41  ;;  %v1169_v30 = vadd.f32 %v1165_v16, %v2113_v43  ;;  %v1170_v2 = vadd.f32 %v1166_v17, %v2118_v12  ;;  %s1292_s20 = ssub.f32 %s1290_s15, %s1291_s19  ;;  %v1171_v31 = vadd.f32 %v1167_v46, %v2123_v13 }
 0x2fb   : > { %v1295_v40 = vsub.f32 %v2047_v19, %v1294_v37  ;;  %v1296_v18 = vsub.f32 %v2049_v54, %v1294_v37  ;;  %v1297_v49 = vsub.f32 %v2057_v42, %v1294_v37  ;;  %v1298_v51 = vsub.f32 %v2062_v15, %v1294_v37 }
 0x2fc   : > { %vm1172_vm14 = vcmp.ge.f32.partialorder %v1168_v29, 0.0  ;;  %vm1173_vm15 = vcmp.ge.f32.partialorder %v1169_v30, 0.0  ;;  %s1293_s21 = smax.f32 %s1565_s26, %s1292_s20  ;;  %v1176_v3 = vmul.f32 0.02, %v1168_v29  ;;  %v1177_v8 = vmul.f32 0.02, %v1169_v30 }
 0x2fd   : > { %v1178_v9 = vmul.f32 0.02, %v1170_v2  ;;  %vm1174_vm0 = vcmp.ge.f32.partialorder %v1170_v2, 0.0  ;;  %s1299_s25 = sadd.f32 1e-05, %s1293_s21  ;;  %vm1175_vm1 = vcmp.ge.f32.partialorder %v1171_v31, 0.0 }
 0x2fe   : > { %v1179_v34 = vmul.f32 0.02, %v1171_v31  ;;  %v1180_v24 = vsel %vm1172_vm14, %v1168_v29, %v1176_v3  ;;  %v1181_v35 = vsel %vm1173_vm15, %v1169_v30, %v1177_v8 }
 0x2ff   : > { %v1184_v36 = vadd.f32 %v1181_v35, %v1180_v24  ;;  %v1300_v60 = vstv %s1299_s25  ;;  %v1182_v23 = vsel %vm1174_vm0, %v1170_v2, %v1178_v9 }
 0x300   : > { %1552 = vrsqrt.f32 %v1300_v60  ;;  %v1183_v61 = vsel %vm1175_vm1, %v1171_v31, %v1179_v34  ;;  %vm1307_vm3 = vweird.f32 %v1300_v60 }
 0x301   : > { %v1185_v56 = vadd.f32 %v1184_v36, %v1182_v23 }
 0x303   : > { %v1186_v53 = vadd.f32 %v1185_v56, %v1183_v61 }
 0x305   : > { %v1187_v62 = vmul.f32 0.25, %v1186_v53 }
 0x306   : > { %v1553_v33 = vpop.eup %1552 }
 0x307   : > { %v1191_v63 = vmul.f32 %v1512_v1, %v1187_v62  ;;  %v1302_v21 = vmul.f32 %v1553_v33, %v1300_v60  ;;  %vm1308_vm2 = vweird.f32 %v1553_v33 }
 0x308   : > { %vm1309_vm4 = vmor %vm1307_vm3, %vm1308_vm2 }
 0x309   : > { %1192 = vst [vmem:[%s2142_s28] sm:$0xff] %v1191_v63  ;;  %v1303_v59 = vmul.f32 %v1553_v33, %v1302_v21 }
 0x30b   : > { %v1304_v7 = vmul.f32 0.5, %v1303_v59 }
 0x30d   : > { %v1305_v45 = vsub.f32 1.5, %v1304_v7 }
 0x30f   : > { %v1306_v22 = vmul.f32 %v1553_v33, %v1305_v45 }
 0x311   : > { %v1310_v47 = vsel %vm1309_vm4, %v1553_v33, %v1306_v22 }
 0x312   : > { %1497 = vpush %v1310_v47 }
 0x343   : > { %s1498_s5 = spop %1497 }
 0x344   : > { %v1312_v27 = vstv %s1498_s5 }
 0x345   : > { %v1313_v10 = vmul.f32 %v1312_v27, %v1295_v40  ;;  %v1314_v52 = vmul.f32 %v1312_v27, %v1296_v18  ;;  %v1315_v48 = vmul.f32 %v1312_v27, %v1297_v49  ;;  %v1316_v55 = vmul.f32 %v1312_v27, %v1298_v51 }
 0x347   : > { %v1317_v50 = vmul.f32 %v1313_v10, %v2082_v25  ;;  %v1318_v44 = vmul.f32 %v1314_v52, %v2091_v5  ;;  %v1319_v0 = vmul.f32 %v1315_v48, %v2096_v6  ;;  %v1320_v19 = vmul.f32 %v1316_v55, %v2101_v32 }
 0x349   : > { %v1321_v54 = vadd.f32 %v1317_v50, %v2108_v41  ;;  %v1322_v42 = vadd.f32 %v1318_v44, %v2113_v43  ;;  %v1323_v15 = vadd.f32 %v1319_v0, %v2118_v12  ;;  %v1324_v26 = vadd.f32 %v1320_v19, %v2123_v13 }
 0x34b   : > { %vm1325_vm5 = vcmp.ge.f32.partialorder %v1321_v54, 0.0  ;;  %vm1326_vm6 = vcmp.ge.f32.partialorder %v1322_v42, 0.0  ;;  %v1329_v38 = vmul.f32 0.02, %v1321_v54  ;;  %v1330_v25 = vmul.f32 0.02, %v1322_v42 }
 0x34c   : > { %v1331_v4 = vmul.f32 0.02, %v1323_v15  ;;  %vm1327_vm7 = vcmp.ge.f32.partialorder %v1323_v15, 0.0  ;;  %v1332_v28 = vmul.f32 0.02, %v1324_v26  ;;  %vm1328_vm8 = vcmp.ge.f32.partialorder %v1324_v26, 0.0 }
 0x34d   : > { %v1333_v5 = vsel %vm1325_vm5, %v1321_v54, %v1329_v38  ;;  %v1334_v6 = vsel %vm1326_vm6, %v1322_v42, %v1330_v25 }
 0x34e   : > { %v1337_v32 = vadd.f32 %v1334_v6, %v1333_v5  ;;  %v1335_v20 = vsel %vm1327_vm7, %v1323_v15, %v1331_v4  ;;  %v1336_v58 = vsel %vm1328_vm8, %v1324_v26, %v1332_v28 }
 0x350   : > { %v1338_v39 = vadd.f32 %v1337_v32, %v1335_v20 }
 0x352   : > { %v1339_v11 = vadd.f32 %v1338_v39, %v1336_v58 }
 0x354   : > { %v1340_v41 = vmul.f32 0.25, %v1339_v11 }
 0x356   : > { %v1344_v43 = vmul.f32 %v1513_v57, %v1340_v41 }
 0x358   : > { %1482 = vst [vmem:[%s2142_s28 + $0x8] sm:$0xff] %v1344_v43 }
 0x359 PF: > { %s23_s23 = sadd.s32 1, %s1560_s23  }
 0x35a   : > { %p20_p4 = scmp.ge.s32.totalorder %s23_s23, 4  }
 0x35c   :  { %22 = sbr.rel (!%p20_p4) target bundleno = 2 (0x2), region = 116 }

// kernel: encoder_forward.5
= control target key start
LH: loop header
LB: loop body
LE: loop exit
PB: predicated region body
PF: predicated region fallthrough
CT: control target
= control target key end

     0   :  { %10 = vsyncpa [#allocation3], 0  ;;  %s3641_s0 = inlined_call_operand.vmem [shape: bf16[4,128,24], index: 0, kind: input, shape index: {}]   ;;  %s3642_s1 = inlined_call_operand.vmem [shape: f32[4,128,1], index: 1, kind: input, shape index: {}]   ;;  %s3643_s2 = inlined_call_operand.vmem [shape: bf16[24,24], index: 2, kind: input, shape index: {}]   ;;  %s3644_s3 = inlined_call_operand.vmem [shape: f32[128,24], index: 3, kind: input, shape index: {}]   ;;  %s3645_s4 = inlined_call_operand.vmem [shape: f32[128,24], index: 4, kind: input, shape index: {}]   ;;  %s3646_s5 = inlined_call_operand.hbm [shape: f32[2,2,24], index: 5, kind: output, shape index: {}]  }
   0x1   :  { %12 = vsyncpa [#allocation3 + $0x1], 0  ;;  %s2143_s18 = smov 0   ;;  %s2145_s19 = smov 0  }
   0x2   :  { %s2147_s20 = smov 0   ;;  %s2149_s21 = smov 0  }
   0x3 LB: > { %s1822_s22 = sadd.s32 4294967295, %s2108_s21   ;;  %s1823_s23 = sadd.s32 4294967294, %s2108_s21   ;;  %s2108_s21 = sphi %s2149_s21, %s3913_s21   ;;  %s2104_s20 = sphi %s2147_s20, %s3912_s20   ;;  %s2100_s19 = sphi %s2145_s19, %s3911_s19   ;;  %s2096_s18 = sphi %s2143_s18, %s3910_s18  }
   0x4   : > { %s2166_s24 = sadd.s32 1, %s2108_s21   ;;  %s140_s25 = sadd.s32 1, %s2104_s20 }
   0x5   : > { %s137_s26 = ssub.s32 %s2108_s21, %s2166_s24  ;;  %p150_p0 = scmp.ne.s32.totalorder %s2104_s20, %s2100_s19 }
   0x6   : > { %p138_p1 = scmp.eq.s32.totalorder %s137_s26, 0  ;;  %p151_p2 = scmp.eq.s32.totalorder %s1822_s22, 1 }
   0x7   : > { %p156_p3 = scmp.ne.s32.totalorder %s2100_s19, %s2096_s18  ;;  %p157_p4 = scmp.eq.s32.totalorder %s1823_s23, 1 }
   0x8   : > { %s2176_s27 = scalar_select %p138_p1, %s2104_s20, %s140_s25  }
   0x9   : > { %p2178_p5 = por %p151_p2, %p150_p0  ;;  %p2182_p6 = por %p157_p4, %p156_p3 }
   0xa   : > { %p1826_p7 = scmp.ge.s32.totalorder %s2108_s21, 1  ;;  %p204_p8 = scmp.lt.s32.totalorder %s2108_s21, 3 }
   0xc   : > { %p205_p9 = pnand %p1826_p7, %p204_p8 }
   0xe   : > { %208 = sbr.rel (%p205_p9) target bundleno = 684 (0x2ac), region = 40 }
  0x13   : > { %v256_v0 = vld [vmem:[%s3643_s2 + $0x8] sm:$0xf]  ;;  %s2191_s7 = sshll.u32 %s1822_s22, 1  ;;  %vm395_vm0 = vcmask 1043456   ;;  %v1956_v4 = vld [vmem:[%s3643_s2] sm:$0xff]  ;;  %vm3720_vm1 = vcmask 195584  }
  0x14   : > { %v366_v1 = vunpack.c.l.b16 %v256_v0  ;;  %p240_p10 = scmp.lt.s32.totalorder %s2191_s7, 3  ;;  %v3648_v14 = vmov 0   ;;  %vm825_vm5 = vcmask 7168   ;;  %s236_s16 = sand.u32 1, %s2100_s19  }
  0x15   : > { %2035 = vset.pattern.permute.xlu2 %v3648_v14  ;;  %2037 = vset.pattern.permute.xlu1 %v3648_v14  ;;  %s1827_s17 = sshll.u32 %s236_s16, 1 }
  0x16   : > { %v368_v2 = vpack.c.b16 %v366_v1, %v366_v1  ;;  %s241_s8 = scalar_select %p240_p10, %s2191_s7, 3  ;;  %2036 = vset.pattern.permute.xlu0 %v3648_v14 }
  0x18   : > { %v397_v3 = vsel %vm395_vm0, %v368_v2, 0  ;;  %s1954_s9 = sshll.u32 %s241_s8, 6  ;;  %s1955_s15 = sshll.u32 %s241_s8, 7 }
  0x19   : > { %405 = vmatpush.bf16.msra.mxu0 %v397_v3  ;;  %1121 = vmatpush.bf16.msra.mxu1 %v397_v3  ;;  %s2201_s14 = scalar_lea.vmem %s3641_s0, %s1954_s9  ;;  %s2218_s22 = scalar_lea.vmem %s3642_s1, %s1955_s15 }
  0x1a   : > { %1973 = vmatpush.bf16.msra.mxu2 %v397_v3  ;;  %1975 = vmatpush.bf16.msra.mxu3 %v397_v3  ;;  %v1957_v5 = vld [vmem:[%s2201_s14] sm:$0xff]  ;;  %v1958_v9 = vld [vmem:[%s2201_s14 + $0x8] sm:$0xff]  ;;  %v2225_v13 = vld [vmem:[%s2218_s22 + $0x10] sm:$0xff]  ;;  %s2111_s9 = smov 0.0  }
  0x1b   : > { %v1965_v6 = vld [vmem:[%s2201_s14 + $0x40] sm:$0xff]  ;;  %v1966_v10 = vld [vmem:[%s2201_s14 + $0x48] sm:$0xff]  ;;  %vm678_vm2 = vcmp.gt.f32.partialorder %v2225_v13, 0.5  ;;  %v2232_v16 = vld [vmem:[%s2218_s22 + $0x18] sm:$0xff]  ;;  %v829_v33 = vsel %vm825_vm5, %v2225_v13, 0.0 }
  0x1c   : > { %v1961_v7 = vld [vmem:[%s2201_s14 + $0x20] sm:$0xff]  ;;  %v1962_v11 = vld [vmem:[%s2201_s14 + $0x28] sm:$0xff]  ;;  %v694_v15 = vsel %vm678_vm2, 1, %v3648_v14  ;;  %vm679_vm3 = vcmp.gt.f32.partialorder %v2232_v16, 0.5  ;;  %v2238_v18 = vld [vmem:[%s2218_s22 + $0x30] sm:$0xff]  ;;  %v831_v35 = vsel %vm825_vm5, %v2232_v16, 0.0 }
  0x1d   : > { %406 = vmatpush.bf16.msra.mxu0 %v1956_v4  ;;  %1122 = vmatpush.bf16.msra.mxu1 %v1956_v4  ;;  %v1969_v8 = vld [vmem:[%s2201_s14 + $0x60] sm:$0xff]  ;;  %v1970_v12 = vld [vmem:[%s2201_s14 + $0x68] sm:$0xff]  ;;  %v695_v17 = vsel %vm679_vm3, 1, %v3648_v14  ;;  %v1959_v19 = vld [vmem:[%s2201_s14 + $0x10] sm:$0xff]  ;;  %vm682_vm4 = vcmp.gt.f32.partialorder %v2238_v18, 0.5  ;;  %v837_v43 = vsel %vm825_vm5, %v2238_v18, 0.0 }
  0x1e   : > { %1974 = vmatpush.bf16.msra.mxu2 %v1956_v4  ;;  %1976 = vmatpush.bf16.msra.mxu3 %v1956_v4  ;;  %v1967_v20 = vld [vmem:[%s2201_s14 + $0x50] sm:$0xff]  ;;  %v698_v23 = vsel %vm682_vm4, 1, %v3648_v14  ;;  %v1960_v24 = vld [vmem:[%s2201_s14 + $0x18] sm:$0xff]  ;;  %v2259_v28 = vld [vmem:[%s2218_s22] sm:$0xff] }
  0x1f   : > { %715 = vperm.xlu2 %2035, %v694_v15   ;;  %v1963_v21 = vld [vmem:[%s2201_s14 + $0x30] sm:$0xff]  ;;  %v1968_v25 = vld [vmem:[%s2201_s14 + $0x58] sm:$0xff]  ;;  %v2262_v29 = vld [vmem:[%s2218_s22 + $0x8] sm:$0xff]  ;;  %v826_v30 = vsel %vm825_vm5, %v2259_v28, 0.0  ;;  %vm676_vm10 = vcmp.gt.f32.partialorder %v2259_v28, 0.5 }
  0x20   : > { %1870 = vmatmul.msk.bf16.vlgmr.msra.gmra.mxu0 %vm3720_vm1, %v1957_v5  ;;  %1942 = vmatmul.msk.bf16.vlgmr.msra.gmra.mxu1 %vm3720_vm1, %v1965_v6  ;;  %v1971_v22 = vld [vmem:[%s2201_s14 + $0x70] sm:$0xff]  ;;  %v1964_v26 = vld [vmem:[%s2201_s14 + $0x38] sm:$0xff]  ;;  %v827_v31 = vsel %vm825_vm5, %v2262_v29, 0.0  ;;  %v2273_v36 = vld [vmem:[%s2218_s22 + $0x20] sm:$0xff]  ;;  %vm677_vm11 = vcmp.gt.f32.partialorder %v2262_v29, 0.5 }
  0x21   : > { %1874 = vmatmul.msk.bf16.vlgmr.msra.gmra.mxu2 %vm3720_vm1, %v1961_v7  ;;  %1946 = vmatmul.msk.bf16.vlgmr.msra.gmra.mxu3 %vm3720_vm1, %v1969_v8  ;;  %v1972_v27 = vld [vmem:[%s2201_s14 + $0x78] sm:$0xff]  ;;  %v828_v32 = vadd.f32 %v827_v31, %v826_v30  ;;  %v833_v38 = vsel %vm825_vm5, %v2273_v36, 0.0  ;;  %v2278_v39 = vld [vmem:[%s2218_s22 + $0x28] sm:$0xff]  ;;  %v2285_v44 = vld [vmem:[%s2218_s22 + $0x80] sm:$0xff] }
  0x22   : > { %v835_v41 = vsel %vm825_vm5, %v2278_v39, 0.0  ;;  %v2288_v45 = vld [vmem:[%s2218_s22 + $0x88] sm:$0xff]  ;;  %v1541_v46 = vsel %vm825_vm5, %v2285_v44, 0.0  ;;  %v2295_v49 = vld [vmem:[%s2218_s22 + $0x90] sm:$0xff]  ;;  %v2300_v52 = vld [vmem:[%s2218_s22 + $0x38] sm:$0xff]  ;;  %vm681_vm12 = vcmp.gt.f32.partialorder %v2278_v39, 0.5 }
  0x23   : > { %v830_v34 = vadd.f32 %v829_v33, %v828_v32  ;;  %v1542_v47 = vsel %vm825_vm5, %v2288_v45, 0.0  ;;  %v1544_v51 = vsel %vm825_vm5, %v2295_v49, 0.0  ;;  %v2303_v53 = vld [vmem:[%s2218_s22 + $0x40] sm:$0xff]  ;;  %v2306_v54 = vld [vmem:[%s2218_s22 + $0x98] sm:$0xff]  ;;  %v839_v56 = vsel %vm825_vm5, %v2300_v52, 0.0  ;;  %v2322_v1 = vld [vmem:[%s2218_s22 + $0x48] sm:$0xff] }
  0x24   : > { %v1543_v50 = vadd.f32 %v1542_v47, %v1541_v46  ;;  %vm684_vm6 = vcmp.gt.f32.partialorder %v2303_v53, 0.5  ;;  %v841_v57 = vsel %vm825_vm5, %v2303_v53, 0.0  ;;  %v1546_v58 = vsel %vm825_vm5, %v2306_v54, 0.0  ;;  %v2317_v61 = vld [vmem:[%s2218_s22 + $0xa0] sm:$0xff]  ;;  %v2325_v2 = vld [vmem:[%s2218_s22 + $0xa8] sm:$0xff]  ;;  %v2332_v6 = vld [vmem:[%s2218_s22 + $0x50] sm:$0xff] }
  0x25   : > { %v832_v37 = vadd.f32 %v831_v35, %v830_v34  ;;  %v700_v59 = vsel %vm684_vm6, 1, %v3648_v14  ;;  %v1548_v63 = vsel %vm825_vm5, %v2317_v61, 0.0  ;;  %3723 = vst [vmem:[#allocation5_spill] sm:$0xff] %v2325_v2  ;;  %v843_v4 = vsel %vm825_vm5, %v2322_v1, 0.0  ;;  %v2335_v8 = vld [vmem:[%s2218_s22 + $0xb0] sm:$0xff]  ;;  %v2342_v15 = vld [vmem:[%s2218_s22 + $0x58] sm:$0xff] }
  0x26   : > { %v1545_v55 = vadd.f32 %v1544_v51, %v1543_v50  ;;  %v1550_v5 = vsel %vm825_vm5, %v2325_v2, 0.0  ;;  %3724 = vst [vmem:[#allocation6_spill] sm:$0xff] %v2335_v8  ;;  %vm686_vm7 = vcmp.gt.f32.partialorder %v2332_v6, 0.5  ;;  %v2364_v31 = vld [vmem:[%s2218_s22 + $0x68] sm:$0xff]  ;;  %v2384_v47 = vld [vmem:[%s2218_s22 + $0x78] sm:$0xff]  ;;  %vm683_vm13 = vcmp.gt.f32.partialorder %v2300_v52, 0.5 }
  0x27   : > { %718 = vperm.xlu2 %2035, %v695_v17   ;;  %v834_v40 = vadd.f32 %v833_v38, %v832_v37  ;;  %v2345_v17 = vld [vmem:[%s2218_s22 + $0xb8] sm:$0xff]  ;;  %v2367_v33 = vld [vmem:[%s2218_s22 + $0xc8] sm:$0xff]  ;;  %v851_v35 = vsel %vm825_vm5, %v2364_v31, 0.0  ;;  %v2374_v38 = vld [vmem:[%s2218_s22 + $0x70] sm:$0xff]  ;;  %vm685_vm14 = vcmp.gt.f32.partialorder %v2322_v1, 0.5  ;;  %vm687_vm15 = vcmp.gt.f32.partialorder %v2342_v15, 0.5 }
  0x28   : > { %v1547_v62 = vadd.f32 %v1546_v58, %v1545_v55  ;;  %v1558_v37 = vsel %vm825_vm5, %v2367_v33, 0.0  ;;  %3726 = vst [vmem:[#allocation8_spill] sm:$0xff] %v2374_v38  ;;  %v2387_v50 = vld [vmem:[%s2218_s22 + $0xd8] sm:$0xff]  ;;  %v855_v55 = vsel %vm825_vm5, %v2384_v47, 0.0  ;;  %vm690_vm9 = vcmp.gt.f32.partialorder %v2374_v38, 0.5 }
  0x29   : > { %v836_v42 = vadd.f32 %v835_v41, %v834_v40  ;;  %v2377_v41 = vld [vmem:[%s2218_s22 + $0xd0] sm:$0xff]  ;;  %3728 = vst [vmem:[#allocation10_spill] sm:$0xff] %v2387_v50  ;;  %vm689_vm0 = vcmp.gt.f32.partialorder %v2364_v31, 0.5  ;;  %vm1392_vm2 = vcmp.gt.f32.partialorder %v2285_v44, 0.5  ;;  %vm1393_vm3 = vcmp.gt.f32.partialorder %v2288_v45, 0.5 }
  0x2a   : > { %v1549_v3 = vadd.f32 %v1548_v63, %v1547_v62  ;;  %3727 = vst [vmem:[#allocation9_spill] sm:$0xff] %v2377_v41  ;;  %v1560_v46 = vsel %vm825_vm5, %v2377_v41, 0.0  ;;  %v2401_v63 = vld [vmem:[%s2218_s22 + $0xe8] sm:$0xff]  ;;  %vm1394_vm4 = vcmp.gt.f32.partialorder %v2295_v49, 0.5  ;;  %vm1395_vm6 = vcmp.gt.f32.partialorder %v2306_v54, 0.5 }
  0x2b   : > { %v838_v48 = vadd.f32 %v837_v43, %v836_v42  ;;  %v853_v43 = vsel %vm825_vm5, %v2374_v38, 0.0  ;;  %3729 = vst [vmem:[#allocation11_spill] sm:$0xff] %v2401_v63 }
  0x2d   : > { %v840_v60 = vadd.f32 %v839_v56, %v838_v48  ;;  %v1562_v56 = vsel %vm825_vm5, %v2387_v50, 0.0 }
  0x2f   : > { %727 = vperm.xlu2 %2035, %v698_v23   ;;  %v842_v0 = vadd.f32 %v841_v57, %v840_v60  ;;  %v2354_v23 = vld [vmem:[%s2218_s22 + $0x60] sm:$0xff] }
  0x30   : > { %1871 = vmatmul.msk.bf16.gmra.mxu0 %vm3720_vm1, %v1958_v9  ;;  %1943 = vmatmul.msk.bf16.gmra.mxu1 %vm3720_vm1, %v1966_v10  ;;  %v1551_v9 = vadd.f32 %v1550_v5, %v1549_v3  ;;  %v845_v10 = vsel %vm825_vm5, %v2332_v6, 0.0  ;;  %3725 = vst [vmem:[#allocation7_spill] sm:$0xff] %v2354_v23  ;;  %vm688_vm8 = vcmp.gt.f32.partialorder %v2354_v23, 0.5  ;;  %v1566_v3 = vsel %vm825_vm5, %v2401_v63, 0.0 }
  0x31   : > { %1875 = vmatmul.msk.bf16.gmra.mxu2 %vm3720_vm1, %v1962_v11  ;;  %1947 = vmatmul.msk.bf16.gmra.mxu3 %vm3720_vm1, %v1970_v12  ;;  %v844_v7 = vadd.f32 %v843_v4, %v842_v0  ;;  %v1552_v11 = vsel %vm825_vm5, %v2335_v8, 0.0  ;;  %v704_v57 = vsel %vm688_vm8, 1, %v3648_v14  ;;  %v2406_v4 = vld [vmem:[%s2218_s22 + $0xf0] sm:$0xff]  ;;  %vm1396_vm8 = vcmp.gt.f32.partialorder %v2317_v61, 0.5 }
  0x32   : > { %3730 = vst [vmem:[#allocation12_spill] sm:$0xff] %v2406_v4 }
  0x33   : > { %v846_v12 = vadd.f32 %v845_v10, %v844_v7  ;;  %v1568_v7 = vsel %vm825_vm5, %v2406_v4, 0.0 }
  0x37   : > { %733 = vperm.xlu2 %2035, %v700_v59   ;;  %v2396_v59 = vld [vmem:[%s2218_s22 + $0xe0] sm:$0xff] }
  0x38   : > { %v1564_v62 = vsel %vm825_vm5, %v2396_v59, 0.0 }
  0x40   : > { %1872 = vmatmul.msk.bf16.gmra.mxu0 %vm3720_vm1, %v1959_v19  ;;  %1944 = vmatmul.msk.bf16.gmra.mxu1 %vm3720_vm1, %v1967_v20  ;;  %v1553_v19 = vadd.f32 %v1552_v11, %v1551_v9  ;;  %v847_v20 = vsel %vm825_vm5, %v2342_v15, 0.0  ;;  %v2411_v9 = vld [vmem:[%s2218_s22 + $0xf8] sm:$0xff] }
  0x41   : > { %1876 = vmatmul.msk.bf16.gmra.mxu2 %vm3720_vm1, %v1963_v21  ;;  %1948 = vmatmul.msk.bf16.gmra.mxu3 %vm3720_vm1, %v1971_v22  ;;  %v1554_v21 = vsel %vm825_vm5, %v2345_v17, 0.0  ;;  %v702_v22 = vsel %vm686_vm7, 1, %v3648_v14  ;;  %3731 = vst [vmem:[#allocation13_spill] sm:$0xff] %v2411_v9  ;;  %v1570_v11 = vsel %vm825_vm5, %v2411_v9, 0.0  ;;  %vm691_vm7 = vcmp.gt.f32.partialorder %v2384_v47, 0.5 }
  0x42   : > { %739 = vperm.xlu2 %2035, %v702_v22  }
  0x4a   : > { %745 = vperm.xlu2 %2035, %v704_v57  }
  0x50   : > { %1873 = vmatmul.msk.bf16.gmra.mxu0 %vm3720_vm1, %v1960_v24  ;;  %1945 = vmatmul.msk.bf16.gmra.mxu1 %vm3720_vm1, %v1968_v25  ;;  %v848_v24 = vadd.f32 %v847_v20, %v846_v12  ;;  %v2357_v25 = vld [vmem:[%s2218_s22 + $0xc0] sm:$0xff]  ;;  %v706_v12 = vsel %vm690_vm9, 1, %v3648_v14  ;;  %vm1399_vm9 = vcmp.gt.f32.partialorder %v2345_v17, 0.5 }
  0x51   : > { %1877 = vmatmul.msk.bf16.gmra.mxu2 %vm3720_vm1, %v1964_v26  ;;  %1949 = vmatmul.msk.bf16.gmra.mxu3 %vm3720_vm1, %v1972_v27  ;;  %v1555_v26 = vadd.f32 %v1554_v21, %v1553_v19  ;;  %v849_v27 = vsel %vm825_vm5, %v2354_v23, 0.0  ;;  %v1556_v30 = vsel %vm825_vm5, %v2357_v25, 0.0  ;;  %vm680_vm5 = vcmp.gt.f32.partialorder %v2273_v36, 0.5 }
  0x52   : > { %v850_v32 = vadd.f32 %v849_v27, %v848_v24  ;;  %751 = vperm.xlu2 %2035, %v706_v12  }
  0x53   : > { %v1557_v34 = vadd.f32 %v1556_v30, %v1555_v26 }
  0x54   : > { %v852_v40 = vadd.f32 %v851_v35, %v850_v32 }
  0x55   : > { %v1559_v42 = vadd.f32 %v1558_v37, %v1557_v34  ;;  %v692_v37 = vsel %vm676_vm10, 1, %v3648_v14  ;;  %vm1400_vm10 = vcmp.gt.f32.partialorder %v2357_v25, 0.5 }
  0x56   : > { %v854_v48 = vadd.f32 %v853_v43, %v852_v40 }
  0x57   : > { %v1561_v51 = vadd.f32 %v1560_v46, %v1559_v42 }
  0x58   : > { %v856_v58 = vadd.f32 %v855_v55, %v854_v48 }
  0x59   : > { %v1563_v60 = vadd.f32 %v1562_v56, %v1561_v51 }
  0x5a   : > { %857 = vadd.xlane.f32.xlu1 %v856_v58  ;;  %869 = vperm.xlu2 %2035, %v2259_v28   ;;  %v693_v28 = vsel %vm677_vm11, 1, %v3648_v14  ;;  %vm1401_vm11 = vcmp.gt.f32.partialorder %v2367_v33, 0.5 }
  0x5b   : > { %v1565_v0 = vadd.f32 %v1564_v62, %v1563_v60 }
  0x5d   : > { %v1567_v5 = vadd.f32 %v1566_v3, %v1565_v0 }
  0x5f   : > { %v1569_v10 = vadd.f32 %v1568_v7, %v1567_v5 }
  0x61   : > { %v1571_v19 = vadd.f32 %v1570_v11, %v1569_v10 }
  0x63   : > { %1572 = vadd.xlane.f32.xlu1 %v1571_v19 }
  0x7c   : > { %709 = vperm.xlu1 %2037, %v692_v37  }
  0x84   : > { %712 = vperm.xlu1 %2037, %v693_v28  }
  0x9d   : > { %v2417_v20 = vpop.f32.mrf.mxu0  ;;  %v2419_v21 = vpop.f32.mrf.mxu1 }
  0x9e   : > { %3732 = vst [vmem:[#allocation14_spill] sm:$0xff] %v2417_v20  ;;  %v1205_v48 = vmul.f32 %v2419_v21, %v2419_v21  ;;  %v1164_v55 = vsel %vm3720_vm1, %v2419_v21, 0.0  ;;  %v489_v37 = vmul.f32 %v2417_v20, %v2417_v20 }
  0x9f   : > { %3733 = vst [vmem:[#allocation15_spill] sm:$0xff] %v2419_v21 }
  0xa0   : > { %v1221_v0 = vsel %vm3720_vm1, %v1205_v48, 0.0 }
  0xa4   : > { %v2422_v22 = vpop.f32.mrf.mxu2  ;;  %v2424_v24 = vpop.f32.mrf.mxu3 }
  0xa5   : > { %3734 = vst [vmem:[#allocation16_spill] sm:$0xff] %v2422_v22  ;;  %v2426_v26 = vpop.f32.mrf.mxu0  ;;  %v2428_v27 = vpop.f32.mrf.mxu1 }
  0xa6   : > { %3735 = vst [vmem:[#allocation17_spill] sm:$0xff] %v2424_v24  ;;  %v1206_v51 = vmul.f32 %v2428_v27, %v2428_v27  ;;  %v1165_v56 = vsel %vm3720_vm1, %v2428_v27, 0.0  ;;  %v490_v28 = vmul.f32 %v2426_v26, %v2426_v26 }
  0xa7   : > { %3736 = vst [vmem:[#allocation18_spill] sm:$0xff] %v2426_v26  ;;  %v1166_v7 = vadd.f32 %v1165_v56, %v1164_v55 }
  0xa8   : > { %3737 = vst [vmem:[#allocation19_spill] sm:$0xff] %v2428_v27  ;;  %v1222_v3 = vsel %vm3720_vm1, %v1206_v51, 0.0  ;;  %v697_v51 = vsel %vm681_vm12, 1, %v3648_v14  ;;  %v449_v14 = vsel %vm3720_vm1, %v2426_v26, 0.0  ;;  %vm1404_vm12 = vcmp.gt.f32.partialorder %v2396_v59, 0.5 }
  0xa9   : > { %v1223_v11 = vadd.f32 %v1222_v3, %v1221_v0  ;;  %724 = vperm.xlu1 %2037, %v697_v51   ;;  %v497_v3 = vmul.f32 %v2422_v22, %v2422_v22  ;;  %v505_v51 = vsel %vm3720_vm1, %v489_v37, 0.0 }
  0xac   : > { %v2430_v30 = vpop.f32.mrf.mxu2  ;;  %v2432_v32 = vpop.f32.mrf.mxu3 }
  0xad   : > { %3738 = vst [vmem:[#allocation20_spill] sm:$0xff] %v2430_v30  ;;  %v2434_v34 = vpop.f32.mrf.mxu0  ;;  %v2436_v35 = vpop.f32.mrf.mxu1 }
  0xae   : > { %3739 = vst [vmem:[#allocation21_spill] sm:$0xff] %v2432_v32  ;;  %v1207_v5 = vmul.f32 %v2436_v35, %v2436_v35  ;;  %v1167_v10 = vsel %vm3720_vm1, %v2436_v35, 0.0  ;;  %v491_v26 = vmul.f32 %v2434_v34, %v2434_v34 }
  0xaf   : > { %3740 = vst [vmem:[#allocation22_spill] sm:$0xff] %v2434_v34  ;;  %v1168_v48 = vadd.f32 %v1167_v10, %v1166_v7  ;;  %v448_v10 = vsel %vm3720_vm1, %v2417_v20, 0.0  ;;  %v506_v20 = vsel %vm3720_vm1, %v490_v28, 0.0  ;;  %v451_v28 = vsel %vm3720_vm1, %v2434_v34, 0.0 }
  0xb0   : > { %3741 = vst [vmem:[#allocation23_spill] sm:$0xff] %v2436_v35  ;;  %v1224_v12 = vsel %vm3720_vm1, %v1207_v5, 0.0  ;;  %v450_v9 = vadd.f32 %v449_v14, %v448_v10  ;;  %v507_v41 = vadd.f32 %v506_v20, %v505_v51  ;;  %v3751_v10 = vmov 0  }
  0xb1   : > { %v1225_v5 = vadd.f32 %v1224_v12, %v1223_v11  ;;  %v2503_v11 = vsel %vm3720_vm1, %v2422_v22, 0.0  ;;  %v1213_v12 = vmul.f32 %v2424_v24, %v2424_v24  ;;  %v2517_v22 = vsel %vm3720_vm1, %v497_v3, 0.0 }
  0xb2   : > { %v508_v8 = vsel %vm3720_vm1, %v491_v26, 0.0  ;;  %v452_v20 = vadd.f32 %v451_v28, %v450_v9 }
  0xb3   : > { %v2528_v14 = vsel %vm3720_vm1, %v1213_v12, 0.0 }
  0xb4   : > { %v2440_v40 = vpop.f32.mrf.mxu2  ;;  %v2442_v42 = vpop.f32.mrf.mxu3 }
  0xb5   : > { %3742 = vst [vmem:[#allocation24_spill] sm:$0xff] %v2442_v42  ;;  %v2444_v43 = vpop.f32.mrf.mxu0  ;;  %v2446_v46 = vpop.f32.mrf.mxu1 }
  0xb6   : > { %3743 = vst [vmem:[#allocation25_spill] sm:$0xff] %v2444_v43  ;;  %v1208_v19 = vmul.f32 %v2446_v46, %v2446_v46  ;;  %v1169_v55 = vsel %vm3720_vm1, %v2446_v46, 0.0  ;;  %v492_v63 = vmul.f32 %v2444_v43, %v2444_v43 }
  0xb7   : > { %3744 = vst [vmem:[#allocation26_spill] sm:$0xff] %v2446_v46  ;;  %v1170_v21 = vadd.f32 %v1169_v55, %v1168_v48 }
  0xb8   : > { %v1226_v46 = vsel %vm3720_vm1, %v1208_v19, 0.0  ;;  %v2512_v19 = vsel %vm3720_vm1, %v2424_v24, 0.0  ;;  %v510_v51 = vsel %vm3720_vm1, %v492_v63, 0.0  ;;  %v1214_v63 = vmul.f32 %v2432_v32, %v2432_v32 }
  0xb9   : > { %v1227_v48 = vadd.f32 %v1226_v46, %v1225_v5  ;;  %v453_v46 = vsel %vm3720_vm1, %v2444_v43, 0.0 }
  0xba   : > { %v454_v28 = vadd.f32 %v453_v46, %v452_v20  ;;  %v465_v20 = vsel %vm3720_vm1, %v2430_v30, 0.0 }
  0xbc   : > { %v2458_v57 = vpop.f32.mrf.mxu2  ;;  %v2460_v58 = vpop.f32.mrf.mxu3 }
  0xbd   : > { %3745 = vst [vmem:[#allocation27_spill] sm:$0xff] %v2460_v58  ;;  %v2462_v60 = vpop.f32.mrf.mxu0  ;;  %v2464_v62 = vpop.f32.mrf.mxu1 }
  0xbe   : > { %3746 = vst [vmem:[#allocation28_spill] sm:$0xff] %v2462_v60  ;;  %v1209_v27 = vmul.f32 %v2464_v62, %v2464_v62  ;;  %v1171_v37 = vsel %vm3720_vm1, %v2464_v62, 0.0  ;;  %v455_v43 = vsel %vm3720_vm1, %v2462_v60, 0.0 }
  0xbf   : > { %3747 = vst [vmem:[#allocation29_spill] sm:$0xff] %v2464_v62  ;;  %v1172_v3 = vadd.f32 %v1171_v37, %v1170_v21  ;;  %v699_v62 = vsel %vm683_vm13, 1, %v3751_v10  ;;  %v498_v21 = vmul.f32 %v2430_v30, %v2430_v30 }
  0xc0   : > { %v1228_v55 = vsel %vm3720_vm1, %v1209_v27, 0.0  ;;  %v493_v27 = vmul.f32 %v2462_v60, %v2462_v60  ;;  %730 = vperm.xlu1 %2037, %v699_v62   ;;  %v509_v62 = vadd.f32 %v508_v8, %v507_v41  ;;  %v456_v8 = vadd.f32 %v455_v43, %v454_v28 }
  0xc1   : > { %v1229_v12 = vadd.f32 %v1228_v55, %v1227_v48  ;;  %v522_v43 = vsel %vm3720_vm1, %v498_v21, 0.0 }
  0xc2   : > { %v512_v4 = vsel %vm3720_vm1, %v493_v27, 0.0  ;;  %v511_v50 = vadd.f32 %v510_v51, %v509_v62 }
  0xc4   : > { %v2483_v56 = vpop.f32.mrf.mxu2  ;;  %v2485_v0 = vpop.f32.mrf.mxu3 }
  0xc5   : > { %3748 = vst [vmem:[#allocation30_spill] sm:$0xff] %v2485_v0  ;;  %v2489_v35 = vpop.f32.mrf.mxu0  ;;  %v2491_v7 = vpop.f32.mrf.mxu1 }
  0xc6   : > { %3749 = vst [vmem:[#allocation31_spill] sm:$0xff] %v2489_v35  ;;  %v1210_v24 = vmul.f32 %v2491_v7, %v2491_v7  ;;  %v1173_v5 = vsel %vm3720_vm1, %v2491_v7, 0.0  ;;  %v457_v60 = vsel %vm3720_vm1, %v2489_v35, 0.0 }
  0xc7   : > { %3750 = vst [vmem:[#allocation32_spill] sm:$0xff] %v2491_v7  ;;  %v494_v7 = vmul.f32 %v2489_v35, %v2489_v35  ;;  %v1174_v48 = vadd.f32 %v1173_v5, %v1172_v3  ;;  %v701_v5 = vsel %vm685_vm14, 1, %v3751_v10  ;;  %v513_v35 = vadd.f32 %v512_v4, %v511_v50 }
  0xc8   : > { %v1230_v38 = vsel %vm3720_vm1, %v1210_v24, 0.0  ;;  %v458_v2 = vadd.f32 %v457_v60, %v456_v8  ;;  %736 = vperm.xlu1 %2037, %v701_v5  }
  0xc9   : > { %v1231_v41 = vadd.f32 %v1230_v38, %v1229_v12  ;;  %v514_v3 = vsel %vm3720_vm1, %v494_v7, 0.0  ;;  %v1181_v38 = vsel %vm3720_vm1, %v2432_v32, 0.0  ;;  %v1238_v7 = vsel %vm3720_vm1, %v1214_v63, 0.0 }
  0xca   : > { %v515_v62 = vadd.f32 %v514_v3, %v513_v35  ;;  %v1183_v3 = vsel %vm3720_vm1, %v2442_v42, 0.0 }
  0xcc   : > { %v2538_v34 = vpop.f32.mrf.mxu3  ;;  %v2556_v55 = vpop.f32.mrf.mxu2 }
  0xcd   : > { %3752 = vst [vmem:[#allocation33_spill] sm:$0xff] %v2538_v34  ;;  %v2543_v26 = vpop.f32.mrf.mxu0  ;;  %v2545_v37 = vpop.f32.mrf.mxu1 }
  0xce   : > { %3753 = vst [vmem:[#allocation34_spill] sm:$0xff] %v2545_v37  ;;  %v1211_v9 = vmul.f32 %v2545_v37, %v2545_v37  ;;  %v495_v23 = vmul.f32 %v2543_v26, %v2543_v26  ;;  %v1175_v24 = vsel %vm3720_vm1, %v2545_v37, 0.0  ;;  %v459_v46 = vsel %vm3720_vm1, %v2543_v26, 0.0 }
  0xcf   : > { %v1176_v37 = vadd.f32 %v1175_v24, %v1174_v48  ;;  %v460_v28 = vadd.f32 %v459_v46, %v458_v2  ;;  %v1215_v2 = vmul.f32 %v2442_v42, %v2442_v42  ;;  %v2922_v42 = vld [vmem:[%s3645_s4 + $0x28] sm:$0xff] }
  0xd0   : > { %v1232_v27 = vsel %vm3720_vm1, %v1211_v9, 0.0  ;;  %v516_v51 = vsel %vm3720_vm1, %v495_v23, 0.0  ;;  %v499_v9 = vmul.f32 %v2440_v40, %v2440_v40  ;;  %3794 = vst [vmem:[#allocation41_spill] sm:$0xff] %v2922_v42 }
  0xd1   : > { %v1233_v50 = vadd.f32 %v1232_v27, %v1231_v41  ;;  %v517_v35 = vadd.f32 %v516_v51, %v515_v62  ;;  %v467_v41 = vsel %vm3720_vm1, %v2440_v40, 0.0  ;;  %v500_v62 = vmul.f32 %v2458_v57, %v2458_v57 }
  0xd4   : > { %v2578_v12 = vpop.f32.mrf.mxu3 }
  0xd5   : > { %3754 = vst [vmem:[#allocation35_spill] sm:$0xff] %v2578_v12  ;;  %v2582_v4 = vpop.f32.mrf.mxu0  ;;  %v2584_v60 = vpop.f32.mrf.mxu1 }
  0xd6   : > { %3755 = vst [vmem:[#allocation36_spill] sm:$0xff] %v2584_v60  ;;  %v461_v21 = vsel %vm3720_vm1, %v2582_v4, 0.0  ;;  %v496_v63 = vmul.f32 %v2582_v4, %v2582_v4  ;;  %v1177_v23 = vsel %vm3720_vm1, %v2584_v60, 0.0  ;;  %v1212_v48 = vmul.f32 %v2584_v60, %v2584_v60  ;;  %v2603_v60 = vpop.f32.mrf.mxu2 }
  0xd7   : > { %v462_v24 = vadd.f32 %v461_v21, %v460_v28  ;;  %v1178_v8 = vadd.f32 %v1177_v23, %v1176_v37  ;;  %v524_v37 = vsel %vm3720_vm1, %v499_v9, 0.0  ;;  %v1216_v28 = vmul.f32 %v2460_v58, %v2460_v58 }
  0xd8   : > { %v518_v46 = vsel %vm3720_vm1, %v496_v63, 0.0  ;;  %v1234_v27 = vsel %vm3720_vm1, %v1212_v48, 0.0  ;;  %v1240_v21 = vsel %vm3720_vm1, %v1215_v2, 0.0  ;;  %v501_v9 = vmul.f32 %v2483_v56, %v2483_v56 }
  0xd9   : > { %v464_v5 = vadd.f32 %v2503_v11, %v462_v24  ;;  %v519_v32 = vadd.f32 %v518_v46, %v517_v35  ;;  %v1180_v30 = vadd.f32 %v2512_v19, %v1178_v8  ;;  %v1235_v51 = vadd.f32 %v1234_v27, %v1233_v50 }
  0xda   : > { %v469_v19 = vsel %vm3720_vm1, %v2458_v57, 0.0  ;;  %v1217_v50 = vmul.f32 %v2485_v0, %v2485_v0  ;;  %v703_v48 = vsel %vm687_vm15, 1, %v3751_v10  ;;  %v471_v46 = vsel %vm3720_vm1, %v2483_v56, 0.0 }
  0xdb   : > { %v466_v63 = vadd.f32 %v465_v20, %v464_v5  ;;  %v521_v11 = vadd.f32 %v2517_v22, %v519_v32  ;;  %v1237_v23 = vadd.f32 %v2528_v14, %v1235_v51  ;;  %v1182_v8 = vadd.f32 %v1181_v38, %v1180_v30  ;;  %742 = vperm.xlu1 %2037, %v703_v48  }
  0xdc   : > { %v526_v22 = vsel %vm3720_vm1, %v500_v62, 0.0  ;;  %v1185_v32 = vsel %vm3720_vm1, %v2460_v58, 0.0  ;;  %v1242_v14 = vsel %vm3720_vm1, %v1216_v28, 0.0  ;;  %v1218_v20 = vmul.f32 %v2538_v34, %v2538_v34  ;;  %v2917_v58 = vld [vmem:[%s3645_s4 + $0x20] sm:$0xff] }
  0xdd   : > { %v468_v35 = vadd.f32 %v467_v41, %v466_v63  ;;  %v523_v24 = vadd.f32 %v522_v43, %v521_v11  ;;  %v1239_v2 = vadd.f32 %v1238_v7, %v1237_v23  ;;  %v2630_v41 = vpop.f32.mrf.mxu3  ;;  %v528_v43 = vsel %vm3720_vm1, %v501_v9, 0.0  ;;  %3793 = vst [vmem:[#allocation40_spill] sm:$0xff] %v2917_v58 }
  0xde   : > { %3756 = vst [vmem:[#allocation37_spill] sm:$0xff] %v2630_v41  ;;  %v473_v38 = vsel %vm3720_vm1, %v2556_v55, 0.0  ;;  %v1244_v7 = vsel %vm3720_vm1, %v1217_v50, 0.0  ;;  %v1219_v51 = vmul.f32 %v2578_v12, %v2578_v12  ;;  %v1184_v62 = vadd.f32 %v1183_v3, %v1182_v8 }
  0xdf   : > { %v525_v27 = vadd.f32 %v524_v37, %v523_v24  ;;  %v1241_v5 = vadd.f32 %v1240_v21, %v1239_v2  ;;  %v470_v30 = vadd.f32 %v469_v19, %v468_v35  ;;  %v502_v37 = vmul.f32 %v2556_v55, %v2556_v55  ;;  %v2644_v19 = vpop.f32.mrf.mxu2 }
  0xe0   : > { %v1246_v21 = vsel %vm3720_vm1, %v1218_v20, 0.0  ;;  %v1220_v23 = vmul.f32 %v2630_v41, %v2630_v41  ;;  %v475_v3 = vsel %vm3720_vm1, %v2603_v60, 0.0  ;;  %v1248_v35 = vsel %vm3720_vm1, %v1219_v51, 0.0 }
  0xe1   : > { %v472_v28 = vadd.f32 %v471_v46, %v470_v30  ;;  %v1243_v63 = vadd.f32 %v1242_v14, %v1241_v5  ;;  %v527_v11 = vadd.f32 %v526_v22, %v525_v27  ;;  %v705_v24 = vsel %vm689_vm0, 1, %v3751_v10 }
  0xe2   : > { %v1187_v8 = vsel %vm3720_vm1, %v2485_v0, 0.0  ;;  %v1186_v2 = vadd.f32 %v1185_v32, %v1184_v62  ;;  %v530_v20 = vsel %vm3720_vm1, %v502_v37, 0.0  ;;  %v503_v46 = vmul.f32 %v2603_v60, %v2603_v60 }
  0xe3   : > { %v474_v9 = vadd.f32 %v473_v38, %v472_v28  ;;  %v1245_v50 = vadd.f32 %v1244_v7, %v1243_v63  ;;  %v529_v48 = vadd.f32 %v528_v43, %v527_v11  ;;  %748 = vperm.xlu1 %2037, %v705_v24   ;;  %v477_v27 = vsel %vm3720_vm1, %v2644_v19, 0.0 }
  0xe4   : > { %v1250_v5 = vsel %vm3720_vm1, %v1220_v23, 0.0  ;;  %v1188_v7 = vadd.f32 %v1187_v8, %v1186_v2  ;;  %v1189_v32 = vsel %vm3720_vm1, %v2538_v34, 0.0  ;;  %v504_v62 = vmul.f32 %v2644_v19, %v2644_v19  ;;  %v2906_v34 = vld [vmem:[%s3645_s4 + $0x18] sm:$0xff] }
  0xe5   : > { %v476_v22 = vadd.f32 %v475_v3, %v474_v9  ;;  %v1247_v14 = vadd.f32 %v1246_v21, %v1245_v50  ;;  %v531_v38 = vadd.f32 %v530_v20, %v529_v48  ;;  %v532_v28 = vsel %vm3720_vm1, %v503_v46, 0.0  ;;  %v3762_v20 = vld [vmem:[#allocation6_spill] sm:$0xff]  ;;  %3792 = vst [vmem:[#allocation39_spill] sm:$0xff] %v2906_v34 }
  0xe6   : > { %v1190_v11 = vadd.f32 %v1189_v32, %v1188_v7  ;;  %v1191_v37 = vsel %vm3720_vm1, %v2578_v12, 0.0  ;;  %v534_v21 = vsel %vm3720_vm1, %v504_v62, 0.0  ;;  %v1193_v50 = vsel %vm3720_vm1, %v2630_v41, 0.0 }
  0xe7   : > { %v478_v30 = vadd.f32 %v477_v27, %v476_v22  ;;  %v1249_v43 = vadd.f32 %v1248_v35, %v1247_v14  ;;  %v533_v63 = vadd.f32 %v532_v28, %v531_v38  ;;  %v1408_v48 = vsel %vm1392_vm2, 1, %v3751_v10  ;;  %v3761_v14 = vld [vmem:[#allocation8_spill] sm:$0xff]  ;;  %v2717_v27 = vpop.permute.xlu2 %715  ;;  %v3764_v38 = vld [vmem:[#allocation11_spill] sm:$0xff] }
  0xe8   : > { %v1192_v9 = vadd.f32 %v1191_v37, %v1190_v11  ;;  %v1410_v35 = vsel %vm1394_vm4, 1, %v3751_v10  ;;  %v696_v24 = vsel %vm680_vm5, 1, %v3751_v10  ;;  %v1411_v8 = vsel %vm1395_vm6, 1, %v3751_v10  ;;  %v3765_v37 = vld [vmem:[#allocation13_spill] sm:$0xff] }
  0xe9   : > { %479 = vadd.xlane.f32.xlu0 %v478_v30  ;;  %v1251_v51 = vadd.f32 %v1250_v5, %v1249_v43  ;;  %v535_v23 = vadd.f32 %v534_v21, %v533_v63  ;;  %v707_v2 = vsel %vm691_vm7, 1, %v3751_v10  ;;  %v1416_v22 = vsel %vm1400_vm10, 1, %v3751_v10 }
  0xea   : > { %v1194_v3 = vadd.f32 %v1193_v50, %v1192_v9  ;;  %vm1398_vm0 = vcmp.gt.f32.partialorder %v3762_v20, 0.5  ;;  %vm1407_vm4 = vcmp.gt.f32.partialorder %v3765_v37, 0.5 }
  0xeb   : > { %1252 = vadd.xlane.f32.xlu2 %v1251_v51  ;;  %924 = vperm.xlu1 %2037, %v2342_v15   ;;  %v1409_v15 = vsel %vm1393_vm3, 1, %v3751_v10  ;;  %vm1405_vm3 = vcmp.gt.f32.partialorder %v3764_v38, 0.5 }
  0xec   : > { %v1421_v51 = vsel %vm1405_vm3, 1, %v3751_v10 }
  0xef   : > { %v2723_v62 = vpop.permute.xlu2 %718 }
  0xf1   : > { %536 = vadd.xlane.f32.xlu0 %v535_v23  ;;  %v1423_v23 = vsel %vm1407_vm4, 1, %v3751_v10 }
  0xf3   : > { %1425 = vperm.xlu1 %2037, %v1408_v48  }
  0xf7   : > { %v2728_v50 = vpop.permute.xlu2 %727 }
  0xf9   : > { %1195 = vadd.xlane.f32.xlu0 %v1194_v3 }
  0xfb   : > { %1428 = vperm.xlu1 %2037, %v1409_v15  }
  0xff   : > { %v2732_v3 = vpop.permute.xlu2 %733 }
 0x103   : > { %879 = vperm.xlu2 %2035, %v2225_v13   ;;  %1431 = vperm.xlu1 %2037, %v1410_v35   ;;  %v1412_v13 = vsel %vm1396_vm8, 1, %v3751_v10 }
 0x10b   : > { %889 = vperm.xlu2 %2035, %v2273_v36   ;;  %1434 = vperm.xlu1 %2037, %v1411_v8   ;;  %v1415_v36 = vsel %vm1399_vm9, 1, %v3751_v10 }
 0x10d   : > { %721 = vperm.xlu0 %2036, %v696_v24  }
 0x113   : > { %899 = vperm.xlu2 %2035, %v2238_v18   ;;  %1437 = vperm.xlu1 %2037, %v1412_v13   ;;  %v1417_v18 = vsel %vm1401_vm11, 1, %v3751_v10 }
 0x115   : > { %754 = vperm.xlu0 %2036, %v707_v2  }
 0x11b   : > { %909 = vperm.xlu2 %2035, %v2303_v53   ;;  %1446 = vperm.xlu1 %2037, %v1415_v36   ;;  %v3757_v53 = vld [vmem:[#allocation5_spill] sm:$0xff] }
 0x11c   : > { %vm1397_vm13 = vcmp.gt.f32.partialorder %v3757_v53, 0.5 }
 0x11d   : > { %874 = vperm.xlu0 %2036, %v2262_v29   ;;  %v1420_v29 = vsel %vm1404_vm12, 1, %v3751_v10 }
 0x123   : > { %919 = vperm.xlu2 %2035, %v2332_v6   ;;  %1449 = vperm.xlu1 %2037, %v1416_v22   ;;  %v3758_v6 = vld [vmem:[#allocation10_spill] sm:$0xff] }
 0x124   : > { %vm1403_vm14 = vcmp.gt.f32.partialorder %v3758_v6, 0.5 }
 0x125   : > { %884 = vperm.xlu0 %2036, %v2232_v16   ;;  %v1413_v16 = vsel %vm1397_vm13, 1, %v3751_v10 }
 0x12b   : > { %934 = vperm.xlu2 %2035, %v2364_v31   ;;  %1452 = vperm.xlu1 %2037, %v1417_v18   ;;  %v3759_v31 = vld [vmem:[#allocation7_spill] sm:$0xff] }
 0x12d   : > { %894 = vperm.xlu0 %2036, %v2278_v39   ;;  %v1419_v39 = vsel %vm1403_vm14, 1, %v3751_v10 }
 0x133   : > { %944 = vperm.xlu2 %2035, %v2384_v47   ;;  %1461 = vperm.xlu1 %2037, %v1420_v29   ;;  %v3760_v47 = vld [vmem:[#allocation12_spill] sm:$0xff] }
 0x134   : > { %vm1406_vm15 = vcmp.gt.f32.partialorder %v3760_v47, 0.5 }
 0x135   : > { %904 = vperm.xlu0 %2036, %v2300_v52   ;;  %v1422_v52 = vsel %vm1406_vm15, 1, %v3751_v10 }
 0x13b   : > { %1440 = vperm.xlu2 %2035, %v1413_v16   ;;  %1629 = vperm.xlu1 %2037, %v2367_v33   ;;  %v3763_v33 = vld [vmem:[#allocation9_spill] sm:$0xff] }
 0x13c   : > { %vm1402_vm2 = vcmp.gt.f32.partialorder %v3763_v33, 0.5 }
 0x13d   : > { %914 = vperm.xlu0 %2036, %v2322_v1   ;;  %v1414_v1 = vsel %vm1398_vm0, 1, %v3751_v10  ;;  %v1418_v46 = vsel %vm1402_vm2, 1, %v3751_v10  ;;  %v2736_v10 = vpop.permute.xlu2 %739 }
 0x143   : > { %1458 = vperm.xlu2 %2035, %v1419_v39  }
 0x145   : > { %929 = vperm.xlu0 %2036, %v3759_v31   ;;  %v2741_v15 = vpop.permute.xlu2 %745 }
 0x14b   : > { %1467 = vperm.xlu2 %2035, %v1422_v52  }
 0x14d   : > { %939 = vperm.xlu0 %2036, %v3761_v14  }
 0x153   : > { %1584 = vperm.xlu2 %2035, %v2285_v44  }
 0x155   : > { %1443 = vperm.xlu0 %2036, %v1414_v1  }
 0x15b   : > { %1594 = vperm.xlu2 %2035, %v2295_v49  }
 0x15c   : > { %v480_v5 = vpop.xlane.xlu0 %479 }
 0x15d   : > { %v481_v30 = vrot.slane %v480_v5, 4  ;;  %1455 = vperm.xlu0 %2036, %v1418_v46  }
 0x15f   : > { %v482_v43 = vadd.f32 %v481_v30, %v480_v5 }
 0x161   : > { %v483_v7 = vrot.slane %v482_v43, 2 }
 0x163   : > { %1604 = vperm.xlu2 %2035, %v2317_v61   ;;  %v484_v44 = vadd.f32 %v483_v7, %v482_v43 }
 0x164   : > { %v537_v32 = vpop.xlane.xlu0 %536 }
 0x165   : > { %v538_v28 = vrot.slane %v537_v32, 4  ;;  %1464 = vperm.xlu0 %2036, %v1421_v51   ;;  %v485_v63 = vrot.slane %v484_v44, 1 }
 0x167   : > { %v539_v11 = vadd.f32 %v538_v28, %v537_v32  ;;  %v486_v49 = vadd.f32 %v485_v63, %v484_v44 }
 0x169   : > { %v540_v21 = vrot.slane %v539_v11, 2  ;;  %1977 = vpush %v486_v49 }
 0x16b   : > { %1614 = vperm.xlu2 %2035, %v3762_v20   ;;  %v541_v9 = vadd.f32 %v540_v21, %v539_v11 }
 0x16c   : > { %v1196_v35 = vpop.xlane.xlu0 %1195 }
 0x16d   : > { %1470 = vperm.xlu0 %2036, %v1423_v23   ;;  %v542_v61 = vrot.slane %v541_v9, 1  ;;  %v1197_v24 = vrot.slane %v1196_v35, 4 }
 0x16f   : > { %v543_v48 = vadd.f32 %v542_v61, %v541_v9  ;;  %v1198_v36 = vadd.f32 %v1197_v24, %v1196_v35  ;;  %v3766_v35 = vld [vmem:[#allocation14_spill] sm:$0xff] }
 0x171   : > { %1979 = vpush %v543_v48 }
 0x173   : > { %1624 = vperm.xlu2 %2035, %v2357_v25  }
 0x175   : > { %1589 = vperm.xlu0 %2036, %v2288_v45   ;;  %v2745_v45 = vpop.permute.xlu2 %751 }
 0x17b   : > { %1639 = vperm.xlu2 %2035, %v3758_v6  }
 0x17d   : > { %1599 = vperm.xlu0 %2036, %v2306_v54   ;;  %v2750_v54 = vpop.permute.xlu2 %869 }
 0x17f   : > { %v2756_v44 = vpop.permute.xlu0 %721 }
 0x183   : > { %1649 = vperm.xlu2 %2035, %v3764_v38  }
 0x185   : > { %1609 = vperm.xlu0 %2036, %v3757_v53   ;;  %v1199_v53 = vrot.slane %v1198_v36, 2 }
 0x187   : > { %v2760_v28 = vpop.permute.xlu0 %754 }
 0x188   : > { %vm771_vm8 = vcmp.eq.s32.totalorder %v2760_v28, 1 }
 0x18b   : > { %1659 = vperm.xlu2 %2035, %v3765_v37  }
 0x18d   : > { %1619 = vperm.xlu0 %2036, %v2345_v17   ;;  %v858_v17 = vpop.xlane.xlu1 %857 }
 0x18e   : > { %v859_v25 = vrot.slane %v858_v17, 4 }
 0x18f   : > { %v2764_v11 = vpop.permute.xlu0 %874 }
 0x190   : > { %v860_v13 = vadd.f32 %v859_v25, %v858_v17 }
 0x192   : > { %v861_v18 = vrot.slane %v860_v13, 2 }
 0x194   : > { %v862_v31 = vadd.f32 %v861_v18, %v860_v13  ;;  %v3768_v13 = vld [vmem:[#allocation22_spill] sm:$0xff] }
 0x195   : > { %1634 = vperm.xlu0 %2036, %v3763_v33   ;;  %v1573_v51 = vpop.xlane.xlu1 %1572 }
 0x196   : > { %v863_v1 = vrot.slane %v862_v31, 1  ;;  %v1574_v23 = vrot.slane %v1573_v51, 4 }
 0x197   : > { %v2770_v21 = vpop.permute.xlu0 %884 }
 0x198   : > { %v864_v43 = vadd.f32 %v863_v1, %v862_v31  ;;  %v1575_v61 = vadd.f32 %v1574_v23, %v1573_v51 }
 0x19a   : > { %s1978_s23 = spop %1977  ;;  %v1576_v17 = vrot.slane %v1575_v61, 2 }
 0x19b   : > { %s2748_s25 = smul.f32 0.0026041667, %s1978_s23 }
 0x19d   : > { %1644 = vperm.xlu0 %2036, %v2396_v59   ;;  %s546_s26 = smul.f32 %s2748_s25, %s2748_s25  ;;  %v1253_v59 = vpop.xlane.xlu2 %1252  ;;  %v2758_v32 = vpop.permute.xlu1 %709  ;;  %v549_v48 = vstv %s2748_s25 }
 0x19e   : > { %v1254_v8 = vrot.slane %v1253_v59, 4  ;;  %v557_v31 = vsub.f32 %v2582_v4, %v549_v48  ;;  %v565_v4 = vsub.f32 %v2644_v19, %v549_v48  ;;  %v2807_v19 = vld [vmem:[%s3644_s3 + $0x8] sm:$0xff] }
 0x19f   : > { %v2778_v24 = vpop.permute.xlu0 %894  ;;  %3775 = vst [vmem:[#allocation10_spill] sm:$0xff] %v2807_v19 }
 0x1a0   : > { %v1255_v22 = vadd.f32 %v1254_v8, %v1253_v59  ;;  %v550_v59 = vsub.f32 %v3766_v35, %v549_v48  ;;  %v3767_v8 = vld [vmem:[#allocation18_spill] sm:$0xff] }
 0x1a2   : > { %s1980_s30 = spop %1979  ;;  %v1256_v16 = vrot.slane %v1255_v22, 2 }
 0x1a3   : > { %s545_s6 = smul.f32 0.0026041667, %s1980_s30  ;;  %s2112_s30 = smov 0.1  }
 0x1a4   : > { %v1257_v14 = vadd.f32 %v1256_v16, %v1255_v22  ;;  %v3769_v22 = vld [vmem:[#allocation25_spill] sm:$0xff]  ;;  %v3771_v16 = vld [vmem:[#allocation31_spill] sm:$0xff] }
 0x1a5   : > { %s547_s8 = ssub.f32 %s545_s6, %s546_s26  ;;  %1654 = vperm.xlu0 %2036, %v3760_v47   ;;  %v1200_v47 = vadd.f32 %v1199_v53, %v1198_v36  ;;  %v2762_v63 = vpop.permute.xlu1 %712  ;;  %v2766_v49 = vpop.permute.xlu2 %879  ;;  %v552_v36 = vsub.f32 %v3768_v13, %v549_v48  ;;  %v553_v18 = vsub.f32 %v3769_v22, %v549_v48 }
 0x1a6   : > { %v1258_v5 = vrot.slane %v1257_v14, 1 }
 0x1a7   : > { %s548_s10 = smax.f32 %s2111_s9, %s547_s8  ;;  %v1201_v33 = vrot.slane %v1200_v47, 1 }
 0x1a8   : > { %s566_s11 = sadd.f32 1e-05, %s548_s10  ;;  %v1259_v7 = vadd.f32 %v1258_v5, %v1257_v14  ;;  %v562_v5 = vsub.f32 %v2483_v56, %v549_v48 }
 0x1a9   : > { %v1202_v38 = vadd.f32 %v1201_v33, %v1200_v47  ;;  %v3772_v47 = vld [vmem:[#allocation16_spill] sm:$0xff]  ;;  %v560_v33 = vsub.f32 %v2440_v40, %v549_v48 }
 0x1aa   : > { %v567_v2 = vstv %s566_s11 }
 0x1ab   : > { %2038 = vrsqrt.f32 %v567_v2  ;;  %vm574_vm6 = vweird.f32 %v567_v2 }
 0x1ad   : > { %v2768_v37 = vpop.permute.xlu1 %724  ;;  %v2772_v9 = vpop.permute.xlu2 %889 }
 0x1b1   : > { %v2039_v29 = vpop.eup %2038 }
 0x1b2   : > { %v569_v6 = vmul.f32 %v2039_v29, %v567_v2  ;;  %vm575_vm5 = vweird.f32 %v2039_v29  ;;  %v551_v2 = vsub.f32 %v3767_v8, %v549_v48 }
 0x1b3   : > { %vm576_vm7 = vmor %vm574_vm6, %vm575_vm5 }
 0x1b4   : > { %v570_v39 = vmul.f32 %v2039_v29, %v569_v6  ;;  %v555_v6 = vsub.f32 %v3771_v16, %v549_v48 }
 0x1b5   : > { %v2775_v25 = vpop.permute.xlu1 %730  ;;  %v2788_v14 = vpop.permute.xlu2 %899 }
 0x1b6   : > { %v571_v52 = vmul.f32 0.5, %v570_v39  ;;  %v556_v39 = vsub.f32 %v2543_v26, %v549_v48  ;;  %v564_v26 = vsub.f32 %v2603_v60, %v549_v48  ;;  %v2802_v60 = vld [vmem:[%s3644_s3] sm:$0xff] }
 0x1b7   : > { %3774 = vst [vmem:[#allocation5_spill] sm:$0xff] %v2802_v60 }
 0x1b8   : > { %v572_v20 = vsub.f32 1.5, %v571_v52  ;;  %v558_v52 = vsub.f32 %v3772_v47, %v549_v48 }
 0x1ba   : > { %v573_v46 = vmul.f32 %v2039_v29, %v572_v20  ;;  %v3773_v20 = vld [vmem:[#allocation20_spill] sm:$0xff] }
 0x1bb   : > { %v559_v1 = vsub.f32 %v3773_v20, %v549_v48 }
 0x1bc   : > { %v577_v30 = vsel %vm576_vm7, %v2039_v29, %v573_v46  ;;  %v3770_v29 = vld [vmem:[#allocation28_spill] sm:$0xff]  ;;  %v561_v46 = vsub.f32 %v2458_v57, %v549_v48 }
 0x1bd   : > { %1981 = vpush %v577_v30  ;;  %v554_v53 = vsub.f32 %v3770_v29, %v549_v48  ;;  %v2797_v41 = vpop.permute.xlu1 %736 }
 0x1be   : > { %1983 = vpush %v864_v43  ;;  %v563_v43 = vsub.f32 %v2556_v55, %v549_v48  ;;  %v2809_v48 = vpop.permute.xlu0 %904 }
 0x1bf   : > { %1985 = vpush %v1202_v38 }
 0x1c0   : > { %1987 = vpush %v1259_v7 }
 0x1ee   : > { %s1982_s12 = spop %1981 }
 0x1ef   : > { %v579_v30 = vstv %s1982_s12  ;;  %s2912_s6 = spop %1983 }
 0x1f0   : > { %v580_v38 = vmul.f32 %v579_v30, %v550_v59  ;;  %v581_v7 = vmul.f32 %v579_v30, %v551_v2  ;;  %v582_v51 = vmul.f32 %v579_v30, %v552_v36  ;;  %v583_v23 = vmul.f32 %v579_v30, %v553_v18  ;;  %v2814_v59 = vld [vmem:[%s3644_s3 + $0x10] sm:$0xff]  ;;  %v2819_v2 = vld [vmem:[%s3644_s3 + $0x18] sm:$0xff]  ;;  %v2824_v36 = vld [vmem:[%s3644_s3 + $0x20] sm:$0xff]  ;;  %s1986_s26 = spop %1985  ;;  %s866_s8 = smax.f32 %s2112_s30, %s2912_s6 }
 0x1f1   : > { %v584_v35 = vmul.f32 %v579_v30, %v554_v53  ;;  %v585_v8 = vmul.f32 %v579_v30, %v555_v6  ;;  %v586_v13 = vmul.f32 %v579_v30, %v556_v39  ;;  %v587_v22 = vmul.f32 %v579_v30, %v557_v31  ;;  %3776 = vst [vmem:[#allocation7_spill] sm:$0xff] %v2819_v2  ;;  %v2831_v53 = vld [vmem:[%s3644_s3 + $0x28] sm:$0xff]  ;;  %v2836_v6 = vld [vmem:[%s3644_s3 + $0x30] sm:$0xff]  ;;  %v2841_v39 = vld [vmem:[%s3644_s3 + $0x38] sm:$0xff]  ;;  %v2843_v31 = vpop.permute.xlu2 %909  ;;  %s3011_s25 = smul.f32 0.0026041667, %s1986_s26  ;;  %s1988_s26 = spop %1987 }
 0x1f2   : > { %v588_v40 = vmul.f32 %v579_v30, %v558_v52  ;;  %v589_v29 = vmul.f32 %v579_v30, %v559_v1  ;;  %v590_v57 = vmul.f32 %v579_v30, %v560_v33  ;;  %v591_v16 = vmul.f32 %v579_v30, %v561_v46  ;;  %3777 = vst [vmem:[#allocation12_spill] sm:$0xff] %v2824_v36  ;;  %v2858_v52 = vld [vmem:[%s3644_s3 + $0x50] sm:$0xff]  ;;  %v2863_v1 = vld [vmem:[%s3644_s3 + $0x58] sm:$0xff]  ;;  %v2868_v33 = vld [vmem:[%s3644_s3 + $0x60] sm:$0xff]  ;;  %s1261_s11 = smul.f32 0.0026041667, %s1988_s26 }
 0x1f3   : > { %v592_v56 = vmul.f32 %v579_v30, %v562_v5  ;;  %v593_v47 = vmul.f32 %v579_v30, %v563_v43  ;;  %v594_v20 = vmul.f32 %v579_v30, %v564_v26  ;;  %v595_v55 = vmul.f32 %v579_v30, %v565_v4  ;;  %3778 = vst [vmem:[#allocation8_spill] sm:$0xff] %v2831_v53  ;;  %v2873_v46 = vld [vmem:[%s3644_s3 + $0x68] sm:$0xff]  ;;  %v2879_v30 = vld [vmem:[%s3644_s3 + $0x70] sm:$0xff]  ;;  %v2884_v43 = vld [vmem:[%s3644_s3 + $0x78] sm:$0xff]  ;;  %s1262_s10 = smul.f32 %s3011_s25, %s3011_s25  ;;  %s238_s26 = scalar_lea.vmem [#allocation2], %s1827_s17 }
 0x1f4   : > { %v2826_v18 = vadd.f32 %v1576_v17, %v1575_v61  ;;  %3779 = vst [vmem:[#allocation6_spill] sm:$0xff] %v2836_v6  ;;  %v2848_v61 = vld [vmem:[%s3644_s3 + $0x40] sm:$0xff]  ;;  %v2853_v17 = vld [vmem:[%s3644_s3 + $0x48] sm:$0xff]  ;;  %v596_v5 = vmul.f32 %v580_v38, %v2802_v60  ;;  %v597_v4 = vmul.f32 %v581_v7, %v2807_v19  ;;  %v2901_v60 = vld [vmem:[%s3645_s4 + $0x10] sm:$0xff]  ;;  %v598_v0 = vmul.f32 %v582_v51, %v2814_v59 }
 0x1f5   : > { %3780 = vst [vmem:[#allocation9_spill] sm:$0xff] %v2841_v39  ;;  %v2889_v26 = vld [vmem:[%s3645_s4] sm:$0xff]  ;;  %v2896_v38 = vld [vmem:[%s3645_s4 + $0x8] sm:$0xff]  ;;  %v599_v7 = vmul.f32 %v583_v23, %v2819_v2  ;;  %v600_v12 = vmul.f32 %v584_v35, %v2824_v36  ;;  %v601_v19 = vmul.f32 %v585_v8, %v2831_v53  ;;  %v2927_v51 = vld [vmem:[%s3645_s4 + $0x30] sm:$0xff]  ;;  %v602_v23 = vmul.f32 %v586_v13, %v2836_v6  ;;  %s1263_s6 = ssub.f32 %s1261_s11, %s1262_s10 }
 0x1f6   : > { %3781 = vst [vmem:[#allocation11_spill] sm:$0xff] %v2848_v61  ;;  %v603_v35 = vmul.f32 %v587_v22, %v2841_v39  ;;  %v604_v8 = vmul.f32 %v588_v40, %v2848_v61  ;;  %v605_v53 = vmul.f32 %v589_v29, %v2853_v17  ;;  %v2936_v36 = vld [vmem:[%s3645_s4 + $0x38] sm:$0xff]  ;;  %v2941_v2 = vld [vmem:[%s3645_s4 + $0x40] sm:$0xff]  ;;  %v2946_v13 = vld [vmem:[%s3645_s4 + $0x48] sm:$0xff]  ;;  %v606_v22 = vmul.f32 %v590_v57, %v2858_v52 }
 0x1f7   : > { %3782 = vst [vmem:[#allocation13_spill] sm:$0xff] %v2853_v17  ;;  %v607_v40 = vmul.f32 %v591_v16, %v2863_v1  ;;  %v611_v29 = vmul.f32 %v595_v55, %v2884_v43  ;;  %v612_v17 = vadd.f32 %v596_v5, %v2889_v26  ;;  %v2955_v61 = vld [vmem:[%s3645_s4 + $0x50] sm:$0xff]  ;;  %v2960_v39 = vld [vmem:[%s3645_s4 + $0x58] sm:$0xff]  ;;  %v608_v16 = vmul.f32 %v592_v56, %v2868_v33  ;;  %s3091_s12 = smax.f32 %s2111_s9, %s1263_s6 }
 0x1f8   : > { %3783 = vst [vmem:[#allocation14_spill] sm:$0xff] %v2858_v52  ;;  %v2965_v57 = vld [vmem:[%s3645_s4 + $0x78] sm:$0xff]  ;;  %v609_v55 = vmul.f32 %v593_v47, %v2873_v46  ;;  %v610_v5 = vmul.f32 %v594_v20, %v2879_v30  ;;  %v2981_v52 = vld [vmem:[%s3645_s4 + $0x68] sm:$0xff]  ;;  %v614_v56 = vadd.f32 %v598_v0, %v2901_v60  ;;  %v615_v47 = vadd.f32 %v599_v7, %v2906_v34  ;;  %s1282_s9 = sadd.f32 1e-05, %s3091_s12 }
 0x1f9   : > { %3784 = vst [vmem:[#allocation18_spill] sm:$0xff] %v2863_v1  ;;  %v2976_v1 = vld [vmem:[%s3645_s4 + $0x60] sm:$0xff]  ;;  %v2986_v20 = vadd.f32 %v600_v12, %v2917_v58  ;;  %v3003_v0 = vadd.f32 %v603_v35, %v2936_v36  ;;  %v3006_v12 = vadd.f32 %v604_v8, %v2941_v2  ;;  %v3014_v7 = vadd.f32 %v606_v22, %v2955_v61  ;;  %v3020_v35 = vpop.permute.xlu2 %919 }
 0x1fa   : > { %3785 = vst [vmem:[#allocation22_spill] sm:$0xff] %v2868_v33  ;;  %v3023_v8 = vadd.f32 %v608_v16, %v2976_v1  ;;  %vm628_vm9 = vcmp.ge.f32.partialorder %v612_v17, 0.0  ;;  %vm630_vm11 = vcmp.ge.f32.partialorder %v614_v56, 0.0  ;;  %vm631_vm12 = vcmp.ge.f32.partialorder %v615_v47, 0.0 }
 0x1fb   : > { %3786 = vst [vmem:[#allocation25_spill] sm:$0xff] %v2873_v46  ;;  %v3000_v46 = vadd.f32 %v602_v23, %v2927_v51  ;;  %v627_v23 = vadd.f32 %v611_v29, %v2965_v57  ;;  %vm632_vm13 = vcmp.ge.f32.partialorder %v2986_v20, 0.0  ;;  %vm635_vm0 = vcmp.ge.f32.partialorder %v3003_v0, 0.0 }
 0x1fc   : > { %3787 = vst [vmem:[#allocation28_spill] sm:$0xff] %v2879_v30  ;;  %v2997_v30 = vld [vmem:[%s3645_s4 + $0x70] sm:$0xff]  ;;  %vm636_vm3 = vcmp.ge.f32.partialorder %v3006_v12, 0.0  ;;  %vm638_vm5 = vcmp.ge.f32.partialorder %v3014_v7, 0.0  ;;  %vm640_vm7 = vcmp.ge.f32.partialorder %v3023_v8, 0.0 }
 0x1fd   : > { %3788 = vst [vmem:[#allocation31_spill] sm:$0xff] %v2884_v43  ;;  %v2971_v43 = vpop.permute.xlu1 %742  ;;  %v3029_v22 = vadd.f32 %v610_v5, %v2997_v30  ;;  %vm634_vm15 = vcmp.ge.f32.partialorder %v3000_v46, 0.0  ;;  %vm643_vm2 = vcmp.ge.f32.partialorder %v627_v23, 0.0  ;;  %v659_v29 = vmul.f32 0.2, %v627_v23 }
 0x1fe   : > { %3789 = vst [vmem:[#allocation16_spill] sm:$0xff] %v2889_v26  ;;  %v613_v26 = vadd.f32 %v597_v4, %v2896_v38  ;;  %v2989_v4 = vadd.f32 %v601_v19, %v2922_v42  ;;  %v3009_v19 = vadd.f32 %v605_v53, %v2946_v13  ;;  %v3017_v42 = vadd.f32 %v607_v40, %v2960_v39 }
 0x1ff   : > { %3790 = vst [vmem:[#allocation20_spill] sm:$0xff] %v2896_v38  ;;  %v2992_v38 = vpop.permute.xlu0 %914  ;;  %v3026_v53 = vadd.f32 %v609_v55, %v2981_v52  ;;  %v646_v40 = vmul.f32 0.2, %v614_v56  ;;  %v647_v55 = vmul.f32 0.2, %v615_v47 }
 0x200   : > { %3791 = vst [vmem:[#allocation38_spill] sm:$0xff] %v2901_v60  ;;  %vm629_vm10 = vcmp.ge.f32.partialorder %v613_v26, 0.0  ;;  %vm633_vm14 = vcmp.ge.f32.partialorder %v2989_v4, 0.0  ;;  %vm637_vm4 = vcmp.ge.f32.partialorder %v3009_v19, 0.0  ;;  %vm639_vm6 = vcmp.ge.f32.partialorder %v3017_v42, 0.0 }
 0x201   : > { %3795 = vst [vmem:[#allocation42_spill] sm:$0xff] %v2927_v51  ;;  %v644_v51 = vmul.f32 0.2, %v612_v17  ;;  %v653_v28 = vmul.f32 0.2, %v3009_v19 }
 0x202   : > { %3796 = vst [vmem:[#allocation43_spill] sm:$0xff] %v2936_v36  ;;  %v655_v36 = vmul.f32 0.2, %v3017_v42  ;;  %v656_v58 = vmul.f32 0.2, %v3023_v8 }
 0x203   : > { %3797 = vst [vmem:[#allocation44_spill] sm:$0xff] %v2941_v2  ;;  %v3040_v16 = vsel %vm628_vm9, %v612_v17, %v644_v51  ;;  %v648_v17 = vmul.f32 0.2, %v2986_v20  ;;  %v3054_v51 = vsel %vm630_vm11, %v614_v56, %v646_v40  ;;  %vm641_vm9 = vcmp.ge.f32.partialorder %v3026_v53, 0.0 }
 0x204   : > { %3798 = vst [vmem:[#allocation45_spill] sm:$0xff] %v2946_v13  ;;  %v645_v13 = vmul.f32 0.2, %v613_v26  ;;  %v649_v40 = vmul.f32 0.2, %v2989_v4  ;;  %vm757_vm11 = vcmp.eq.s32.totalorder %v2762_v63, 1 }
 0x205   : > { %3799 = vst [vmem:[#allocation46_spill] sm:$0xff] %v2955_v61  ;;  %v949_v61 = vmul.f32 %v2766_v49, %v3054_v51  ;;  %v654_v2 = vmul.f32 0.2, %v3014_v7  ;;  %v657_v49 = vmul.f32 0.2, %v3026_v53 }
 0x206   : > { %3800 = vst [vmem:[#allocation47_spill] sm:$0xff] %v2960_v39  ;;  %v3045_v5 = vsel %vm629_vm10, %v613_v26, %v645_v13  ;;  %v947_v26 = vmul.f32 %v2750_v54, %v3040_v16  ;;  %v3060_v13 = vpop.permute.xlu1 %748  ;;  %vm642_vm10 = vcmp.ge.f32.partialorder %v3029_v22, 0.0  ;;  %v650_v54 = vmul.f32 0.2, %v3000_v46 }
 0x207   : > { %3801 = vst [vmem:[#allocation48_spill] sm:$0xff] %v2965_v57  ;;  %v3050_v57 = vstv %s866_s8  ;;  %v948_v56 = vmul.f32 %v2764_v11, %v3045_v5  ;;  %v652_v39 = vmul.f32 0.2, %v3006_v12  ;;  %v935_v11 = vpop.permute.xlu2 %934  ;;  %v658_v33 = vmul.f32 0.2, %v3029_v22 }
 0x208   : > { %3802 = vst [vmem:[#allocation49_spill] sm:$0xff] %v2976_v1  ;;  %2040 = vrcp.f32 %v3050_v57  ;;  %v651_v1 = vmul.f32 0.2, %v3003_v0 }
 0x209   : > { %3803 = vst [vmem:[#allocation50_spill] sm:$0xff] %v2981_v52  ;;  %v964_v60 = vsel %vm3720_vm1, %v948_v56, 0.0  ;;  %v966_v56 = vsel %vm3720_vm1, %v949_v61, 0.0  ;;  %v3145_v61 = vsel %vm640_vm7, %v3023_v8, %v656_v58  ;;  %vm767_vm7 = vcmp.eq.s32.totalorder %v2971_v43, 1 }
 0x20a   : > { %3804 = vst [vmem:[#allocation51_spill] sm:$0xff] %v2997_v30  ;;  %v3056_v30 = vsel %vm643_vm2, %v627_v23, %v659_v29  ;;  %v930_v23 = vpop.permute.xlu0 %929  ;;  %v3074_v29 = vsel %vm631_vm12, %v615_v47, %v647_v55  ;;  %v3087_v47 = vsel %vm632_vm13, %v2986_v20, %v648_v17  ;;  %v963_v55 = vsel %vm3720_vm1, %v947_v26, 0.0 }
 0x20b   : > { %v3067_v52 = vsel %vm771_vm8, %v3056_v30, -inf  ;;  %v950_v34 = vmul.f32 %v2770_v21, %v3074_v29  ;;  %v3102_v20 = vsel %vm633_vm14, %v2989_v4, %v649_v40  ;;  %v3107_v17 = vsel %vm634_vm15, %v3000_v46, %v650_v54 }
 0x20c   : > { %v965_v26 = vadd.f32 %v964_v60, %v963_v55  ;;  %v3112_v6 = vsel %vm635_vm0, %v3003_v0, %v651_v1  ;;  %v3117_v21 = vsel %vm636_vm3, %v3006_v12, %v652_v39  ;;  %v951_v4 = vmul.f32 %v2772_v9, %v3087_v47 }
 0x20d   : > { %v3128_v60 = vsel %vm637_vm4, %v3009_v19, %v653_v28  ;;  %v3133_v1 = vsel %vm638_vm5, %v3014_v7, %v654_v2  ;;  %v3138_v39 = vsel %vm639_vm6, %v3017_v42, %v655_v36  ;;  %vm756_vm8 = vcmp.eq.s32.totalorder %v2758_v32, 1 }
 0x20e   : > { %v3123_v40 = vpop.eup %2040  ;;  %v967_v9 = vadd.f32 %v966_v56, %v965_v26  ;;  %v3150_v2 = vsel %vm641_vm9, %v3026_v53, %v657_v49  ;;  %v952_v46 = vmul.f32 %v2778_v24, %v3102_v20  ;;  %v968_v42 = vsel %vm3720_vm1, %v950_v34, 0.0  ;;  %v925_v34 = vpop.permute.xlu1 %924 }
 0x20f   : > { %vm758_vm12 = vcmp.eq.s32.totalorder %v2717_v27, 1  ;;  %vm759_vm13 = vcmp.eq.s32.totalorder %v2723_v62, 1  ;;  %v3160_v36 = vsel %vm642_vm10, %v3029_v22, %v658_v33  ;;  %v953_v58 = vmul.f32 %v2788_v14, %v3107_v17 }
 0x210   : > { %v954_v0 = vmul.f32 %v2809_v48, %v3112_v6  ;;  %v969_v12 = vadd.f32 %v968_v42, %v967_v9  ;;  %vm762_vm14 = vcmp.eq.s32.totalorder %v2728_v50, 1  ;;  %vm761_vm15 = vcmp.eq.s32.totalorder %v2768_v37, 1 }
 0x211   : > { %v955_v24 = vmul.f32 %v2843_v31, %v3117_v21  ;;  %v956_v19 = vmul.f32 %v2992_v38, %v3128_v60  ;;  %v970_v33 = vsel %vm3720_vm1, %v951_v4, 0.0  ;;  %v3173_v7 = vstv %s1282_s9  ;;  %s2066_s9 = scalar_lea.hbm %s3646_s5, 4 }
 0x212   : > { %vm764_vm0 = vcmp.eq.s32.totalorder %v2732_v3, 1  ;;  %vm763_vm2 = vcmp.eq.s32.totalorder %v2775_v25, 1  ;;  %vm765_vm3 = vcmp.eq.s32.totalorder %v2797_v41, 1  ;;  %v940_v14 = vpop.permute.xlu0 %939  ;;  %v957_v48 = vmul.f32 %v3020_v35, %v3133_v1  ;;  %v945_v35 = vpop.permute.xlu2 %944 }
 0x213   : > { %v958_v8 = vmul.f32 %v925_v34, %v3138_v39  ;;  %v971_v31 = vadd.f32 %v970_v33, %v969_v12  ;;  %2042 = vrsqrt.f32 %v3173_v7  ;;  %vm766_vm4 = vcmp.eq.s32.totalorder %v2736_v10, 1 }
 0x214   : > { %vm768_vm5 = vcmp.eq.s32.totalorder %v2741_v15, 1  ;;  %v959_v38 = vmul.f32 %v930_v23, %v3145_v61  ;;  %v960_v53 = vmul.f32 %v935_v11, %v3150_v2  ;;  %v961_v22 = vmul.f32 %v940_v14, %v3160_v36 }
 0x215   : > { %v972_v54 = vsel %vm3720_vm1, %v952_v46, 0.0  ;;  %vm769_vm9 = vcmp.eq.s32.totalorder %v3060_v13, 1  ;;  %vm760_vm10 = vcmp.eq.s32.totalorder %v2756_v44, 1  ;;  %v3193_v55 = vmul.f32 %v945_v35, %v3056_v30 }
 0x216   : > { %v973_v28 = vadd.f32 %v972_v54, %v971_v31  ;;  %v974_v23 = vsel %vm3720_vm1, %v953_v58, 0.0  ;;  %v976_v11 = vsel %vm3720_vm1, %v954_v0, 0.0  ;;  %v3805_v49 = vrot.slane %v2826_v18, 1 }
 0x217   : > { %v978_v56 = vsel %vm3720_vm1, %v955_v24, 0.0  ;;  %v980_v9 = vsel %vm3720_vm1, %v956_v19, 0.0  ;;  %v982_v46 = vsel %vm3720_vm1, %v957_v48, 0.0  ;;  %v984_v42 = vsel %vm3720_vm1, %v958_v8, 0.0 }
 0x218   : > { %v3200_v26 = vadd.f32 %v3805_v49, %v2826_v18  ;;  %v975_v4 = vadd.f32 %v974_v23, %v973_v28  ;;  %v986_v30 = vsel %vm3720_vm1, %v959_v38, 0.0  ;;  %v988_v58 = vsel %vm3720_vm1, %v960_v53, 0.0 }
 0x219   : > { %v3209_v0 = vsel %vm3720_vm1, %v961_v22, 0.0  ;;  %v2043_v12 = vpop.eup %2042  ;;  %v3213_v18 = vmul.f32 %v3123_v40, %v3050_v57  ;;  %v772_v24 = vsel %vm756_vm8, %v3040_v16, -inf  ;;  %v773_v19 = vsel %vm757_vm11, %v3045_v5, -inf }
 0x21a   : > { %v977_v34 = vadd.f32 %v976_v11, %v975_v4  ;;  %v1285_v33 = vmul.f32 %v2043_v12, %v3173_v7  ;;  %vm1290_vm6 = vweird.f32 %v3173_v7  ;;  %vm1291_vm1 = vweird.f32 %v2043_v12 }
 0x21b   : > { %v774_v14 = vsel %vm758_vm12, %v3054_v51, -inf  ;;  %v775_v48 = vsel %vm759_vm13, %v3074_v29, -inf  ;;  %v776_v32 = vsel %vm760_vm10, %v3087_v47, -inf  ;;  %v777_v63 = vsel %vm761_vm15, %v3102_v20, -inf  ;;  %v3247_v51 = vpop.permute.xlu1 %1425  ;;  %v3265_v47 = vpop.permute.xlu0 %1443 }
 0x21c   : > { %v979_v8 = vadd.f32 %v978_v56, %v977_v34  ;;  %v778_v16 = vsel %vm762_vm14, %v3107_v17, -inf  ;;  %v1286_v5 = vmul.f32 %v2043_v12, %v1285_v33  ;;  %v779_v27 = vsel %vm763_vm2, %v3112_v6, -inf }
 0x21d   : > { %v780_v62 = vsel %vm764_vm0, %v3117_v21, -inf  ;;  %v781_v44 = vsel %vm765_vm3, %v3128_v60, -inf  ;;  %v782_v50 = vsel %vm766_vm4, %v3133_v1, -inf  ;;  %v783_v25 = vsel %vm767_vm7, %v3138_v39, -inf  ;;  %vm1292_vm7 = vmor %vm1290_vm6, %vm1291_vm1 }
 0x21e   : > { %v981_v37 = vadd.f32 %v980_v9, %v979_v8  ;;  %v784_v3 = vsel %vm768_vm5, %v3145_v61, -inf  ;;  %v1287_v6 = vmul.f32 0.5, %v1286_v5  ;;  %v785_v41 = vsel %vm769_vm9, %v3150_v2, -inf }
 0x21f   : > { %vm3806_vm8 = vcmp.eq.s32.totalorder %v2745_v45, 1  ;;  %vm3807_vm11 = vcmask 195584  }
 0x220   : > { %v786_v29 = vsel %vm3806_vm8, %v3160_v36, -inf  ;;  %v788_v10 = vsel %vm3807_vm11, %v772_v24, -inf  ;;  %v983_v20 = vadd.f32 %v982_v46, %v981_v37  ;;  %vm3808_vm12 = vmmov %vm3807_vm11  ;;  %v1288_v21 = vsub.f32 1.5, %v1287_v6 }
 0x221   : > { %v789_v43 = vsel %vm3808_vm12, %v773_v19, -inf  ;;  %vm3809_vm13 = vmmov %vm3807_vm11  ;;  %v1012_v37 = vand.u32 2147483648, %v3050_v57 }
 0x222   : > { %v790_v17 = vsel %vm3809_vm13, %v774_v14, -inf  ;;  %vm3810_vm14 = vmmov %vm3807_vm11  ;;  %v985_v45 = vadd.f32 %v984_v42, %v983_v20  ;;  %v1289_v36 = vmul.f32 %v2043_v12, %v1288_v21  ;;  %vm1007_vm13 = vweird.f32 %v3123_v40 }
 0x223   : > { %v791_v15 = vsel %vm3810_vm14, %v775_v48, -inf  ;;  %vm3811_vm15 = vmmov %vm3807_vm11  ;;  %v3288_v24 = vpop.permute.xlu1 %1428  ;;  %v3291_v48 = vpop.permute.xlu2 %1440  ;;  %vm1006_vm14 = vweird.f32 %v3050_v57  ;;  %v1013_v20 = vor.u32 1.1754944e-38, %v1012_v37  ;;  %v3837_v37 = vld [vmem:[#allocation33_spill] sm:$0xff] }
 0x224   : > { %v792_v60 = vsel %vm3811_vm15, %v776_v32, -inf  ;;  %vm3812_vm0 = vmmov %vm3807_vm11  ;;  %v987_v22 = vadd.f32 %v986_v30, %v985_v45  ;;  %v1293_v23 = vsel %vm1292_vm7, %v2043_v12, %v1289_v36  ;;  %v1003_v30 = vsub.f32 1.0, %v3213_v18 }
 0x225   : > { %v794_v13 = vsel %vm3812_vm0, %v777_v63, -inf  ;;  %vm3813_vm2 = vmmov %vm3812_vm0  ;;  %v793_v39 = vmax.f32 %v788_v10, %v792_v60  ;;  %1989 = vpush %v1293_v23  ;;  %v3825_v23 = vld [vmem:[#allocation19_spill] sm:$0xff] }
 0x226   : > { %v796_v1 = vsel %vm3813_vm2, %v778_v16, -inf  ;;  %v795_v61 = vmax.f32 %v789_v43, %v794_v13  ;;  %vm3814_vm3 = vmmov %vm3812_vm0  ;;  %v989_v56 = vadd.f32 %v988_v58, %v987_v22  ;;  %1991 = vpush %v3200_v26  ;;  %v3295_v26 = vpop.permute.xlu0 %1455  ;;  %v1265_v22 = vstv %s3011_s25  ;;  %s1747_s25 = scalar_lea.hbm %s3646_s5, %s2191_s7  ;;  %s1737_s7 = scalar_lea.sflag [#allocation3], %s236_s16 }
 0x227   : > { %v797_v2 = vmax.f32 %v790_v17, %v796_v1  ;;  %v798_v31 = vsel %vm3814_vm3, %v779_v27, -inf  ;;  %vm3815_vm4 = vmmov %vm3812_vm0  ;;  %s1751_s8 = sshll.u32 %s1747_s25, 4  ;;  %s1752_s8 = int_to_ptr.hbm [resolvable:$true] %s1751_s8 }
 0x228   : > { %v800_v38 = vsel %vm3815_vm4, %v780_v62, -inf  ;;  %vm3816_vm5 = vmmov %vm3812_vm0  ;;  %v799_v54 = vmax.f32 %v791_v15, %v798_v31  ;;  %v991_v19 = vadd.f32 %v3209_v0, %v989_v56  ;;  %v3827_v56 = vld [vmem:[#allocation26_spill] sm:$0xff]  ;;  %s2060_s10 = sshra.s32 %s1752_s8, 4  ;;  %s2061_s10 = int_to_ptr.hbm [resolvable:$true] %s2060_s10 }
 0x229   : > { %v802_v53 = vsel %vm3816_vm5, %v781_v44, -inf  ;;  %v801_v35 = vmax.f32 %v793_v39, %v800_v38  ;;  %vm3817_vm9 = vmmov %vm3812_vm0  ;;  %s2062_s11 = scalar_lea.hbm %s2061_s10, 2  ;;  %p2067_p0 = scmp.lt.s32.totalorder %s2061_s10, %s3646_s5 }
 0x22a   : > { %v803_v28 = vmax.f32 %v795_v61, %v802_v53  ;;  %v804_v11 = vsel %vm3817_vm9, %v782_v50, -inf  ;;  %vm3818_vm10 = vmmov %vm3812_vm0  ;;  %p2063_p11 = scmp.ne.s32.totalorder %s2061_s10, %s2062_s11  ;;  %p2068_p1 = scmp.lt.s32.totalorder %s2066_s9, %s2062_s11 }
 0x22b   : > { %v806_v49 = vsel %vm3818_vm10, %v783_v25, -inf  ;;  %vm3819_vm8 = vmmov %vm3812_vm0  ;;  %v805_v9 = vmax.f32 %v797_v2, %v804_v11  ;;  %v3301_v50 = vpop.permute.xlu1 %1431  ;;  %v1010_v25 = vand.u32 2147483647, %v3050_v57  ;;  %v3305_v6 = vpop.permute.xlu2 %1458  ;;  %v1267_v11 = vsub.f32 %v3825_v23, %v1265_v22 }
 0x22c   : > { %v808_v4 = vsel %vm3819_vm8, %v784_v3, -inf  ;;  %v807_v46 = vmax.f32 %v799_v54, %v806_v49  ;;  %vm3820_vm1 = vmmov %vm3812_vm0  ;;  %v3826_v49 = vld [vmem:[#allocation23_spill] sm:$0xff]  ;;  %p2064_p12 = pnand %p2063_p11, %p2178_p5  ;;  %p2069_p2 = por %p2068_p1, %p2067_p0 }
 0x22d   : > { %v809_v42 = vmax.f32 %v801_v35, %v808_v4  ;;  %v810_v7 = vsel %vm3820_vm1, %v785_v41, -inf  ;;  %vm3821_vm6 = vmmov %vm3812_vm0  ;;  %v3824_v35 = vld [vmem:[#allocation15_spill] sm:$0xff]  ;;  %v1268_v4 = vsub.f32 %v3826_v49, %v1265_v22 }
 0x22e   : > { %v812_v34 = vsel %vm3821_vm6, %v786_v29, -inf  ;;  %vm3822_vm11 = vmmov %vm3812_vm0  ;;  %v811_v58 = vmax.f32 %v803_v28, %v810_v7  ;;  %v3307_v41 = vpop.permute.xlu0 %1464  ;;  %v1266_v28 = vsub.f32 %v3824_v35, %v1265_v22  ;;  %p2065_p13 = pneg %p2064_p12 }
 0x22f   : > { %v814_v12 = vsel %vm3822_vm11, %v3067_v52, -inf  ;;  %v813_v33 = vmax.f32 %v805_v9, %v812_v34  ;;  %vm3823_vm12 = vmmov %vm3812_vm0  ;;  %v1004_v52 = vmul.f32 %v3123_v40, %v1003_v30  ;;  %vm1011_vm0 = vcmp.eq.f32.partialorder %v1010_v25, 8.507059e+37  ;;  %v3828_v30 = vld [vmem:[#allocation29_spill] sm:$0xff]  ;;  %v3829_v34 = vld [vmem:[#allocation32_spill] sm:$0xff] }
 0x230   : > { %v815_v14 = vmax.f32 %v807_v46, %v814_v12  ;;  %v992_v18 = vsel %vm3823_vm12, %v3193_v55, 0.0  ;;  %v816_v32 = vmax.f32 %v809_v42, %v811_v58  ;;  %vm1008_vm15 = vmor %vm1006_vm14, %vm1007_vm13  ;;  %v1269_v9 = vsub.f32 %v3827_v56, %v1265_v22  ;;  %v3838_v25 = vld [vmem:[#allocation35_spill] sm:$0xff]  ;;  %p2070_p3 = pnand %p2069_p2, %p2065_p13 }
 0x231   : > { %v993_v8 = vadd.f32 %v992_v18, %v991_v19  ;;  %v1005_v44 = vadd.f32 %v3123_v40, %v1004_v52  ;;  %v1270_v7 = vsub.f32 %v3828_v30, %v1265_v22  ;;  %v1271_v12 = vsub.f32 %v3829_v34, %v1265_v22  ;;  %v3830_v19 = vld [vmem:[#allocation34_spill] sm:$0xff]  ;;  %v3834_v52 = vld [vmem:[#allocation24_spill] sm:$0xff] }
 0x232   : > { %v817_v63 = vmax.f32 %v813_v33, %v815_v14  ;;  %v1272_v58 = vsub.f32 %v3830_v19, %v1265_v22  ;;  %v3831_v14 = vld [vmem:[#allocation36_spill] sm:$0xff] }
 0x233   : > { %v994_v16 = vrot.slane %v993_v8, 4  ;;  %v1009_v10 = vsel %vm1008_vm15, %v3123_v40, %v1005_v44  ;;  %v3310_v13 = vpop.permute.xlu1 %1434  ;;  %v3312_v57 = vpop.permute.xlu2 %1467  ;;  %v1273_v18 = vsub.f32 %v3831_v14, %v1265_v22 }
 0x234   : > { %v818_v5 = vmax.f32 %v816_v32, %v817_v63  ;;  %v1014_v15 = vsel %vm1011_vm0, %v1013_v20, %v1009_v10  ;;  %v3833_v63 = vld [vmem:[#allocation21_spill] sm:$0xff] }
 0x235   : > { %v995_v27 = vadd.f32 %v994_v16, %v993_v8  ;;  %v3832_v8 = vld [vmem:[#allocation17_spill] sm:$0xff]  ;;  %v1275_v16 = vsub.f32 %v3833_v63, %v1265_v22 }
 0x236   : > { %v819_v62 = vrot.slane %v818_v5, 4  ;;  %v3314_v1 = vpop.permute.xlu0 %1470  ;;  %v1274_v32 = vsub.f32 %v3832_v8, %v1265_v22  ;;  %v3840_v8 = vld [vmem:[#allocation5_spill] sm:$0xff] }
 0x237   : > { %v996_v0 = vrot.slane %v995_v27, 2 }
 0x238   : > { %v820_v3 = vmax.f32 %v818_v5, %v819_v62  ;;  %v1276_v5 = vsub.f32 %v3834_v52, %v1265_v22  ;;  %v3841_v52 = vld [vmem:[#allocation10_spill] sm:$0xff] }
 0x239   : > { %v997_v55 = vadd.f32 %v996_v0, %v995_v27  ;;  %v3835_v27 = vld [vmem:[#allocation27_spill] sm:$0xff]  ;;  %v3836_v0 = vld [vmem:[#allocation30_spill] sm:$0xff] }
 0x23a   : > { %v821_v17 = vrot.slane %v820_v3, 2  ;;  %v1277_v62 = vsub.f32 %v3835_v27, %v1265_v22  ;;  %v1278_v44 = vsub.f32 %v3836_v0, %v1265_v22  ;;  %v3848_v0 = vld [vmem:[#allocation13_spill] sm:$0xff] }
 0x23b   : > { %v998_v29 = vrot.slane %v997_v55, 1  ;;  %v3318_v2 = vpop.permute.xlu1 %1437  ;;  %v3320_v40 = vpop.permute.xlu2 %1584 }
 0x23c   : > { %v822_v60 = vmax.f32 %v820_v3, %v821_v17  ;;  %v1280_v3 = vsub.f32 %v3838_v25, %v1265_v22 }
 0x23d   : > { %v999_v43 = vadd.f32 %v998_v29, %v997_v55  ;;  %v1279_v55 = vsub.f32 %v3837_v37, %v1265_v22  ;;  %v3839_v29 = vld [vmem:[#allocation37_spill] sm:$0xff]  ;;  %v3849_v37 = vld [vmem:[#allocation14_spill] sm:$0xff] }
 0x23e   : > { %v823_v45 = vrot.slane %v822_v60, 1  ;;  %v3322_v36 = vpop.permute.xlu0 %1589  ;;  %v1281_v10 = vsub.f32 %v3839_v29, %v1265_v22  ;;  %v3851_v29 = vld [vmem:[#allocation22_spill] sm:$0xff] }
 0x23f   : > { %v1015_v21 = vmul.f32 %v1014_v15, %v999_v43 }
 0x240   : > { %v824_v39 = vmax.f32 %v822_v60, %v823_v45 }
 0x242   : > { %v3316_v61 = vadd.f32 %v1015_v21, %v824_v39 }
 0x243   : > { %v3324_v31 = vpop.permute.xlu1 %1446  ;;  %v3326_v38 = vpop.permute.xlu2 %1594 }
 0x246   : > { %v3328_v53 = vpop.permute.xlu0 %1599 }
 0x24b   : > { %v3331_v54 = vpop.permute.xlu1 %1449  ;;  %v3337_v46 = vpop.permute.xlu2 %1604 }
 0x24e   : > { %v3342_v33 = vpop.permute.xlu0 %1609 }
 0x253   : > { %v3366_v25 = vpop.permute.xlu2 %1614 }
 0x256   : > { %s1990_s13 = spop %1989 }
 0x257   : > { %v1295_v42 = vstv %s1990_s13  ;;  %s1992_s14 = spop %1991 }
 0x258   : > { %v1296_v20 = vmul.f32 %v1295_v42, %v1266_v28  ;;  %v1297_v43 = vmul.f32 %v1295_v42, %v1267_v11  ;;  %v1298_v17 = vmul.f32 %v1295_v42, %v1268_v4  ;;  %v1299_v15 = vmul.f32 %v1295_v42, %v1269_v9  ;;  %v3842_v11 = vld [vmem:[#allocation7_spill] sm:$0xff]  ;;  %v3843_v9 = vld [vmem:[#allocation12_spill] sm:$0xff]  ;;  %s1581_s15 = smax.f32 %s2112_s30, %s1992_s14  ;;  %s1749_s30 = sshll.u32 %s238_s26, 4  ;;  %s1750_s30 = int_to_ptr.vmem [resolvable:$true] %s1749_s30 }
 0x259   : > { %v1300_v21 = vmul.f32 %v1295_v42, %v1270_v7  ;;  %v1301_v60 = vmul.f32 %v1295_v42, %v1271_v12  ;;  %v1302_v45 = vmul.f32 %v1295_v42, %v1272_v58  ;;  %v1303_v39 = vmul.f32 %v1295_v42, %v1273_v18  ;;  %v3844_v12 = vld [vmem:[#allocation8_spill] sm:$0xff]  ;;  %v3845_v18 = vld [vmem:[#allocation6_spill] sm:$0xff] }
 0x25a   : > { %v1304_v35 = vmul.f32 %v1295_v42, %v1274_v32  ;;  %v1305_v23 = vmul.f32 %v1295_v42, %v1275_v16  ;;  %v1306_v49 = vmul.f32 %v1295_v42, %v1276_v5  ;;  %v1307_v56 = vmul.f32 %v1295_v42, %v1277_v62  ;;  %v3360_v16 = vpop.permute.xlu1 %1452  ;;  %v3846_v5 = vld [vmem:[#allocation9_spill] sm:$0xff]  ;;  %v3847_v62 = vld [vmem:[#allocation11_spill] sm:$0xff] }
 0x25b   : > { %v1308_v30 = vmul.f32 %v1295_v42, %v1278_v44  ;;  %v1309_v34 = vmul.f32 %v1295_v42, %v1279_v55  ;;  %v1310_v19 = vmul.f32 %v1295_v42, %v1280_v3  ;;  %v1311_v14 = vmul.f32 %v1295_v42, %v1281_v10 }
 0x25c   : > { %v1312_v63 = vmul.f32 %v1296_v20, %v3840_v8  ;;  %v1313_v22 = vmul.f32 %v1297_v43, %v3841_v52  ;;  %v1314_v28 = vmul.f32 %v1298_v17, %v2814_v59  ;;  %v1315_v4 = vmul.f32 %v1299_v15, %v3842_v11  ;;  %v3850_v59 = vld [vmem:[#allocation18_spill] sm:$0xff]  ;;  %v3852_v20 = vld [vmem:[#allocation25_spill] sm:$0xff]  ;;  %v3853_v17 = vld [vmem:[#allocation28_spill] sm:$0xff] }
 0x25d   : > { %v1316_v7 = vmul.f32 %v1300_v21, %v3843_v9  ;;  %v1317_v58 = vmul.f32 %v1301_v60, %v3844_v12  ;;  %v1318_v32 = vmul.f32 %v1302_v45, %v3845_v18  ;;  %v1319_v27 = vmul.f32 %v1303_v39, %v3846_v5  ;;  %v3372_v21 = vpop.permute.xlu0 %1619  ;;  %v3854_v60 = vld [vmem:[#allocation31_spill] sm:$0xff]  ;;  %v3855_v39 = vld [vmem:[#allocation16_spill] sm:$0xff]  ;;  %v3857_v52 = vld [vmem:[#allocation38_spill] sm:$0xff] }
 0x25e   : > { %v1320_v42 = vmul.f32 %v1304_v35, %v3847_v62  ;;  %v1321_v44 = vmul.f32 %v1305_v23, %v3848_v0  ;;  %v1322_v55 = vmul.f32 %v1306_v49, %v3849_v37  ;;  %v1323_v3 = vmul.f32 %v1307_v56, %v3850_v59  ;;  %v3856_v8 = vld [vmem:[#allocation20_spill] sm:$0xff]  ;;  %v3858_v11 = vld [vmem:[#allocation39_spill] sm:$0xff]  ;;  %v3860_v18 = vld [vmem:[#allocation41_spill] sm:$0xff] }
 0x25f   : > { %v1324_v10 = vmul.f32 %v1308_v30, %v3851_v29  ;;  %v1325_v43 = vmul.f32 %v1309_v34, %v3852_v20  ;;  %v1326_v15 = vmul.f32 %v1310_v19, %v3853_v17  ;;  %v1327_v45 = vmul.f32 %v1311_v14, %v3854_v60  ;;  %v3859_v12 = vld [vmem:[#allocation40_spill] sm:$0xff]  ;;  %v3861_v5 = vld [vmem:[#allocation42_spill] sm:$0xff]  ;;  %v3862_v19 = vld [vmem:[#allocation43_spill] sm:$0xff]  ;;  %v1625_v60 = vpop.permute.xlu2 %1624 }
 0x260   : > { %v1328_v35 = vadd.f32 %v1312_v63, %v3855_v39  ;;  %v1329_v23 = vadd.f32 %v1313_v22, %v3856_v8  ;;  %v1330_v49 = vadd.f32 %v1314_v28, %v3857_v52  ;;  %v1331_v9 = vadd.f32 %v1315_v4, %v3858_v11  ;;  %v3863_v0 = vld [vmem:[#allocation44_spill] sm:$0xff]  ;;  %v3864_v63 = vld [vmem:[#allocation45_spill] sm:$0xff]  ;;  %v3865_v22 = vld [vmem:[#allocation46_spill] sm:$0xff] }
 0x261   : > { %v1332_v56 = vadd.f32 %v1316_v7, %v3859_v12  ;;  %v1333_v30 = vadd.f32 %v1317_v58, %v3860_v18  ;;  %v1334_v34 = vadd.f32 %v1318_v32, %v3861_v5  ;;  %v3383_v62 = vadd.f32 %v1319_v27, %v3862_v19  ;;  %v3866_v4 = vld [vmem:[#allocation47_spill] sm:$0xff]  ;;  %v3867_v7 = vld [vmem:[#allocation49_spill] sm:$0xff]  ;;  %v3868_v32 = vld [vmem:[#allocation50_spill] sm:$0xff] }
 0x262   : > { %v3386_v14 = vadd.f32 %v1320_v42, %v3863_v0  ;;  %v3389_v37 = vadd.f32 %v1321_v44, %v3864_v63  ;;  %v3392_v28 = vadd.f32 %v1322_v55, %v3865_v22  ;;  %v3395_v59 = vadd.f32 %v1323_v3, %v3866_v4  ;;  %v3869_v27 = vld [vmem:[#allocation51_spill] sm:$0xff]  ;;  %v3870_v42 = vld [vmem:[#allocation48_spill] sm:$0xff] }
 0x263   : > { %v3398_v58 = vadd.f32 %v1324_v10, %v3867_v7  ;;  %v3401_v29 = vadd.f32 %v1325_v43, %v3868_v32  ;;  %v3404_v20 = vadd.f32 %v1326_v15, %v3869_v27  ;;  %v3407_v17 = vadd.f32 %v1327_v45, %v3870_v42  ;;  %v3416_v43 = vpop.permute.xlu1 %1461 }
 0x264   : > { %vm1344_vm2 = vcmp.ge.f32.partialorder %v1328_v35, 0.0  ;;  %vm1345_vm3 = vcmp.ge.f32.partialorder %v1329_v23, 0.0  ;;  %v1360_v44 = vmul.f32 0.2, %v1328_v35  ;;  %vm1346_vm4 = vcmp.ge.f32.partialorder %v1330_v49, 0.0 }
 0x265   : > { %vm1347_vm5 = vcmp.ge.f32.partialorder %v1331_v9, 0.0  ;;  %vm1348_vm7 = vcmp.ge.f32.partialorder %v1332_v56, 0.0  ;;  %v1361_v55 = vmul.f32 0.2, %v1329_v23  ;;  %vm1349_vm9 = vcmp.ge.f32.partialorder %v1333_v30, 0.0  ;;  %v3429_v52 = vpop.permute.xlu0 %1634 }
 0x266   : > { %vm1350_vm10 = vcmp.ge.f32.partialorder %v1334_v34, 0.0  ;;  %vm1351_vm8 = vcmp.ge.f32.partialorder %v3383_v62, 0.0  ;;  %vm1352_vm1 = vcmp.ge.f32.partialorder %v3386_v14, 0.0  ;;  %vm1353_vm6 = vcmp.ge.f32.partialorder %v3389_v37, 0.0 }
 0x267   : > { %vm1354_vm11 = vcmp.ge.f32.partialorder %v3392_v28, 0.0  ;;  %v1362_v3 = vmul.f32 0.2, %v1330_v49  ;;  %v3414_v10 = vstv %s1581_s15  ;;  %vm1355_vm12 = vcmp.ge.f32.partialorder %v3395_v59, 0.0 }
 0x268   : > { %vm1356_vm13 = vcmp.ge.f32.partialorder %v3398_v58, 0.0  ;;  %vm1357_vm14 = vcmp.ge.f32.partialorder %v3401_v29, 0.0  ;;  %v3422_v15 = vsel %vm1344_vm2, %v1328_v35, %v1360_v44  ;;  %vm1358_vm15 = vcmp.ge.f32.partialorder %v3404_v20, 0.0 }
 0x269   : > { %vm1359_vm0 = vcmp.ge.f32.partialorder %v3407_v17, 0.0  ;;  %v1363_v45 = vmul.f32 0.2, %v1331_v9  ;;  %v1364_v39 = vmul.f32 0.2, %v1332_v56  ;;  %v3427_v8 = vsel %vm1345_vm3, %v1329_v23, %v1361_v55 }
 0x26a   : > { %v1365_v11 = vmul.f32 0.2, %v1333_v30  ;;  %v1366_v12 = vmul.f32 0.2, %v1334_v34  ;;  %v1367_v18 = vmul.f32 0.2, %v3383_v62  ;;  %2044 = vrcp.f32 %v3414_v10 }
 0x26b   : > { %v1368_v35 = vmul.f32 0.2, %v3386_v14  ;;  %v1369_v5 = vmul.f32 0.2, %v3389_v37  ;;  %v3437_v19 = vsel %vm1346_vm4, %v1330_v49, %v1362_v3  ;;  %v1662_v23 = vmul.f32 %v3320_v40, %v3422_v15 }
 0x26c   : > { %v1370_v0 = vmul.f32 0.2, %v3392_v28  ;;  %v1371_v63 = vmul.f32 0.2, %v3395_v59  ;;  %v1372_v22 = vmul.f32 0.2, %v3398_v58  ;;  %v1663_v4 = vmul.f32 %v3322_v36, %v3427_v8 }
 0x26d   : > { %v1373_v7 = vmul.f32 0.2, %v3401_v29  ;;  %v1374_v49 = vmul.f32 0.2, %v3404_v20  ;;  %v1375_v32 = vmul.f32 0.2, %v3407_v17  ;;  %v3452_v40 = vsel %vm1347_vm5, %v1331_v9, %v1363_v45  ;;  %v1630_v45 = vpop.permute.xlu1 %1629 }
 0x26e   : > { %v3455_v27 = vsel %vm1348_vm7, %v1332_v56, %v1364_v39  ;;  %v1381_v42 = vsel %vm1349_vm9, %v1333_v30, %v1365_v11  ;;  %v1382_v44 = vsel %vm1350_vm10, %v1334_v34, %v1366_v12  ;;  %v1664_v36 = vmul.f32 %v3326_v38, %v3437_v19 }
 0x26f   : > { %vm1474_vm4 = vcmp.eq.s32.totalorder %v3301_v50, 1  ;;  %vm1477_vm2 = vcmp.eq.s32.totalorder %v3291_v48, 1  ;;  %vm1478_vm3 = vcmp.eq.s32.totalorder %v3265_v47, 1  ;;  %v1383_v9 = vsel %vm1351_vm8, %v3383_v62, %v1367_v18 }
 0x270   : > { %v1384_v56 = vsel %vm1352_vm1, %v3386_v14, %v1368_v35  ;;  %v1385_v30 = vsel %vm1353_vm6, %v3389_v37, %v1369_v5  ;;  %vm3871_vm5 = vcmask 195584   ;;  %v3474_v34 = vpop.eup %2044  ;;  %vm1475_vm7 = vcmp.eq.s32.totalorder %v3310_v13, 1 }
 0x271   : > { %v1678_v38 = vsel %vm3871_vm5, %v1662_v23, 0.0  ;;  %vm1476_vm9 = vcmp.eq.s32.totalorder %v3318_v2, 1  ;;  %v1386_v62 = vsel %vm1354_vm11, %v3392_v28, %v1370_v0  ;;  %v1387_v14 = vsel %vm1355_vm12, %v3395_v59, %v1371_v63  ;;  %vm3872_vm8 = vmmov %vm3871_vm5  ;;  %v1645_v23 = vpop.permute.xlu0 %1644 }
 0x272   : > { %v1665_v37 = vmul.f32 %v3328_v53, %v3452_v40  ;;  %v1679_v55 = vsel %vm3872_vm8, %v1663_v4, 0.0  ;;  %vm1479_vm6 = vcmp.eq.s32.totalorder %v3324_v31, 1  ;;  %vm1480_vm5 = vcmp.eq.s32.totalorder %v3331_v54, 1  ;;  %vm3873_vm12 = vmmov %vm3872_vm8 }
 0x273   : > { %v1388_v28 = vsel %vm1356_vm13, %v3398_v58, %v1372_v22  ;;  %v3498_v59 = vsel %vm1357_vm14, %v3401_v29, %v1373_v7  ;;  %v3503_v53 = vsel %vm1359_vm0, %v3407_v17, %v1375_v32  ;;  %v1680_v3 = vadd.f32 %v1679_v55, %v1678_v38  ;;  %v1640_v29 = vpop.permute.xlu2 %1639  ;;  %vm3876_vm14 = vmmov %vm3872_vm8 }
 0x274   : > { %v1666_v39 = vmul.f32 %v3337_v46, %v3455_v27  ;;  %v1667_v11 = vmul.f32 %v3342_v33, %v1381_v42  ;;  %v1668_v58 = vmul.f32 %v3366_v25, %v1382_v44  ;;  %v1681_v12 = vsel %vm3873_vm12, %v1664_v36, 0.0  ;;  %vm3878_vm13 = vmmov %vm3872_vm8 }
 0x275   : > { %v1669_v18 = vmul.f32 %v3372_v21, %v1383_v9  ;;  %v1670_v17 = vmul.f32 %v1625_v60, %v1384_v56  ;;  %v1671_v35 = vmul.f32 %v1630_v45, %v1385_v30  ;;  %v1682_v5 = vadd.f32 %v1681_v12, %v1680_v3  ;;  %vm3880_vm11 = vmmov %vm3872_vm8 }
 0x276   : > { %v3517_v46 = vsel %vm1358_vm15, %v3404_v20, %v1374_v49  ;;  %vm3874_vm0 = vcmp.eq.s32.totalorder %v3314_v1, 1  ;;  %v1672_v25 = vmul.f32 %v3429_v52, %v1386_v62  ;;  %v1683_v0 = vsel %vm3872_vm8, %v1665_v37, 0.0  ;;  %vm3877_vm15 = vmmov %vm3872_vm8 }
 0x277   : > { %v1503_v33 = vsel %vm3874_vm0, %v3503_v53, -inf  ;;  %v1673_v21 = vmul.f32 %v1640_v29, %v1387_v14  ;;  %v3524_v60 = vmul.f32 %v1645_v23, %v1388_v28  ;;  %v1684_v63 = vadd.f32 %v1683_v0, %v1682_v5  ;;  %vm3881_vm10 = vmmov %vm3872_vm8 }
 0x278   : > { %vm3875_vm12 = vcmp.eq.s32.totalorder %v3247_v51, 1  ;;  %v1685_v4 = vsel %vm3876_vm14, %v1666_v39, 0.0  ;;  %v1687_v20 = vsel %vm3877_vm15, %v1667_v11, 0.0  ;;  %v1689_v7 = vsel %vm3878_vm13, %v1668_v58, 0.0  ;;  %vm3882_vm1 = vmmov %vm3872_vm8 }
 0x279   : > { %v1488_v22 = vsel %vm3875_vm12, %v3422_v15, -inf  ;;  %vm3879_vm0 = vcmp.eq.s32.totalorder %v3288_v24, 1  ;;  %v1686_v52 = vadd.f32 %v1685_v4, %v1684_v63  ;;  %v1691_v49 = vsel %vm3872_vm8, %v1669_v18, 0.0 }
 0x27a   : > { %v1489_v1 = vsel %vm3879_vm0, %v3427_v8, -inf  ;;  %v1693_v32 = vsel %vm3880_vm11, %v1670_v17, 0.0  ;;  %v1695_v36 = vsel %vm3881_vm10, %v1671_v35, 0.0  ;;  %v1697_v51 = vsel %vm3882_vm1, %v1672_v25, 0.0 }
 0x27b   : > { %v1490_v15 = vsel %vm1474_vm4, %v3437_v19, -inf  ;;  %v1493_v38 = vsel %vm1477_vm2, %v1381_v42, -inf  ;;  %v1494_v24 = vsel %vm1478_vm3, %v1382_v44, -inf  ;;  %v1688_v8 = vadd.f32 %v1687_v20, %v1686_v52  ;;  %v1650_v42 = vpop.permute.xlu2 %1649  ;;  %v1655_v52 = vpop.permute.xlu0 %1654 }
 0x27c   : > { %v1491_v37 = vsel %vm1475_vm7, %v3452_v40, -inf  ;;  %v1492_v55 = vsel %vm1476_vm9, %v3455_v27, -inf  ;;  %vm3883_vm10 = vcmp.eq.s32.totalorder %v3295_v26, 1  ;;  %v1495_v50 = vsel %vm1479_vm6, %v1383_v9, -inf  ;;  %vm3887_vm7 = vmmov %vm3882_vm1 }
 0x27d   : > { %v1498_v3 = vsel %vm3883_vm10, %v1386_v62, -inf  ;;  %v1496_v48 = vsel %vm1480_vm5, %v1384_v56, -inf  ;;  %vm3884_vm2 = vcmp.eq.s32.totalorder %v3305_v6, 1  ;;  %vm3885_vm3 = vcmp.eq.s32.totalorder %v3307_v41, 1  ;;  %vm3888_vm9 = vmmov %vm3882_vm1 }
 0x27e   : > { %v1499_v47 = vsel %vm3884_vm2, %v1387_v14, -inf  ;;  %v1501_v13 = vsel %vm3885_vm3, %v3498_v59, -inf  ;;  %v1690_v19 = vadd.f32 %v1689_v7, %v1688_v8  ;;  %vm3886_vm4 = vcmp.eq.s32.totalorder %v3360_v16, 1  ;;  %vm3890_vm6 = vmmov %vm3887_vm7 }
 0x27f   : > { %v1497_v2 = vsel %vm3886_vm4, %v1385_v30, -inf  ;;  %v1504_v26 = vsel %vm3887_vm7, %v1488_v22, -inf  ;;  %v1505_v40 = vsel %vm3888_vm9, %v1489_v1, -inf  ;;  %vm3889_vm1 = vcmp.eq.s32.totalorder %v3416_v43, 1  ;;  %vm3891_vm5 = vmmov %vm3890_vm6 }
 0x280   : > { %v1500_v31 = vsel %vm3889_vm1, %v1388_v28, -inf  ;;  %v1506_v54 = vsel %vm3890_vm6, %v1490_v15, -inf  ;;  %v1507_v6 = vsel %vm3891_vm5, %v1491_v37, -inf  ;;  %vm3892_vm11 = vmmov %vm3891_vm5  ;;  %v1692_v41 = vadd.f32 %v1691_v49, %v1690_v19 }
 0x281   : > { %v1508_v27 = vsel %vm3892_vm11, %v1492_v55, -inf  ;;  %vm3893_vm13 = vcmp.eq.s32.totalorder %v3312_v57, 1  ;;  %vm3894_vm14 = vmmov %vm3891_vm5  ;;  %v1675_v7 = vmul.f32 %v1650_v42, %v3498_v59  ;;  %v1676_v15 = vmul.f32 %v1655_v52, %v3517_v46 }
 0x282   : > { %v1502_v16 = vsel %vm3893_vm13, %v3517_v46, -inf  ;;  %v1509_v44 = vmax.f32 %v1504_v26, %v1508_v27  ;;  %v1510_v9 = vsel %vm3894_vm14, %v1493_v38, -inf  ;;  %vm3895_vm12 = vmmov %vm3891_vm5  ;;  %v1694_v14 = vadd.f32 %v1693_v32, %v1692_v41 }
 0x283   : > { %v1511_v56 = vmax.f32 %v1505_v40, %v1510_v9  ;;  %v1512_v30 = vsel %vm3895_vm12, %v1494_v24, -inf  ;;  %vm3896_vm15 = vmmov %vm3891_vm5  ;;  %v1660_v24 = vpop.permute.xlu2 %1659  ;;  %vm1722_vm14 = vweird.f32 %v3474_v34  ;;  %vm1721_vm12 = vweird.f32 %v3414_v10 }
 0x284   : > { %v1514_v43 = vsel %vm3896_vm15, %v1495_v50, -inf  ;;  %vm3897_vm0 = vmmov %vm3891_vm5  ;;  %v1513_v28 = vmax.f32 %v1506_v54, %v1512_v30  ;;  %v1696_v29 = vadd.f32 %v1695_v36, %v1694_v14  ;;  %v1677_v59 = vmul.f32 %v1660_v24, %v3503_v53 }
 0x285   : > { %v1516_v62 = vsel %vm3897_vm0, %v1496_v48, -inf  ;;  %v1515_v45 = vmax.f32 %v1507_v6, %v1514_v43  ;;  %vm3898_vm8 = vmmov %vm3897_vm0  ;;  %v1727_v54 = vand.u32 2147483648, %v3414_v10  ;;  %v1725_v27 = vand.u32 2147483647, %v3414_v10 }
 0x286   : > { %v1517_v39 = vmax.f32 %v1509_v44, %v1516_v62  ;;  %v1518_v11 = vsel %vm3898_vm8, %v1497_v2, -inf  ;;  %vm3899_vm10 = vmmov %vm3897_vm0  ;;  %v1698_v63 = vadd.f32 %v1697_v51, %v1696_v29  ;;  %vm1732_vm8 = vcmask 1040384  }
 0x287   : > { %v1520_v58 = vsel %vm3899_vm10, %v1498_v3, -inf  ;;  %vm3900_vm2 = vmmov %vm3897_vm0  ;;  %v1519_v18 = vmax.f32 %v1511_v56, %v1518_v11  ;;  %v1728_v44 = vor.u32 1.1754944e-38, %v1727_v54  ;;  %vm1734_vm10 = vcmask 189440  }
 0x288   : > { %v1522_v57 = vsel %vm3900_vm2, %v1499_v47, -inf  ;;  %vm3901_vm3 = vmmov %vm3897_vm0  ;;  %v1521_v17 = vmax.f32 %v1513_v28, %v1520_v58 }
 0x289   : > { %v1524_v12 = vsel %vm3901_vm3, %v1500_v31, -inf  ;;  %v1523_v35 = vmax.f32 %v1515_v45, %v1522_v57  ;;  %vm3902_vm4 = vmmov %vm3897_vm0 }
 0x28a   : > { %v1525_v5 = vmax.f32 %v1517_v39, %v1524_v12  ;;  %v1526_v23 = vsel %vm3902_vm4, %v1501_v13, -inf  ;;  %vm3903_vm7 = vmmov %vm3897_vm0 }
 0x28b   : > { %v1528_v25 = vsel %vm3903_vm7, %v1502_v16, -inf  ;;  %vm3904_vm9 = vmmov %vm3897_vm0  ;;  %v1527_v22 = vmax.f32 %v1519_v18, %v1526_v23 }
 0x28c   : > { %v1530_v0 = vsel %vm3904_vm9, %v1503_v33, -inf  ;;  %v1529_v4 = vmax.f32 %v1521_v17, %v1528_v25  ;;  %vm3905_vm1 = vmmov %vm3897_vm0  ;;  %v1717_v33 = vmul.f32 %v3474_v34, %v3414_v10 }
 0x28d   : > { %v1531_v20 = vmax.f32 %v1523_v35, %v1530_v0  ;;  %v1699_v1 = vsel %vm3905_vm1, %v1673_v21, 0.0  ;;  %v1532_v32 = vmax.f32 %v1525_v5, %v1527_v22  ;;  %vm3906_vm6 = vmmov %vm3897_vm0 }
 0x28e   : > { %v1700_v49 = vadd.f32 %v1699_v1, %v1698_v63  ;;  %v1701_v38 = vsel %vm3906_vm6, %v3524_v60, 0.0  ;;  %vm3907_vm5 = vmmov %vm3897_vm0  ;;  %v1718_v46 = vsub.f32 1.0, %v1717_v33 }
 0x28f   : > { %v1533_v36 = vmax.f32 %v1529_v4, %v1531_v20  ;;  %v1703_v21 = vsel %vm3907_vm5, %v1675_v7, 0.0  ;;  %vm3908_vm11 = vmmov %vm3897_vm0 }
 0x290   : > { %v1702_v8 = vadd.f32 %v1701_v38, %v1700_v49  ;;  %v1705_v3 = vsel %vm3908_vm11, %v1676_v15, 0.0  ;;  %vm3909_vm13 = vmmov %vm3897_vm0  ;;  %v1719_v19 = vmul.f32 %v3474_v34, %v1718_v46  ;;  %vm1726_vm0 = vcmp.eq.f32.partialorder %v1725_v27, 8.507059e+37 }
 0x291   : > { %v1534_v51 = vmax.f32 %v1532_v32, %v1533_v36  ;;  %v1707_v60 = vsel %vm3909_vm13, %v1677_v59, 0.0  ;;  %vm1723_vm15 = vmor %vm1721_vm12, %vm1722_vm14 }
 0x292   : > { %v1704_v37 = vadd.f32 %v1703_v21, %v1702_v8  ;;  %v1720_v40 = vadd.f32 %v3474_v34, %v1719_v19 }
 0x293   : > { %v1535_v55 = vrot.slane %v1534_v51, 4 }
 0x294   : > { %v1706_v50 = vadd.f32 %v1705_v3, %v1704_v37  ;;  %v1724_v41 = vsel %vm1723_vm15, %v3474_v34, %v1720_v40 }
 0x295   : > { %v1536_v48 = vmax.f32 %v1534_v51, %v1535_v55  ;;  %v1729_v56 = vsel %vm1726_vm0, %v1728_v44, %v1724_v41 }
 0x296   : > { %v1708_v47 = vadd.f32 %v1707_v60, %v1706_v50 }
 0x297   : > { %v1537_v2 = vrot.slane %v1536_v48, 2 }
 0x298   : > { %v1709_v13 = vrot.slane %v1708_v47, 4 }
 0x299   : > { %v1538_v31 = vmax.f32 %v1536_v48, %v1537_v2 }
 0x29a   : > { %v1710_v26 = vadd.f32 %v1709_v13, %v1708_v47 }
 0x29b   : > { %v1539_v16 = vrot.slane %v1538_v31, 1 }
 0x29c   : > { %v1711_v53 = vrot.slane %v1710_v26, 2 }
 0x29d   : > { %v1540_v43 = vmax.f32 %v1538_v31, %v1539_v16 }
 0x29e   : > { %v1712_v6 = vadd.f32 %v1711_v53, %v1710_v26 }
 0x2a0   : > { %v1713_v42 = vrot.slane %v1712_v6, 1 }
 0x2a2   : > { %v1714_v9 = vadd.f32 %v1713_v42, %v1712_v6 }
 0x2a4   : > { %v1730_v30 = vmul.f32 %v1729_v56, %v1714_v9 }
 0x2a6   : > { %v1731_v10 = vadd.f32 %v1730_v30, %v1540_v43 }
 0x2a8   : > { %v1733_v34 = vsel %vm1732_vm8, %v3316_v61, %v1731_v10 }
 0x2a9   : > { %1735 = vst.msk [vmem:[%s238_s26] sm:$0x3] %vm1734_vm10, %v1733_v34 }
 0x2aa   : > { %2073 = shalt.err (!%p2070_p3)
}
 0x2ab   : > { %1993 = dma.vmem_to_hbm [thread:$0]  (%p2178_p5), %s1750_s30, 32, %s1752_s8, %s1737_s7  }
 0x2ac PF: > { %p1999_p4 = scmp.ge.s32.totalorder %s2108_s21, 2  ;;  %s1763_s15 = sand.u32 1, %s2096_s18  }
 0x2ad   : > { %s1764_s16 = scalar_lea.sflag [#allocation3], %s1763_s15 }
 0x2ae   : > { %p1996_p7 = pnand %p1999_p4, %p2182_p6 }
 0x2b0   : > { %p1997_p8 = pneg %p1996_p7 }
 0x2b2   : > { %2091 = dma.done.wait (%p1997_p8), %s1764_s16, 32  }
 0x2b3   : > { %2093 = vsyncadd (%p1997_p8), %s1764_s16, 4294967264  ;;  %p15_p9 = scmp.ge.s32.totalorder %s2166_s24, 4   ;;  %s3910_s18 = smov %s2100_s19 }
 0x2b4   : > { %s3911_s19 = smov %s2104_s20  ;;  %s3912_s20 = smov %s2176_s27 }
 0x2b5   : > { %s3913_s21 = smov %s2166_s24  ;;  %17 = sbr.rel (!%p15_p9) target bundleno = 3 (0x3), region = 80 }
 0x2ba   :  { %1770 = vsyncpa [#allocation3], 1 }
 0x2bb   :  { %1772 = vsyncpa [#allocation3 + $0x1], 1 }

</bundles_post_ra>
